<compile_context>
chip_gen: v7x
topology: tpu7x:2x2x1
jax: 0.10.0
libtpu: 0.0.40
codegen_flags: <defaults>
</compile_context>

<pallas_src>
from functools import partial

import jax
import jax.numpy as jnp
from jax import lax
from jax.experimental import pallas as pl
from jax.experimental.pallas import tpu as pltpu

NEG = -1e9  # python float -> inlined literal (never a captured jnp constant)


def _bf(x):
    return x.astype(jnp.bfloat16)


def _round_up(x, m):
    return ((x + m - 1) // m) * m


def _cdiv(a, b):
    return -(-a // b)


def _row_tiling(n, pref=512):
    t = min(pref, _round_up(n, 8))
    n_tiles = _cdiv(n, t)
    return t, n_tiles, n_tiles * t


def _pad_rows(x, n_pad, dtype):
    x = x.astype(dtype)
    n = x.shape[0]
    if n == n_pad:
        return x
    return jnp.zeros((n_pad,) + x.shape[1:], dtype).at[:n].set(x)


# ----------------------------------------------------------------------------
# Kernel 1: fused document-encoder projection + span-attention logits
# ----------------------------------------------------------------------------
def _encoder_kernel(e_ref, w_ref, b_ref, aw_ref, ab_ref, x_ref, alpha_ref):
    x = jnp.dot(e_ref[...], w_ref[...], preferred_element_type=jnp.float32)
    x = jnp.tanh(x + b_ref[...])                                      # (tile_t, H) f32
    x_ref[...] = x
    # (H, 1) attention projection = VPU multiply + lane reduce (no N=1 matmul)
    alpha_ref[...] = jnp.sum(x * aw_ref[...], axis=-1, keepdims=True) + ab_ref[...]


def fused_encoder(embeds, enc_w, enc_b, attn_w, attn_b):
    T, H = embeds.shape
    tile_t, n_tiles, T_pad = _row_tiling(T)
    x, alpha = pl.pallas_call(
        _encoder_kernel,
        out_shape=(jax.ShapeDtypeStruct((T_pad, H), jnp.float32),
                   jax.ShapeDtypeStruct((T_pad, 1), jnp.float32)),
        grid=(n_tiles,),
        in_specs=[
            pl.BlockSpec((tile_t, H), lambda i: (i, 0)),
            pl.BlockSpec((H, H), lambda i: (0, 0)),
            pl.BlockSpec((1, H), lambda i: (0, 0)),
            pl.BlockSpec((1, H), lambda i: (0, 0)),
            pl.BlockSpec((1, 1), lambda i: (0, 0)),
        ],
        out_specs=(pl.BlockSpec((tile_t, H), lambda i: (i, 0)),
                   pl.BlockSpec((tile_t, 1), lambda i: (i, 0))),
        compiler_params=pltpu.CompilerParams(dimension_semantics=("parallel",)),
    )(_pad_rows(embeds, T_pad, jnp.bfloat16), _bf(enc_w),
      enc_b.reshape(1, H).astype(jnp.float32),
      attn_w.reshape(1, H).astype(jnp.float32),
      attn_b.reshape(1, 1).astype(jnp.float32))
    return x[:T], alpha[:T, 0]


# ----------------------------------------------------------------------------
# Kernel 2: fused 3-layer mention FFNN (tiled over spans)
# ----------------------------------------------------------------------------
def _mention_ffnn_kernel(g_ref, w1_ref, b1_ref, w2_ref, b2_ref, w3_ref, b3_ref, o_ref):
    h = jnp.dot(g_ref[...], w1_ref[...], preferred_element_type=jnp.float32)
    h = jnp.maximum(h + b1_ref[...], 0.0)
    h = jnp.dot(_bf(h), w2_ref[...], preferred_element_type=jnp.float32)
    h = jnp.maximum(h + b2_ref[...], 0.0)
    # final (F, 1) projection = VPU multiply + lane reduce
    o_ref[...] = jnp.sum(h * w3_ref[...], axis=-1, keepdims=True) + b3_ref[...]


def fused_mention_ffnn(g, w1, b1, w2, b2, w3, b3):
    S, G = g.shape
    F = w1.shape[1]
    tile_s, n_tiles, S_pad = _row_tiling(S)
    out = pl.pallas_call(
        _mention_ffnn_kernel,
        out_shape=jax.ShapeDtypeStruct((S_pad, 1), jnp.float32),
        grid=(n_tiles,),
        in_specs=[
            pl.BlockSpec((tile_s, G), lambda i: (i, 0)),
            pl.BlockSpec((G, F), lambda i: (0, 0)),
            pl.BlockSpec((1, F), lambda i: (0, 0)),
            pl.BlockSpec((F, F), lambda i: (0, 0)),
            pl.BlockSpec((1, F), lambda i: (0, 0)),
            pl.BlockSpec((1, F), lambda i: (0, 0)),
            pl.BlockSpec((1, 1), lambda i: (0, 0)),
        ],
        out_specs=pl.BlockSpec((tile_s, 1), lambda i: (i, 0)),
        compiler_params=pltpu.CompilerParams(dimension_semantics=("parallel",)),
    )(_pad_rows(g, S_pad, jnp.bfloat16), _bf(w1),
      b1.reshape(1, F).astype(jnp.float32), _bf(w2),
      b2.reshape(1, F).astype(jnp.float32),
      w3.reshape(1, F).astype(jnp.float32),
      b3.reshape(1, 1).astype(jnp.float32))
    return out[:S, 0]


# ----------------------------------------------------------------------------
# Kernel 3: fused pair FFNN + coref-score epilogue (batched row tiles)
# ----------------------------------------------------------------------------
def _pair_coref_kernel(gr_ref, ga_ref, smr_ref, smc_ref, wa_ref, wb_ref, wc_ref,
                       b1_ref, w2_ref, b2_ref, w3_ref, o_ref, *, tile_m):
    Mc, G = ga_ref.shape
    F = wa_ref.shape[1]

    g_rows = gr_ref[...]                       # (tile_m, G) bf16  -- g_i for this row tile
    g_all = ga_ref[...]                        # (Mc, G)     bf16  -- g_j for all antecedents

    # layer-1 i-only / j-only pieces: one small matmul each, hoisted for the whole tile
    a_rows = jnp.dot(g_rows, wa_ref[...], preferred_element_type=jnp.float32)   # (tile_m, F)
    b_cols = jnp.dot(g_all, wb_ref[...], preferred_element_type=jnp.float32)    # (Mc, F)
    b_cols = b_cols + b1_ref[...]              # fold layer-1 bias once (loop-invariant)

    # pair cross term g_i*g_j built on the fly as a (tile_m*Mc, G) slab in VMEM:
    # ONE big MXU matmul instead of tile_m tiny per-row matmuls.
    cross = (g_rows[:, None, :] * g_all[None, :, :]).reshape(tile_m * Mc, G)
    c = jnp.dot(cross, wc_ref[...], preferred_element_type=jnp.float32)         # (tile_m*Mc, F)

    h1 = jnp.maximum(c.reshape(tile_m, Mc, F)
                     + a_rows[:, None, :] + b_cols[None, :, :], 0.0)
    h2 = jnp.dot(_bf(h1.reshape(tile_m * Mc, F)), w2_ref[...],
                 preferred_element_type=jnp.float32)
    h2 = jnp.maximum(h2 + b2_ref[...], 0.0)                                     # (tile_m*Mc, F)

    # final (F, 1) projection = VPU multiply + lane reduce
    s_pair = jnp.sum(h2.reshape(tile_m, Mc, F) * w3_ref[...], axis=-1)          # (tile_m, Mc)

    # coref epilogue: s_p + s_m[i] + s_m[j] (pair-bias b3 folded into smc); only j < i valid
    s = s_pair + smc_ref[...] + smr_ref[...]
    row0 = pl.program_id(0) * tile_m
    row_ids = row0 + lax.broadcasted_iota(jnp.int32, (tile_m, Mc), 0)
    col_ids = lax.broadcasted_iota(jnp.int32, (tile_m, Mc), 1)
    o_ref[...] = jnp.where(col_ids < row_ids, s, NEG)   # lane-dense full-width store


def _pick_tile_m(M, M_col, G, F):
    # VMEM budget for per-tile slabs (cross bf16 + c/h1/h2 f32) -> rows per grid step
    per_row = M_col * (2 * G + 12 * F) + 8192
    t = (6 * 1024 * 1024 // per_row) // 8 * 8
    t = max(8, min(128, t))
    t = min(t, _round_up(M, 8))                 # never more rows than needed
    if M > 8:                                   # >= 2 grid steps: v7x megacore + writeback overlap
        t = min(t, _round_up(_cdiv(M, 2), 8))
    return t


def fused_pair_coref(g, mention_scores, p_w1, p_b1, p_w2, p_b2, p_w3, p_b3):
    M, G = g.shape
    F = p_w1.shape[1]
    M_col = _round_up(M, 128)                   # lane-dense antecedent axis
    tile_m = _pick_tile_m(M, M_col, G, F)
    n_tiles = _cdiv(M, tile_m)
    M_row = n_tiles * tile_m
    M_g = max(M_row, M_col)                     # pad g / s_m so every block stays in bounds

    g_pad = _pad_rows(g, M_g, jnp.bfloat16)
    sm = mention_scores.astype(jnp.float32)
    sm_row = jnp.zeros((M_g, 1), jnp.float32).at[:M, 0].set(sm)
    sm_col = jnp.zeros((1, M_col), jnp.float32).at[0, :M].set(sm + p_b3[0])  # fold b3 once

    # split p_w1 into the [g_i | g_j | g_i*g_j] blocks of the pair-feature layer
    wa, wb, wc = _bf(p_w1[:G]), _bf(p_w1[G:2 * G]), _bf(p_w1[2 * G:])

    pair = pl.pallas_call(
        partial(_pair_coref_kernel, tile_m=tile_m),
        out_shape=jax.ShapeDtypeStruct((M_row, M_col), jnp.float32),
        grid=(n_tiles,),
        in_specs=[
            pl.BlockSpec((tile_m, G), lambda i: (i, 0)),   # g_i rows of this tile
            pl.BlockSpec((M_col, G), lambda i: (0, 0)),    # g_j for all antecedents
            pl.BlockSpec((tile_m, 1), lambda i: (i, 0)),   # s_m[i]
            pl.BlockSpec((1, M_col), lambda i: (0, 0)),    # s_m[j] + b3
            pl.BlockSpec((G, F), lambda i: (0, 0)),
            pl.BlockSpec((G, F), lambda i: (0, 0)),
            pl.BlockSpec((G, F), lambda i: (0, 0)),
            pl.BlockSpec((1, F), lambda i: (0, 0)),
            pl.BlockSpec((F, F), lambda i: (0, 0)),
            pl.BlockSpec((1, F), lambda i: (0, 0)),
            pl.BlockSpec((1, F), lambda i: (0, 0)),
        ],
        out_specs=pl.BlockSpec((tile_m, M_col), lambda i: (i, 0)),
        compiler_params=pltpu.CompilerParams(dimension_semantics=("parallel",)),
    )(g_pad, g_pad, sm_row, sm_col, wa, wb, wc,
      p_b1.reshape(1, F).astype(jnp.float32),
      _bf(p_w2), p_b2.reshape(1, F).astype(jnp.float32),
      p_w3.reshape(1, F).astype(jnp.float32))

    # dummy epsilon-antecedent column (score 0) concatenated in glue so kernel stores
    # stay lane-dense (last dim multiple of 128, offset 0).
    return jnp.concatenate([jnp.zeros((M, 1), jnp.float32), pair[:M, :M]], axis=1)


# ----------------------------------------------------------------------------
# Model pieces (glue in plain JAX, hot paths in the fused Pallas kernels above)
# ----------------------------------------------------------------------------
def init_params(key, vocab=100, hidden=32, ffnn=64):
    ks = jax.random.split(key, 12)
    s = 0.1
    G = 3 * hidden          # span-rep dim
    P = 3 * G               # pair-feature dim
    return {
        "embed_table": s * jax.random.normal(ks[0], (vocab, hidden), jnp.float32),
        "enc_w": s * jax.random.normal(ks[1], (hidden, hidden), jnp.float32),
        "enc_b": jnp.zeros((hidden,), jnp.float32),
        "attn_w": s * jax.random.normal(ks[2], (hidden, 1), jnp.float32),
        "attn_b": jnp.zeros((1,), jnp.float32),
        "m_w1": s * jax.random.normal(ks[3], (G, ffnn), jnp.float32),
        "m_b1": jnp.zeros((ffnn,), jnp.float32),
        "m_w2": s * jax.random.normal(ks[4], (ffnn, ffnn), jnp.float32),
        "m_b2": jnp.zeros((ffnn,), jnp.float32),
        "m_w3": s * jax.random.normal(ks[5], (ffnn, 1), jnp.float32),
        "m_b3": jnp.zeros((1,), jnp.float32),
        "p_w1": s * jax.random.normal(ks[6], (P, ffnn), jnp.float32),
        "p_b1": jnp.zeros((ffnn,), jnp.float32),
        "p_w2": s * jax.random.normal(ks[7], (ffnn, ffnn), jnp.float32),
        "p_b2": jnp.zeros((ffnn,), jnp.float32),
        "p_w3": s * jax.random.normal(ks[8], (ffnn, 1), jnp.float32),
        "p_b3": jnp.zeros((1,), jnp.float32),
    }


def document_encoder(params, doc_tokens):
    # TODO(synk): the original DocumentEncoder wraps a pretrained tokenizer/transformer;
    # replaced here with an embedding lookup + one fused Pallas projection/attention kernel.
    embeds = params["embed_table"][doc_tokens]                       # (T, H) gather glue
    return fused_encoder(embeds, params["enc_w"], params["enc_b"],
                         params["attn_w"], params["attn_b"])


def mention_scorer(params, embeds, alpha, *, max_width=4, prune_p=0.4, K=250):
    T, H = embeds.shape
    L = max_width
    starts = jnp.repeat(jnp.arange(T), L)                            # (T*L,)
    widths = jnp.tile(jnp.arange(1, L + 1), T)                       # (T*L,)
    ends = starts + widths - 1
    valid = ends < T
    ends_c = jnp.minimum(ends, T - 1)

    # span-internal attention (logits from the fused encoder kernel; softmax is glue)
    tok_idx = starts[:, None] + jnp.arange(L)[None, :]               # (S, L)
    in_span = (jnp.arange(L)[None, :] < widths[:, None]) & (tok_idx < T)
    tok_idx_c = jnp.minimum(tok_idx, T - 1)
    a = jnp.where(in_span, alpha[tok_idx_c], NEG)
    a = jax.nn.softmax(a, axis=-1)                                   # (S, L)
    x_attn = jnp.einsum("sl,sld->sd", a, embeds[tok_idx_c])          # (S, H)

    g = jnp.concatenate([embeds[starts], embeds[ends_c], x_attn], axis=-1)  # (S, 3H)

    scores = fused_mention_ffnn(g, params["m_w1"], params["m_b1"],
                                params["m_w2"], params["m_b2"],
                                params["m_w3"], params["m_b3"])      # (S,)
    scores = jnp.where(valid, scores, NEG)

    # prune to top-M spans (data-dependent top-k stays in JAX glue); clamp M to the
    # number of valid spans so top_k never selects a masked (-1e9) span.
    num_valid = sum(min(L, T - s) for s in range(T))
    M = max(1, min(K, int(prune_p * T), num_valid))
    _, top_idx = jax.lax.top_k(scores, M)
    spans = jnp.stack([starts[top_idx], ends_c[top_idx]], axis=-1)   # (M, 2)
    return spans, g[top_idx], scores[top_idx]


def mention_link_scorer(params, spans, g_i, mention_scores):
    coref_scores = fused_pair_coref(g_i, mention_scores,
                                    params["p_w1"], params["p_b1"],
                                    params["p_w2"], params["p_b2"],
                                    params["p_w3"], params["p_b3"])  # (M, M+1)
    return spans, coref_scores


def coref_scorer_forward(params, doc_tokens):
    embeds, alpha = document_encoder(params, doc_tokens)
    spans, g_i, mention_scores = mention_scorer(params, embeds, alpha, K=250)
    spans, coref_scores = mention_link_scorer(params, spans, g_i, mention_scores)
    return spans, coref_scores


# ----------------------------------------------------------------------------
if __name__ == "__main__":
    key = jax.random.PRNGKey(0)
    pkey, dkey = jax.random.split(key)

    T = 16        # document length (tokens)
    H = 32        # hidden size
    params = init_params(pkey, vocab=100, hidden=H, ffnn=64)
    doc_tokens = jax.random.randint(dkey, (T,), 0, 100, dtype=jnp.int32)

    fwd = jax.jit(coref_scorer_forward)
    spans, coref_scores = fwd(params, doc_tokens)
    jax.block_until_ready((spans, coref_scores))

    assert spans.shape == (6, 2)            # M = int(0.4 * 16) = 6 pruned spans
    assert coref_scores.shape == (6, 7)     # (M, M+1) with dummy-epsilon column
    assert bool(jnp.all(coref_scores[:, 0] == 0.0))
    print("KERNEL_OK")
</pallas_src>

<mosaic_0001>
module attributes {stable_mosaic.version = 11 : i64} {
  func.func @_encoder_kernel(%arg0: i32, %arg1: memref<16x32xbf16, #tpu.memory_space<vmem>>, %arg2: memref<32x32xbf16, #tpu.memory_space<vmem>>, %arg3: memref<1x32xf32, #tpu.memory_space<vmem>>, %arg4: memref<1x32xf32, #tpu.memory_space<vmem>>, %arg5: memref<1x1xf32, #tpu.memory_space<vmem>>, %arg6: memref<16x32xf32, #tpu.memory_space<vmem>>, %arg7: memref<16x1xf32, #tpu.memory_space<vmem>>) attributes {dimension_semantics = [#tpu.dimension_semantics<parallel>], iteration_bounds = array<i64: 1>, scalar_prefetch = 0 : i64, scratch_operands = 0 : i64, tpu.core_type = #tpu.core_type<tc>, window_params = [{transform_indices = @transform_0, window_bounds = array<i64: 16, 32>}, {pipeline_mode = #tpu.pipeline_mode<synchronous>, transform_indices = @transform_1, window_bounds = array<i64: 32, 32>}, {pipeline_mode = #tpu.pipeline_mode<synchronous>, transform_indices = @transform_2, window_bounds = array<i64: 1, 32>}, {pipeline_mode = #tpu.pipeline_mode<synchronous>, transform_indices = @transform_3, window_bounds = array<i64: 1, 32>}, {pipeline_mode = #tpu.pipeline_mode<synchronous>, transform_indices = @transform_4, window_bounds = array<i64: 1, 1>}, {transform_indices = @transform_5, window_bounds = array<i64: 16, 32>}, {transform_indices = @transform_6, window_bounds = array<i64: 16, 1>}]} {
    %c0 = arith.constant 0 : index
    %c0_0 = arith.constant 0 : index
    %0 = vector.load %arg1[%c0, %c0_0] : memref<16x32xbf16, #tpu.memory_space<vmem>>, vector<16x32xbf16>
    %c0_1 = arith.constant 0 : index
    %c0_2 = arith.constant 0 : index
    %1 = vector.load %arg2[%c0_1, %c0_2] : memref<32x32xbf16, #tpu.memory_space<vmem>>, vector<32x32xbf16>
    %cst = arith.constant dense<0.000000e+00> : vector<16x32xf32>
    %2 = tpu.matmul %0, %1, %cst {dimension_numbers = #tpu.dot_dimension_numbers<[1], [0], [0], [1], [0, 0, 1, 1], [], []>} : vector<16x32xbf16>, vector<32x32xbf16>, vector<16x32xf32> -> vector<16x32xf32>
    %c0_3 = arith.constant 0 : index
    %c0_4 = arith.constant 0 : index
    %3 = vector.load %arg3[%c0_3, %c0_4] : memref<1x32xf32, #tpu.memory_space<vmem>>, vector<1x32xf32>
    %4 = vector.broadcast %3 : vector<1x32xf32> to vector<16x32xf32>
    %5 = arith.addf %2, %4 : vector<16x32xf32>
    %6 = math.tanh %5 : vector<16x32xf32>
    %c0_5 = arith.constant 0 : index
    %c0_6 = arith.constant 0 : index
    %7 = vector.load %arg6[%c0_5, %c0_6] : memref<16x32xf32, #tpu.memory_space<vmem>>, vector<16x32xf32>
    tpu.vector_store %arg6[%c0_5, %c0_6], %6 {strides = array<i32>} : memref<16x32xf32, #tpu.memory_space<vmem>>, vector<16x32xf32>,
    %c0_7 = arith.constant 0 : index
    %c0_8 = arith.constant 0 : index
    %8 = vector.load %arg4[%c0_7, %c0_8] : memref<1x32xf32, #tpu.memory_space<vmem>>, vector<1x32xf32>
    %9 = vector.broadcast %8 : vector<1x32xf32> to vector<16x32xf32>
    %10 = arith.mulf %6, %9 : vector<16x32xf32>
    %cst_9 = arith.constant dense<0.000000e+00> : vector<16xf32>
    %11 = vector.multi_reduction <add>, %10, %cst_9 [1] : vector<16x32xf32> to vector<16xf32>
    %12 = vector.shape_cast %11 : vector<16xf32> to vector<16x1xf32>
    %c0_10 = arith.constant 0 : index
    %c0_11 = arith.constant 0 : index
    %13 = vector.load %arg5[%c0_10, %c0_11] : memref<1x1xf32, #tpu.memory_space<vmem>>, vector<1x1xf32>
    %14 = vector.broadcast %13 : vector<1x1xf32> to vector<16x1xf32>
    %15 = arith.addf %12, %14 : vector<16x1xf32>
    %c0_12 = arith.constant 0 : index
    %c0_13 = arith.constant 0 : index
    %16 = vector.load %arg7[%c0_12, %c0_13] : memref<16x1xf32, #tpu.memory_space<vmem>>, vector<16x1xf32>
    tpu.vector_store %arg7[%c0_12, %c0_13], %15 {strides = array<i32>} : memref<16x1xf32, #tpu.memory_space<vmem>>, vector<16x1xf32>,
    return
  }
  func.func @transform_0(%arg0: i32) -> (i32, i32) {
    %c0_i32 = arith.constant 0 : i32
    %c0_i32_0 = arith.constant 0 : i32
    return %arg0, %c0_i32 : i32, i32
  }
  func.func @transform_1(%arg0: i32) -> (i32, i32) {
    %c0_i32 = arith.constant 0 : i32
    %c0_i32_0 = arith.constant 0 : i32
    %c0_i32_1 = arith.constant 0 : i32
    return %c0_i32, %c0_i32_0 : i32, i32
  }
  func.func @transform_2(%arg0: i32) -> (i32, i32) {
    %c0_i32 = arith.constant 0 : i32
    %c0_i32_0 = arith.constant 0 : i32
    %c0_i32_1 = arith.constant 0 : i32
    return %c0_i32, %c0_i32_0 : i32, i32
  }
  func.func @transform_3(%arg0: i32) -> (i32, i32) {
    %c0_i32 = arith.constant 0 : i32
    %c0_i32_0 = arith.constant 0 : i32
    %c0_i32_1 = arith.constant 0 : i32
    return %c0_i32, %c0_i32_0 : i32, i32
  }
  func.func @transform_4(%arg0: i32) -> (i32, i32) {
    %c0_i32 = arith.constant 0 : i32
    %c0_i32_0 = arith.constant 0 : i32
    %c0_i32_1 = arith.constant 0 : i32
    return %c0_i32, %c0_i32_0 : i32, i32
  }
  func.func @transform_5(%arg0: i32) -> (i32, i32) {
    %c0_i32 = arith.constant 0 : i32
    %c0_i32_0 = arith.constant 0 : i32
    return %arg0, %c0_i32 : i32, i32
  }
  func.func @transform_6(%arg0: i32) -> (i32, i32) {
    %c0_i32 = arith.constant 0 : i32
    %c0_i32_0 = arith.constant 0 : i32
    return %arg0, %c0_i32 : i32, i32
  }
}

module attributes {stable_mosaic.version = 11 : i64} {
  func.func @_mention_ffnn_kernel(%arg0: i32, %arg1: memref<64x96xbf16, #tpu.memory_space<vmem>>, %arg2: memref<96x64xbf16, #tpu.memory_space<vmem>>, %arg3: memref<1x64xf32, #tpu.memory_space<vmem>>, %arg4: memref<64x64xbf16, #tpu.memory_space<vmem>>, %arg5: memref<1x64xf32, #tpu.memory_space<vmem>>, %arg6: memref<1x64xf32, #tpu.memory_space<vmem>>, %arg7: memref<1x1xf32, #tpu.memory_space<vmem>>, %arg8: memref<64x1xf32, #tpu.memory_space<vmem>>) attributes {dimension_semantics = [#tpu.dimension_semantics<parallel>], iteration_bounds = array<i64: 1>, scalar_prefetch = 0 : i64, scratch_operands = 0 : i64, tpu.core_type = #tpu.core_type<tc>, window_params = [{transform_indices = @transform_0, window_bounds = array<i64: 64, 96>}, {pipeline_mode = #tpu.pipeline_mode<synchronous>, transform_indices = @transform_1, window_bounds = array<i64: 96, 64>}, {pipeline_mode = #tpu.pipeline_mode<synchronous>, transform_indices = @transform_2, window_bounds = array<i64: 1, 64>}, {pipeline_mode = #tpu.pipeline_mode<synchronous>, transform_indices = @transform_3, window_bounds = array<i64: 64, 64>}, {pipeline_mode = #tpu.pipeline_mode<synchronous>, transform_indices = @transform_4, window_bounds = array<i64: 1, 64>}, {pipeline_mode = #tpu.pipeline_mode<synchronous>, transform_indices = @transform_5, window_bounds = array<i64: 1, 64>}, {pipeline_mode = #tpu.pipeline_mode<synchronous>, transform_indices = @transform_6, window_bounds = array<i64: 1, 1>}, {transform_indices = @transform_7, window_bounds = array<i64: 64, 1>}]} {
    %c0 = arith.constant 0 : index
    %c0_0 = arith.constant 0 : index
    %0 = vector.load %arg1[%c0, %c0_0] : memref<64x96xbf16, #tpu.memory_space<vmem>>, vector<64x96xbf16>
    %c0_1 = arith.constant 0 : index
    %c0_2 = arith.constant 0 : index
    %1 = vector.load %arg2[%c0_1, %c0_2] : memref<96x64xbf16, #tpu.memory_space<vmem>>, vector<96x64xbf16>
    %cst = arith.constant dense<0.000000e+00> : vector<64x64xf32>
    %2 = tpu.matmul %0, %1, %cst {dimension_numbers = #tpu.dot_dimension_numbers<[1], [0], [0], [1], [0, 0, 1, 1], [], []>} : vector<64x96xbf16>, vector<96x64xbf16>, vector<64x64xf32> -> vector<64x64xf32>
    %c0_3 = arith.constant 0 : index
    %c0_4 = arith.constant 0 : index
    %3 = vector.load %arg3[%c0_3, %c0_4] : memref<1x64xf32, #tpu.memory_space<vmem>>, vector<1x64xf32>
    %4 = vector.broadcast %3 : vector<1x64xf32> to vector<64x64xf32>
    %5 = arith.addf %2, %4 : vector<64x64xf32>
    %cst_5 = arith.constant 0.000000e+00 : f32
    %6 = vector.broadcast %cst_5 : f32 to vector<64x64xf32>
    %7 = arith.maximumf %5, %6 : vector<64x64xf32>
    %8 = arith.truncf %7 : vector<64x64xf32> to vector<64x64xbf16>
    %c0_6 = arith.constant 0 : index
    %c0_7 = arith.constant 0 : index
    %9 = vector.load %arg4[%c0_6, %c0_7] : memref<64x64xbf16, #tpu.memory_space<vmem>>, vector<64x64xbf16>
    %cst_8 = arith.constant dense<0.000000e+00> : vector<64x64xf32>
    %10 = tpu.matmul %8, %9, %cst_8 {dimension_numbers = #tpu.dot_dimension_numbers<[1], [0], [0], [1], [0, 0, 1, 1], [], []>} : vector<64x64xbf16>, vector<64x64xbf16>, vector<64x64xf32> -> vector<64x64xf32>
    %c0_9 = arith.constant 0 : index
    %c0_10 = arith.constant 0 : index
    %11 = vector.load %arg5[%c0_9, %c0_10] : memref<1x64xf32, #tpu.memory_space<vmem>>, vector<1x64xf32>
    %12 = vector.broadcast %11 : vector<1x64xf32> to vector<64x64xf32>
    %13 = arith.addf %10, %12 : vector<64x64xf32>
    %cst_11 = arith.constant 0.000000e+00 : f32
    %14 = vector.broadcast %cst_11 : f32 to vector<64x64xf32>
    %15 = arith.maximumf %13, %14 : vector<64x64xf32>
    %c0_12 = arith.constant 0 : index
    %c0_13 = arith.constant 0 : index
    %16 = vector.load %arg6[%c0_12, %c0_13] : memref<1x64xf32, #tpu.memory_space<vmem>>, vector<1x64xf32>
    %17 = vector.broadcast %16 : vector<1x64xf32> to vector<64x64xf32>
    %18 = arith.mulf %15, %17 : vector<64x64xf32>
    %cst_14 = arith.constant dense<0.000000e+00> : vector<64xf32>
    %19 = vector.multi_reduction <add>, %18, %cst_14 [1] : vector<64x64xf32> to vector<64xf32>
    %20 = vector.shape_cast %19 : vector<64xf32> to vector<64x1xf32>
    %c0_15 = arith.constant 0 : index
    %c0_16 = arith.constant 0 : index
    %21 = vector.load %arg7[%c0_15, %c0_16] : memref<1x1xf32, #tpu.memory_space<vmem>>, vector<1x1xf32>
    %22 = vector.broadcast %21 : vector<1x1xf32> to vector<64x1xf32>
    %23 = arith.addf %20, %22 : vector<64x1xf32>
    %c0_17 = arith.constant 0 : index
    %c0_18 = arith.constant 0 : index
    %24 = vector.load %arg8[%c0_17, %c0_18] : memref<64x1xf32, #tpu.memory_space<vmem>>, vector<64x1xf32>
    tpu.vector_store %arg8[%c0_17, %c0_18], %23 {strides = array<i32>} : memref<64x1xf32, #tpu.memory_space<vmem>>, vector<64x1xf32>,
    return
  }
  func.func @transform_0(%arg0: i32) -> (i32, i32) {
    %c0_i32 = arith.constant 0 : i32
    %c0_i32_0 = arith.constant 0 : i32
    return %arg0, %c0_i32 : i32, i32
  }
  func.func @transform_1(%arg0: i32) -> (i32, i32) {
    %c0_i32 = arith.constant 0 : i32
    %c0_i32_0 = arith.constant 0 : i32
    %c0_i32_1 = arith.constant 0 : i32
    return %c0_i32, %c0_i32_0 : i32, i32
  }
  func.func @transform_2(%arg0: i32) -> (i32, i32) {
    %c0_i32 = arith.constant 0 : i32
    %c0_i32_0 = arith.constant 0 : i32
    %c0_i32_1 = arith.constant 0 : i32
    return %c0_i32, %c0_i32_0 : i32, i32
  }
  func.func @transform_3(%arg0: i32) -> (i32, i32) {
    %c0_i32 = arith.constant 0 : i32
    %c0_i32_0 = arith.constant 0 : i32
    %c0_i32_1 = arith.constant 0 : i32
    return %c0_i32, %c0_i32_0 : i32, i32
  }
  func.func @transform_4(%arg0: i32) -> (i32, i32) {
    %c0_i32 = arith.constant 0 : i32
    %c0_i32_0 = arith.constant 0 : i32
    %c0_i32_1 = arith.constant 0 : i32
    return %c0_i32, %c0_i32_0 : i32, i32
  }
  func.func @transform_5(%arg0: i32) -> (i32, i32) {
    %c0_i32 = arith.constant 0 : i32
    %c0_i32_0 = arith.constant 0 : i32
    %c0_i32_1 = arith.constant 0 : i32
    return %c0_i32, %c0_i32_0 : i32, i32
  }
  func.func @transform_6(%arg0: i32) -> (i32, i32) {
    %c0_i32 = arith.constant 0 : i32
    %c0_i32_0 = arith.constant 0 : i32
    %c0_i32_1 = arith.constant 0 : i32
    return %c0_i32, %c0_i32_0 : i32, i32
  }
  func.func @transform_7(%arg0: i32) -> (i32, i32) {
    %c0_i32 = arith.constant 0 : i32
    %c0_i32_0 = arith.constant 0 : i32
    return %arg0, %c0_i32 : i32, i32
  }
}

module attributes {stable_mosaic.version = 11 : i64} {
  func.func @_pair_coref_kernel(%arg0: i32, %arg1: memref<8x96xbf16, #tpu.memory_space<vmem>>, %arg2: memref<128x96xbf16, #tpu.memory_space<vmem>>, %arg3: memref<8x1xf32, #tpu.memory_space<vmem>>, %arg4: memref<1x128xf32, #tpu.memory_space<vmem>>, %arg5: memref<96x64xbf16, #tpu.memory_space<vmem>>, %arg6: memref<96x64xbf16, #tpu.memory_space<vmem>>, %arg7: memref<96x64xbf16, #tpu.memory_space<vmem>>, %arg8: memref<1x64xf32, #tpu.memory_space<vmem>>, %arg9: memref<64x64xbf16, #tpu.memory_space<vmem>>, %arg10: memref<1x64xf32, #tpu.memory_space<vmem>>, %arg11: memref<1x64xf32, #tpu.memory_space<vmem>>, %arg12: memref<8x128xf32, #tpu.memory_space<vmem>>) attributes {dimension_semantics = [#tpu.dimension_semantics<parallel>], iteration_bounds = array<i64: 1>, scalar_prefetch = 0 : i64, scratch_operands = 0 : i64, tpu.core_type = #tpu.core_type<tc>, window_params = [{transform_indices = @transform_0, window_bounds = array<i64: 8, 96>}, {pipeline_mode = #tpu.pipeline_mode<synchronous>, transform_indices = @transform_1, window_bounds = array<i64: 128, 96>}, {transform_indices = @transform_2, window_bounds = array<i64: 8, 1>}, {pipeline_mode = #tpu.pipeline_mode<synchronous>, transform_indices = @transform_3, window_bounds = array<i64: 1, 128>}, {pipeline_mode = #tpu.pipeline_mode<synchronous>, transform_indices = @transform_4, window_bounds = array<i64: 96, 64>}, {pipeline_mode = #tpu.pipeline_mode<synchronous>, transform_indices = @transform_5, window_bounds = array<i64: 96, 64>}, {pipeline_mode = #tpu.pipeline_mode<synchronous>, transform_indices = @transform_6, window_bounds = array<i64: 96, 64>}, {pipeline_mode = #tpu.pipeline_mode<synchronous>, transform_indices = @transform_7, window_bounds = array<i64: 1, 64>}, {pipeline_mode = #tpu.pipeline_mode<synchronous>, transform_indices = @transform_8, window_bounds = array<i64: 64, 64>}, {pipeline_mode = #tpu.pipeline_mode<synchronous>, transform_indices = @transform_9, window_bounds = array<i64: 1, 64>}, {pipeline_mode = #tpu.pipeline_mode<synchronous>, transform_indices = @transform_10, window_bounds = array<i64: 1, 64>}, {transform_indices = @transform_11, window_bounds = array<i64: 8, 128>}]} {
    %c0 = arith.constant 0 : index
    %c0_0 = arith.constant 0 : index
    %0 = vector.load %arg1[%c0, %c0_0] : memref<8x96xbf16, #tpu.memory_space<vmem>>, vector<8x96xbf16>
    %c0_1 = arith.constant 0 : index
    %c0_2 = arith.constant 0 : index
    %1 = vector.load %arg2[%c0_1, %c0_2] : memref<128x96xbf16, #tpu.memory_space<vmem>>, vector<128x96xbf16>
    %c0_3 = arith.constant 0 : index
    %c0_4 = arith.constant 0 : index
    %2 = vector.load %arg5[%c0_3, %c0_4] : memref<96x64xbf16, #tpu.memory_space<vmem>>, vector<96x64xbf16>
    %cst = arith.constant dense<0.000000e+00> : vector<8x64xf32>
    %3 = tpu.matmul %0, %2, %cst {dimension_numbers = #tpu.dot_dimension_numbers<[1], [0], [0], [1], [0, 0, 1, 1], [], []>} : vector<8x96xbf16>, vector<96x64xbf16>, vector<8x64xf32> -> vector<8x64xf32>
    %c0_5 = arith.constant 0 : index
    %c0_6 = arith.constant 0 : index
    %4 = vector.load %arg6[%c0_5, %c0_6] : memref<96x64xbf16, #tpu.memory_space<vmem>>, vector<96x64xbf16>
    %cst_7 = arith.constant dense<0.000000e+00> : vector<128x64xf32>
    %5 = tpu.matmul %1, %4, %cst_7 {dimension_numbers = #tpu.dot_dimension_numbers<[1], [0], [0], [1], [0, 0, 1, 1], [], []>} : vector<128x96xbf16>, vector<96x64xbf16>, vector<128x64xf32> -> vector<128x64xf32>
    %c0_8 = arith.constant 0 : index
    %c0_9 = arith.constant 0 : index
    %6 = vector.load %arg8[%c0_8, %c0_9] : memref<1x64xf32, #tpu.memory_space<vmem>>, vector<1x64xf32>
    %7 = vector.broadcast %6 : vector<1x64xf32> to vector<128x64xf32>
    %8 = arith.addf %5, %7 : vector<128x64xf32>
    %9 = vector.shape_cast %0 : vector<8x96xbf16> to vector<8x1x96xbf16>
    %10 = vector.shape_cast %1 : vector<128x96xbf16> to vector<1x128x96xbf16>
    %11 = vector.broadcast %9 : vector<8x1x96xbf16> to vector<8x128x96xbf16>
    %12 = vector.broadcast %10 : vector<1x128x96xbf16> to vector<8x128x96xbf16>
    %13 = arith.mulf %11, %12 : vector<8x128x96xbf16>
    %14 = vector.shape_cast %13 : vector<8x128x96xbf16> to vector<1024x96xbf16>
    %c0_10 = arith.constant 0 : index
    %c0_11 = arith.constant 0 : index
    %15 = vector.load %arg7[%c0_10, %c0_11] : memref<96x64xbf16, #tpu.memory_space<vmem>>, vector<96x64xbf16>
    %cst_12 = arith.constant dense<0.000000e+00> : vector<1024x64xf32>
    %16 = tpu.matmul %14, %15, %cst_12 {dimension_numbers = #tpu.dot_dimension_numbers<[1], [0], [0], [1], [0, 0, 1, 1], [], []>} : vector<1024x96xbf16>, vector<96x64xbf16>, vector<1024x64xf32> -> vector<1024x64xf32>
    %17 = vector.shape_cast %16 : vector<1024x64xf32> to vector<8x128x64xf32>
    %18 = vector.shape_cast %3 : vector<8x64xf32> to vector<8x1x64xf32>
    %19 = vector.broadcast %18 : vector<8x1x64xf32> to vector<8x128x64xf32>
    %20 = arith.addf %17, %19 : vector<8x128x64xf32>
    %21 = vector.shape_cast %8 : vector<128x64xf32> to vector<1x128x64xf32>
    %22 = vector.broadcast %21 : vector<1x128x64xf32> to vector<8x128x64xf32>
    %23 = arith.addf %20, %22 : vector<8x128x64xf32>
    %cst_13 = arith.constant 0.000000e+00 : f32
    %24 = vector.broadcast %cst_13 : f32 to vector<8x128x64xf32>
    %25 = arith.maximumf %23, %24 : vector<8x128x64xf32>
    %26 = vector.shape_cast %25 : vector<8x128x64xf32> to vector<1024x64xf32>
    %27 = arith.truncf %26 : vector<1024x64xf32> to vector<1024x64xbf16>
    %c0_14 = arith.constant 0 : index
    %c0_15 = arith.constant 0 : index
    %28 = vector.load %arg9[%c0_14, %c0_15] : memref<64x64xbf16, #tpu.memory_space<vmem>>, vector<64x64xbf16>
    %cst_16 = arith.constant dense<0.000000e+00> : vector<1024x64xf32>
    %29 = tpu.matmul %27, %28, %cst_16 {dimension_numbers = #tpu.dot_dimension_numbers<[1], [0], [0], [1], [0, 0, 1, 1], [], []>} : vector<1024x64xbf16>, vector<64x64xbf16>, vector<1024x64xf32> -> vector<1024x64xf32>
    %c0_17 = arith.constant 0 : index
    %c0_18 = arith.constant 0 : index
    %30 = vector.load %arg10[%c0_17, %c0_18] : memref<1x64xf32, #tpu.memory_space<vmem>>, vector<1x64xf32>
    %31 = vector.broadcast %30 : vector<1x64xf32> to vector<1024x64xf32>
    %32 = arith.addf %29, %31 : vector<1024x64xf32>
    %cst_19 = arith.constant 0.000000e+00 : f32
    %33 = vector.broadcast %cst_19 : f32 to vector<1024x64xf32>
    %34 = arith.maximumf %32, %33 : vector<1024x64xf32>
    %35 = vector.shape_cast %34 : vector<1024x64xf32> to vector<8x128x64xf32>
    %c0_20 = arith.constant 0 : index
    %c0_21 = arith.constant 0 : index
    %36 = vector.load %arg11[%c0_20, %c0_21] : memref<1x64xf32, #tpu.memory_space<vmem>>, vector<1x64xf32>
    %37 = vector.shape_cast %36 : vector<1x64xf32> to vector<1x1x64xf32>
    %38 = vector.broadcast %37 : vector<1x1x64xf32> to vector<8x128x64xf32>
    %39 = arith.mulf %35, %38 : vector<8x128x64xf32>
    %cst_22 = arith.constant dense<0.000000e+00> : vector<8x128xf32>
    %40 = vector.multi_reduction <add>, %39, %cst_22 [2] : vector<8x128x64xf32> to vector<8x128xf32>
    %c0_23 = arith.constant 0 : index
    %c0_24 = arith.constant 0 : index
    %41 = vector.load %arg4[%c0_23, %c0_24] : memref<1x128xf32, #tpu.memory_space<vmem>>, vector<1x128xf32>
    %42 = vector.broadcast %41 : vector<1x128xf32> to vector<8x128xf32>
    %43 = arith.addf %40, %42 : vector<8x128xf32>
    %c0_25 = arith.constant 0 : index
    %c0_26 = arith.constant 0 : index
    %44 = vector.load %arg3[%c0_25, %c0_26] : memref<8x1xf32, #tpu.memory_space<vmem>>, vector<8x1xf32>
    %45 = vector.broadcast %44 : vector<8x1xf32> to vector<8x128xf32>
    %46 = arith.addf %43, %45 : vector<8x128xf32>
    %c8_i32 = arith.constant 8 : i32
    %47 = arith.muli %arg0, %c8_i32 : i32
    %48 = tpu.iota {dimensions = array<i32: 0>} : vector<8x128xi32>
    %49 = vector.broadcast %47 : i32 to vector<8x128xi32>
    %50 = arith.addi %49, %48 : vector<8x128xi32>
    %51 = tpu.iota {dimensions = array<i32: 1>} : vector<8x128xi32>
    %52 = arith.cmpi slt, %51, %50 : vector<8x128xi32>
    %cst_27 = arith.constant -1.000000e+09 : f32
    %53 = vector.broadcast %cst_27 : f32 to vector<8x128xf32>
    %54 = arith.select %52, %46, %53 : vector<8x128xi1>, vector<8x128xf32>
    %c0_28 = arith.constant 0 : index
    %c0_29 = arith.constant 0 : index
    %55 = vector.load %arg12[%c0_28, %c0_29] : memref<8x128xf32, #tpu.memory_space<vmem>>, vector<8x128xf32>
    tpu.vector_store %arg12[%c0_28, %c0_29], %54 {strides = array<i32>} : memref<8x128xf32, #tpu.memory_space<vmem>>, vector<8x128xf32>,
    return
  }
  func.func @transform_0(%arg0: i32) -> (i32, i32) {
    %c0_i32 = arith.constant 0 : i32
    %c0_i32_0 = arith.constant 0 : i32
    return %arg0, %c0_i32 : i32, i32
  }
  func.func @transform_1(%arg0: i32) -> (i32, i32) {
    %c0_i32 = arith.constant 0 : i32
    %c0_i32_0 = arith.constant 0 : i32
    %c0_i32_1 = arith.constant 0 : i32
    return %c0_i32, %c0_i32_0 : i32, i32
  }
  func.func @transform_2(%arg0: i32) -> (i32, i32) {
    %c0_i32 = arith.constant 0 : i32
    %c0_i32_0 = arith.constant 0 : i32
    return %arg0, %c0_i32 : i32, i32
  }
  func.func @transform_3(%arg0: i32) -> (i32, i32) {
    %c0_i32 = arith.constant 0 : i32
    %c0_i32_0 = arith.constant 0 : i32
    %c0_i32_1 = arith.constant 0 : i32
    return %c0_i32, %c0_i32_0 : i32, i32
  }
  func.func @transform_4(%arg0: i32) -> (i32, i32) {
    %c0_i32 = arith.constant 0 : i32
    %c0_i32_0 = arith.constant 0 : i32
    %c0_i32_1 = arith.constant 0 : i32
    return %c0_i32, %c0_i32_0 : i32, i32
  }
  func.func @transform_5(%arg0: i32) -> (i32, i32) {
    %c0_i32 = arith.constant 0 : i32
    %c0_i32_0 = arith.constant 0 : i32
    %c0_i32_1 = arith.constant 0 : i32
    return %c0_i32, %c0_i32_0 : i32, i32
  }
  func.func @transform_6(%arg0: i32) -> (i32, i32) {
    %c0_i32 = arith.constant 0 : i32
    %c0_i32_0 = arith.constant 0 : i32
    %c0_i32_1 = arith.constant 0 : i32
    return %c0_i32, %c0_i32_0 : i32, i32
  }
  func.func @transform_7(%arg0: i32) -> (i32, i32) {
    %c0_i32 = arith.constant 0 : i32
    %c0_i32_0 = arith.constant 0 : i32
    %c0_i32_1 = arith.constant 0 : i32
    return %c0_i32, %c0_i32_0 : i32, i32
  }
  func.func @transform_8(%arg0: i32) -> (i32, i32) {
    %c0_i32 = arith.constant 0 : i32
    %c0_i32_0 = arith.constant 0 : i32
    %c0_i32_1 = arith.constant 0 : i32
    return %c0_i32, %c0_i32_0 : i32, i32
  }
  func.func @transform_9(%arg0: i32) -> (i32, i32) {
    %c0_i32 = arith.constant 0 : i32
    %c0_i32_0 = arith.constant 0 : i32
    %c0_i32_1 = arith.constant 0 : i32
    return %c0_i32, %c0_i32_0 : i32, i32
  }
  func.func @transform_10(%arg0: i32) -> (i32, i32) {
    %c0_i32 = arith.constant 0 : i32
    %c0_i32_0 = arith.constant 0 : i32
    %c0_i32_1 = arith.constant 0 : i32
    return %c0_i32, %c0_i32_0 : i32, i32
  }
  func.func @transform_11(%arg0: i32) -> (i32, i32) {
    %c0_i32 = arith.constant 0 : i32
    %c0_i32_0 = arith.constant 0 : i32
    return %arg0, %c0_i32 : i32, i32
  }
}

</mosaic_0001>

<bundles_post_ra>
// kernel: tile.9
= control target key start
LH: loop header
LB: loop body
LE: loop exit
PB: predicated region body
PF: predicated region fallthrough
CT: control target
= control target key end

     0   :  { %s28_s0 = inlined_call_operand.vmem [shape: s32[4], index: 0, kind: input, shape index: {}]   ;;  %s29_s1 = inlined_call_operand.vmem [shape: s32[16,4], index: 1, kind: output, shape index: {}]  }
   0x1   :  { %v4_v0 = vld [vmem:[%s28_s0] ss:$0 sm:$0xff] }
   0x2   :  { %5 = vst [vmem:[%s29_s1] sm:$0xff] %v4_v0  ;;  %8 = vst [vmem:[%s29_s1 + $0x8] sm:$0xff] %v4_v0 }

// kernel: coref_scorer_forward.3
= control target key start
LH: loop header
LB: loop body
LE: loop exit
PB: predicated region body
PF: predicated region fallthrough
CT: control target
= control target key end

     0   :  { %v166_v0 = vmov 0.0   ;;  %vm167_vm0 = vmmov 0   ;;  %vm55_vm1 = vcmask 261120   ;;  %vm128_vm2 = vcmask 7168   ;;  %s238_s1 = inlined_call_operand.vmem [shape: bf16[32,32], index: 1, kind: input, shape index: {}]   ;;  %s239_s0 = inlined_call_operand.vmem [shape: bf16[16,32], index: 0, kind: input, shape index: {}]   ;;  %s240_s4 = inlined_call_operand.<no memory space> [shape: f32[1,1], index: 4, kind: input, shape index: {}]   ;;  %s241_s2 = inlined_call_operand.vmem [shape: f32[1,32], index: 2, kind: input, shape index: {}]   ;;  %s242_s3 = inlined_call_operand.vmem [shape: f32[1,32], index: 3, kind: input, shape index: {}]   ;;  %s243_s5 = inlined_call_operand.vmem [shape: f32[16,32], index: 5, kind: output, shape index: {0}]   ;;  %s244_s6 = inlined_call_operand.vmem [shape: f32[16,1], index: 6, kind: output, shape index: {1}]  }
   0x1   :  { %149 = vmatprep.subr.bf16.mxu0 %v166_v0  ;;  %v159_v1 = vld [vmem:[%s238_s1] sm:$0xff]   ;;  %153 = vmatprep.mubr.msk.bf16.mxu0 %vm167_vm0, %v166_v0  ;;  %v160_v2 = vld [vmem:[%s238_s1 + $0x8] sm:$0xff]   ;;  %v12_v4 = vstv %s240_s4 }
   0x2   :  { %150 = vmatpush3.bf16.msra.mxu0 %v159_v1  ;;  %v161_v3 = vld [vmem:[%s239_s0] sm:$0xff]   ;;  %13 = vst [vmem:[#allocation2] sm:$0x1] %v12_v4 }
   0x3   :  { %151 = vmatprep.subr.bf16.mxu0 %v166_v0  ;;  %v139_v5 = vld [vmem:[%s241_s2] ss:$0 sm:$0xff] }
   0x4   :  { %v144_v12 = vld [vmem:[%s242_s3] ss:$0 sm:$0xff] }
   0x6   :  { %152 = vmatpush3.bf16.msra.mxu0 %v160_v2 }
   0x9   :  { %154 = vmatmul.mubr.msk.bf16.vlgmr.msra.gmra.mrb[0].mxu0 %vm55_vm1, %v161_v3  ;;  %v145_v19 = vld [vmem:[#allocation2] ss:$0 sm:$0xff] }
  0xdc   :  { %v93_v6 = vpop.f32.mrb[0].mxu0 }
  0xdd   :  { %v94_v7 = vadd.f32 %v139_v5, %v93_v6  ;;  %v155_v8 = vpop.f32.mrb[1].mxu0 }
  0xde   :  { %v96_v9 = vpop.f32.mrb[2].mxu0 }
  0xdf   :  { %162 = vtanh.f32 %v94_v7  ;;  %v97_v10 = vadd.f32 %v139_v5, %v96_v9  ;;  %v156_v11 = vpop.f32.mrb[3].mxu0 }
  0xe1   :  { %164 = vtanh.f32 %v97_v10 }
  0xe9   :  { %v163_v13 = vpop.eup %162 }
  0xea   :  { %102 = vst.msk [vmem:[%s243_s5] sm:$0xff] %vm55_vm1, %v163_v13  ;;  %v111_v14 = vmul.f32 %v163_v13, %v144_v12 }
  0xeb   :  { %v165_v15 = vpop.eup %164 }
  0xec   :  { %103 = vst.msk [vmem:[%s243_s5 + $0x8] sm:$0xff] %vm55_vm1, %v165_v15  ;;  %v113_v16 = vsel %vm55_vm1, %v111_v14, 0.0  ;;  %v112_v17 = vmul.f32 %v165_v15, %v144_v12 }
  0xed   :  { %114 = vadd.xlane.f32.xlu0 %v113_v16 }
  0xee   :  { %v116_v18 = vsel %vm55_vm1, %v112_v17, 0.0 }
  0xf1   :  { %117 = vadd.xlane.f32.xlu0 %v116_v18 }
 0x17a   :  { %v115_v20 = vpop.xlane.xlu0 %114 }
 0x17b   :  { %v126_v21 = vadd.f32 %v145_v19, %v115_v20 }
 0x17d   :  { %129 = vst.msk [vmem:[%s244_s6] sm:$0xff] %vm128_vm2, %v126_v21 }
 0x17e   :  { %v118_v22 = vpop.xlane.xlu0 %117 }
 0x17f   :  { %v127_v23 = vadd.f32 %v145_v19, %v118_v22 }
 0x181   :  { %130 = vst.msk [vmem:[%s244_s6 + $0x8] sm:$0xff] %vm128_vm2, %v127_v23 }

// kernel: coref_scorer_forward.4
= control target key start
LH: loop header
LB: loop body
LE: loop exit
PB: predicated region body
PF: predicated region fallthrough
CT: control target
= control target key end

     0   :  { %vm112_vm0 = vcmask 785408   ;;  %vm241_vm1 = vcmask 523264   ;;  %vm381_vm2 = vcmask 7168   ;;  %s630_s1 = inlined_call_operand.vmem [shape: bf16[96,64], index: 1, kind: input, shape index: {}]   ;;  %s631_s0 = inlined_call_operand.vmem [shape: bf16[64,96], index: 0, kind: input, shape index: {}]   ;;  %s632_s3 = inlined_call_operand.vmem [shape: bf16[64,64], index: 3, kind: input, shape index: {}]   ;;  %s633_s2 = inlined_call_operand.vmem [shape: f32[1,64], index: 2, kind: input, shape index: {}]   ;;  %s634_s6 = inlined_call_operand.<no memory space> [shape: f32[1,1], index: 6, kind: input, shape index: {}]   ;;  %s635_s4 = inlined_call_operand.vmem [shape: f32[1,64], index: 4, kind: input, shape index: {}]   ;;  %s636_s5 = inlined_call_operand.vmem [shape: f32[1,64], index: 5, kind: input, shape index: {}]   ;;  %s637_s7 = inlined_call_operand.vmem [shape: f32[64,1], index: 7, kind: output, shape index: {}]  }
   0x1   :  { %v474_v0 = vld [vmem:[%s630_s1] sm:$0xff]   ;;  %v475_v1 = vld [vmem:[%s630_s1 + $0x8] sm:$0xff]   ;;  %v476_v2 = vld [vmem:[%s630_s1 + $0x10] sm:$0xff]   ;;  %v12_v43 = vstv %s634_s6 }
   0x2   :  { %438 = vmatprep.subr.bf16.mxu0 %v474_v0  ;;  %v480_v3 = vld [vmem:[%s631_s0] sm:$0xff]   ;;  %v477_v4 = vld [vmem:[%s630_s1 + $0x18] sm:$0xff]   ;;  %v485_v7 = vld [vmem:[%s632_s3 + $0x8] sm:$0xff]   ;;  %13 = vst [vmem:[#allocation2] sm:$0x1] %v12_v43 }
   0x3   :  { %439 = vmatpush3.bf16.msra.mxu0 %v474_v0  ;;  %450 = vmatprep.mubr.msk.bf16.mxu0 %vm112_vm0, %v480_v3  ;;  %v478_v5 = vld [vmem:[%s630_s1 + $0x20] sm:$0xff]   ;;  %v479_v8 = vld [vmem:[%s630_s1 + $0x28] sm:$0xff]   ;;  %v482_v10 = vld [vmem:[%s631_s0 + $0x10] sm:$0xff]  }
   0x4   :  { %440 = vmatprep.subr.bf16.mxu0 %v475_v1  ;;  %v484_v6 = vld [vmem:[%s632_s3] sm:$0xff]   ;;  %v481_v9 = vld [vmem:[%s631_s0 + $0x8] sm:$0xff]   ;;  %v483_v11 = vld [vmem:[%s631_s0 + $0x18] sm:$0xff]  }
   0x5   :  { %458 = vmatprep.subr.bf16.mxu1 %v484_v6  ;;  %v486_v12 = vld [vmem:[%s632_s3 + $0x10] sm:$0xff]   ;;  %v487_v13 = vld [vmem:[%s632_s3 + $0x18] sm:$0xff]   ;;  %v394_v14 = vld [vmem:[%s633_s2] ss:$0 sm:$0xff] }
   0x6   :  { %459 = vmatpush3.bf16.msra.mxu1 %v484_v6  ;;  %v409_v44 = vld [vmem:[%s635_s4] ss:$0 sm:$0xff] }
   0x7   :  { %441 = vmatpush3.bf16.msra.mxu0 %v475_v1  ;;  %460 = vmatprep.subr.bf16.mxu1 %v485_v7  ;;  %v418_v50 = vld [vmem:[%s636_s5] ss:$0 sm:$0xff] }
   0x8   :  { %442 = vmatprep.subr.bf16.mxu0 %v476_v2 }
   0xa   :  { %461 = vmatpush3.bf16.msra.mxu1 %v485_v7 }
   0xb   :  { %443 = vmatpush3.bf16.msra.mxu0 %v476_v2  ;;  %462 = vmatprep.subr.bf16.mxu1 %v486_v12 }
   0xc   :  { %444 = vmatprep.subr.bf16.mxu0 %v477_v4 }
   0xe   :  { %463 = vmatpush3.bf16.msra.mxu1 %v486_v12 }
   0xf   :  { %445 = vmatpush3.bf16.msra.mxu0 %v477_v4  ;;  %464 = vmatprep.subr.bf16.mxu1 %v487_v13 }
  0x10   :  { %446 = vmatprep.subr.bf16.mxu0 %v478_v5 }
  0x12   :  { %465 = vmatpush3.bf16.msra.mxu1 %v487_v13 }
  0x13   :  { %447 = vmatpush3.bf16.msra.mxu0 %v478_v5 }
  0x14   :  { %448 = vmatprep.subr.bf16.mxu0 %v479_v8 }
  0x17   :  { %449 = vmatpush3.bf16.msra.mxu0 %v479_v8 }
  0x1a   :  { %451 = vmatmul.mubr.msk.bf16.vlgmr.msra.gmra.mrb[0].mxu0 %vm112_vm0, %v481_v9 }
  0x1b   :  { %454 = vmatprep.mubr.msk.bf16.mxu0 %vm112_vm0, %v482_v10 }
  0x22   :  { %455 = vmatmul.mubr.msk.bf16.gmra.mrb[4].mxu0 %vm112_vm0, %v483_v11 }
  0xed   :  { %v452_v15 = vpop.f32.mrb[0].mxu0 }
  0xee   :  { %v168_v16 = vadd.f32 %v452_v15, %v394_v14  ;;  %v159_v17 = vpop.f32.mrb[1].mxu0 }
  0xef   :  { %v160_v18 = vadd.f32 %v394_v14, %v159_v17  ;;  %v453_v19 = vpop.f32.mrb[2].mxu0 }
  0xf0   :  { %v171_v20 = vadd.f32 %v453_v19, %v394_v14  ;;  %v162_v21 = vpop.f32.mrb[3].mxu0  ;;  %v192_v23 = vmax.f32 %v168_v16, 0.0 }
  0xf1   :  { %v163_v22 = vadd.f32 %v394_v14, %v162_v21  ;;  %v190_v25 = vmax.f32 %v160_v18, 0.0 }
  0xf2   :  { %v193_v24 = vmax.f32 %v171_v20, 0.0 }
  0xf3   :  { %v191_v26 = vmax.f32 %v163_v22, 0.0  ;;  %v419_v22 = vld [vmem:[#allocation2] ss:$0 sm:$0xff] }
  0xf4   :  { %v199_v27 = vpack.c.bf16 %v193_v24, %v192_v23 }
  0xf5   :  { %v456_v28 = vpop.f32.mrb[4].mxu0  ;;  %v198_v29 = vpack.c.bf16 %v191_v26, %v190_v25 }
  0xf6   :  { %v184_v30 = vadd.f32 %v456_v28, %v394_v14  ;;  %v175_v31 = vpop.f32.mrb[5].mxu0 }
  0xf7   :  { %v176_v32 = vadd.f32 %v394_v14, %v175_v31  ;;  %v457_v33 = vpop.f32.mrb[6].mxu0  ;;  %466 = vmatprep.mubr.msk.bf16.mxu1 %vm241_vm1, %v198_v29 }
  0xf8   :  { %v187_v34 = vadd.f32 %v457_v33, %v394_v14  ;;  %v178_v35 = vpop.f32.mrb[7].mxu0  ;;  %467 = vmatmul.mubr.msk.bf16.vlgmr.msra.gmra.mrb[0].mxu1 %vm241_vm1, %v199_v27  ;;  %v196_v37 = vmax.f32 %v184_v30, 0.0 }
  0xf9   :  { %v179_v36 = vadd.f32 %v394_v14, %v178_v35  ;;  %v194_v39 = vmax.f32 %v176_v32, 0.0 }
  0xfa   :  { %v197_v38 = vmax.f32 %v187_v34, 0.0 }
  0xfb   :  { %v195_v40 = vmax.f32 %v179_v36, 0.0 }
  0xfc   :  { %v201_v41 = vpack.c.bf16 %v197_v38, %v196_v37 }
  0xfd   :  { %v200_v42 = vpack.c.bf16 %v195_v40, %v194_v39 }
  0xff   :  { %470 = vmatprep.mubr.msk.bf16.mxu1 %vm241_vm1, %v200_v42 }
 0x100   :  { %471 = vmatmul.mubr.msk.bf16.gmra.mrb[4].mxu1 %vm241_vm1, %v201_v41 }
 0x1cb   :  { %v468_v45 = vpop.f32.mrb[0].mxu1 }
 0x1cc   :  { %v297_v46 = vadd.f32 %v468_v45, %v409_v44  ;;  %v288_v47 = vpop.f32.mrb[1].mxu1 }
 0x1cd   :  { %v289_v48 = vadd.f32 %v409_v44, %v288_v47  ;;  %v469_v49 = vpop.f32.mrb[2].mxu1 }
 0x1ce   :  { %v321_v51 = vmax.f32 %v297_v46, 0.0  ;;  %v300_v52 = vadd.f32 %v469_v49, %v409_v44  ;;  %v291_v53 = vpop.f32.mrb[3].mxu1 }
 0x1cf   :  { %v319_v54 = vmax.f32 %v289_v48, 0.0  ;;  %v292_v55 = vadd.f32 %v409_v44, %v291_v53 }
 0x1d0   :  { %v322_v56 = vmax.f32 %v300_v52, 0.0  ;;  %v336_v57 = vmul.f32 %v418_v50, %v321_v51 }
 0x1d1   :  { %v320_v58 = vmax.f32 %v292_v55, 0.0  ;;  %v334_v59 = vmul.f32 %v418_v50, %v319_v54 }
 0x1d2   :  { %v348_v60 = vsel %vm241_vm1, %v336_v57, 0.0  ;;  %v337_v61 = vmul.f32 %v418_v50, %v322_v56 }
 0x1d3   :  { %349 = vadd.xlane.f32.xlu1 %v348_v60  ;;  %v472_v62 = vpop.f32.mrb[4].mxu1  ;;  %v342_v63 = vsel %vm241_vm1, %v334_v59, 0.0  ;;  %v335_v0 = vmul.f32 %v418_v50, %v320_v58 }
 0x1d4   :  { %v313_v1 = vadd.f32 %v472_v62, %v409_v44  ;;  %v304_v2 = vpop.f32.mrb[5].mxu1  ;;  %343 = vadd.xlane.f32.xlu0 %v342_v63  ;;  %v351_v7 = vsel %vm241_vm1, %v337_v61, 0.0 }
 0x1d5   :  { %v305_v3 = vadd.f32 %v409_v44, %v304_v2  ;;  %v473_v4 = vpop.f32.mrb[6].mxu1  ;;  %v345_v11 = vsel %vm241_vm1, %v335_v0, 0.0 }
 0x1d6   :  { %v316_v5 = vadd.f32 %v473_v4, %v409_v44  ;;  %v307_v6 = vpop.f32.mrb[7].mxu1  ;;  %v325_v8 = vmax.f32 %v313_v1, 0.0 }
 0x1d7   :  { %v323_v9 = vmax.f32 %v305_v3, 0.0  ;;  %v308_v10 = vadd.f32 %v409_v44, %v307_v6  ;;  %352 = vadd.xlane.f32.xlu1 %v351_v7 }
 0x1d8   :  { %346 = vadd.xlane.f32.xlu0 %v345_v11  ;;  %v326_v12 = vmax.f32 %v316_v5, 0.0  ;;  %v340_v17 = vmul.f32 %v418_v50, %v325_v8 }
 0x1d9   :  { %v324_v13 = vmax.f32 %v308_v10, 0.0  ;;  %v338_v14 = vmul.f32 %v418_v50, %v323_v9 }
 0x1da   :  { %v341_v19 = vmul.f32 %v418_v50, %v326_v12  ;;  %v360_v20 = vsel %vm241_vm1, %v340_v17, 0.0 }
 0x1db   :  { %v354_v15 = vsel %vm241_vm1, %v338_v14, 0.0  ;;  %v339_v16 = vmul.f32 %v418_v50, %v324_v13 }
 0x1dc   :  { %355 = vadd.xlane.f32.xlu0 %v354_v15  ;;  %v363_v21 = vsel %vm241_vm1, %v341_v19, 0.0 }
 0x1dd   :  { %v357_v18 = vsel %vm241_vm1, %v339_v16, 0.0 }
 0x1de   :  { %358 = vadd.xlane.f32.xlu1 %v357_v18 }
 0x1e0   :  { %361 = vadd.xlane.f32.xlu0 %v360_v20 }
 0x1e2   :  { %364 = vadd.xlane.f32.xlu1 %v363_v21 }
 0x260   :  { %v350_v23 = vpop.xlane.xlu1 %349 }
 0x261   :  { %v375_v24 = vadd.f32 %v419_v22, %v350_v23  ;;  %v344_v25 = vpop.xlane.xlu0 %343 }
 0x262   :  { %v373_v26 = vadd.f32 %v419_v22, %v344_v25 }
 0x263   :  { %384 = vst.msk [vmem:[%s637_s7 + $0x10] sm:$0xff] %vm381_vm2, %v375_v24 }
 0x264   :  { %382 = vst.msk [vmem:[%s637_s7] sm:$0xff] %vm381_vm2, %v373_v26  ;;  %v353_v27 = vpop.xlane.xlu1 %352 }
 0x265   :  { %v376_v28 = vadd.f32 %v419_v22, %v353_v27  ;;  %v347_v29 = vpop.xlane.xlu0 %346 }
 0x266   :  { %v374_v30 = vadd.f32 %v419_v22, %v347_v29 }
 0x267   :  { %385 = vst.msk [vmem:[%s637_s7 + $0x18] sm:$0xff] %vm381_vm2, %v376_v28 }
 0x268   :  { %383 = vst.msk [vmem:[%s637_s7 + $0x8] sm:$0xff] %vm381_vm2, %v374_v30 }
 0x269   :  { %v356_v31 = vpop.xlane.xlu0 %355 }
 0x26a   :  { %v377_v32 = vadd.f32 %v419_v22, %v356_v31 }
 0x26b   :  { %v359_v33 = vpop.xlane.xlu1 %358 }
 0x26c   :  { %386 = vst.msk [vmem:[%s637_s7 + $0x20] sm:$0xff] %vm381_vm2, %v377_v32  ;;  %v378_v34 = vadd.f32 %v419_v22, %v359_v33 }
 0x26d   :  { %v362_v35 = vpop.xlane.xlu0 %361 }
 0x26e   :  { %387 = vst.msk [vmem:[%s637_s7 + $0x28] sm:$0xff] %vm381_vm2, %v378_v34  ;;  %v379_v36 = vadd.f32 %v419_v22, %v362_v35 }
 0x26f   :  { %v365_v37 = vpop.xlane.xlu1 %364 }
 0x270   :  { %388 = vst.msk [vmem:[%s637_s7 + $0x30] sm:$0xff] %vm381_vm2, %v379_v36  ;;  %v380_v38 = vadd.f32 %v419_v22, %v365_v37 }
 0x272   :  { %389 = vst.msk [vmem:[%s637_s7 + $0x38] sm:$0xff] %vm381_vm2, %v380_v38 }

// kernel: coref_scorer_forward.5
= control target key start
LH: loop header
LB: loop body
LE: loop exit
PB: predicated region body
PF: predicated region fallthrough
CT: control target
= control target key end

     0   :  { %v5595_v0 = vmov 0.0   ;;  %vm5596_vm0 = vmmov 0   ;;  %v5597_v2 = vmov 1966171168   ;;  %v8050_v4 = vlaneseq  ;;  %s8038_s4 = inlined_call_operand.vmem [shape: bf16[96,64], index: 4, kind: input, shape index: {}]   ;;  %s8039_s5 = inlined_call_operand.vmem [shape: bf16[96,64], index: 5, kind: input, shape index: {}]   ;;  %s8040_s0 = inlined_call_operand.vmem [shape: bf16[128,96], index: 0, kind: input, shape index: {}, may-alias: {0,1}]   ;;  %s8041_s6 = inlined_call_operand.vmem [shape: bf16[96,64], index: 6, kind: input, shape index: {}]   ;;  %s8042_s1 = inlined_call_operand.vmem [shape: bf16[128,96], index: 1, kind: input, shape index: {}, may-alias: {0,1}]   ;;  %s8043_s8 = inlined_call_operand.vmem [shape: bf16[64,64], index: 8, kind: input, shape index: {}]   ;;  %s8044_s7 = inlined_call_operand.vmem [shape: f32[1,64], index: 7, kind: input, shape index: {}]   ;;  %s8045_s3 = inlined_call_operand.vmem [shape: f32[1,128], index: 3, kind: input, shape index: {}]   ;;  %s8046_s2 = inlined_call_operand.vmem [shape: f32[128,1], index: 2, kind: input, shape index: {}]   ;;  %s8047_s9 = inlined_call_operand.vmem [shape: f32[1,64], index: 9, kind: input, shape index: {}]   ;;  %s8048_s10 = inlined_call_operand.vmem [shape: f32[1,64], index: 10, kind: input, shape index: {}]   ;;  %s8049_s11 = inlined_call_operand.vmem [shape: f32[8,128], index: 11, kind: output, shape index: {}]  }
   0x1   :  { %5235 = vmatprep.subr.bf16.mxu0 %v5595_v0  ;;  %v5561_v1 = vld [vmem:[%s8038_s4] sm:$0xff]   ;;  %5247 = vmatprep.mubr.msk.bf16.mxu0 %vm5596_vm0, %v5595_v0  ;;  %v366_v3 = vunpack.c.l.s4 %v5597_v2  ;;  %v5562_v5 = vld [vmem:[%s8038_s4 + $0x8] sm:$0xff]   ;;  %v5563_v9 = vld [vmem:[%s8038_s4 + $0x10] sm:$0xff]   ;;  %vm104_vm1 = vcmask 785408   ;;  %vm1927_vm2 = vcmask 523264   ;;  %vm4227_vm3 = vcmask 130112  }
   0x2   :  { %5236 = vmatpush3.bf16.msra.mxu0 %v5561_v1  ;;  %v5666_v7 = vshrl.u32 %v8050_v4, 7  ;;  %v5567_v10 = vld [vmem:[%s8039_s5] sm:$0xff]   ;;  %v5569_v13 = vld [vmem:[%s8039_s5 + $0x8] sm:$0xff]   ;;  %v5564_v14 = vld [vmem:[%s8038_s4 + $0x18] sm:$0xff]   ;;  %vm4234_vm4 = vcmask 195712   ;;  %vm4241_vm5 = vcmask 261312  }
   0x3   :  { %v367_v6 = vunpack.c.0.s8 %v366_v3  ;;  %5237 = vmatprep.subr.bf16.mxu0 %v5595_v0  ;;  %v39_v11 = vld [vmem:[%s8040_s0] sm:$0xf]  ;;  %5251 = vmatprep.subr.bf16.mxu1 %v5567_v10  ;;  %v5571_v17 = vld [vmem:[%s8039_s5 + $0x10] sm:$0xff]   ;;  %v5566_v21 = vld [vmem:[%s8038_s4 + $0x28] sm:$0xff]   ;;  %vm4248_vm6 = vcmask 326912   ;;  %vm4255_vm7 = vcmask 392512  }
   0x4   :  { %5252 = vmatpush3.bf16.msra.mxu1 %v5567_v10  ;;  %v5694_v16 = vsub.s32 0, %v5666_v7  ;;  %v5565_v19 = vld [vmem:[%s8038_s4 + $0x20] sm:$0xff]   ;;  %v5573_v22 = vld [vmem:[%s8039_s5 + $0x18] sm:$0xff]   ;;  %v5577_v28 = vld [vmem:[%s8039_s5 + $0x28] sm:$0xff]   ;;  %vm4262_vm8 = vcmask 458112   ;;  %vm4269_vm9 = vcmask 523712  }
   0x5   :  { %v5669_v8 = vsub.s32 %v367_v6, %v5666_v7  ;;  %5253 = vmatprep.subr.bf16.mxu1 %v5569_v13  ;;  %v5568_v24 = vld [vmem:[%s8041_s6] sm:$0xff]   ;;  %v5570_v29 = vld [vmem:[%s8041_s6 + $0x8] sm:$0xff]   ;;  %v5572_v31 = vld [vmem:[%s8041_s6 + $0x10] sm:$0xff]   ;;  %vm4276_vm10 = vcmask 589312   ;;  %vm4283_vm11 = vcmask 654912   ;;  %vm4290_vm12 = vcmask 720512  }
   0x6   :  { %5238 = vmatpush3.bf16.msra.mxu0 %v5562_v5  ;;  %v5717_v25 = vld [vmem:[%s8042_s1] sm:$0xff]   ;;  %v5743_v32 = vld [vmem:[%s8042_s1 + $0x8] sm:$0xff]   ;;  %v5748_v33 = vld [vmem:[%s8042_s1 + $0x10] sm:$0xff]   ;;  %vm8061_vm13 = vcmask 786112   ;;  %vm8062_vm14 = vcmask 851712   ;;  %vm4311_vm15 = vcmask 917312  }
   0x7   :  { %5239 = vmatprep.subr.bf16.mxu0 %v5595_v0  ;;  %v5681_v12 = vrot.slane %v39_v11, %v5669_v8  ;;  %v5575_v27 = vld [vmem:[%s8039_s5 + $0x20] sm:$0xff]   ;;  %5263 = vmatprep.mubr.msk.bf16.mxu1 %vm104_vm1, %v5717_v25  ;;  %v5574_v34 = vld [vmem:[%s8041_s6 + $0x18] sm:$0xff]   ;;  %v5579_v38 = vld [vmem:[%s8041_s6 + $0x28] sm:$0xff]   ;;  %vm4318_vm0 = vcmask 982912  }
   0x8   :  { %5254 = vmatpush3.bf16.msra.mxu1 %v5569_v13  ;;  %v5576_v35 = vld [vmem:[%s8041_s6 + $0x20] sm:$0xff]   ;;  %v5763_v36 = vld [vmem:[%s8042_s1 + $0x18] sm:$0xff]   ;;  %v5780_v39 = vld [vmem:[%s8042_s1 + $0x28] sm:$0xff]  }
   0x9   :  { %v5691_v15 = vrot.slane %v5681_v12, %v5669_v8  ;;  %5255 = vmatprep.subr.bf16.mxu1 %v5571_v17  ;;  %v5768_v37 = vld [vmem:[%s8042_s1 + $0x20] sm:$0xff]   ;;  %v5787_v41 = vld [vmem:[%s8042_s1 + $0x30] sm:$0xff]   ;;  %v5801_v44 = vld [vmem:[%s8042_s1 + $0x38] sm:$0xff]   ;;  %v372_v56 = vcombine.high %v5681_v12, %v5681_v12 }
   0xa   :  { %5240 = vmatpush3.bf16.msra.mxu0 %v5563_v9 }
   0xb   :  { %5241 = vmatprep.subr.bf16.mxu0 %v5595_v0  ;;  %v4931_v18 = vpack.i.b16 %v5691_v15, %v5691_v15  ;;  %v390_v43 = vunpack.i.h.s16 %v5691_v15  ;;  %v5830_v58 = vrot.slane %v372_v56, %v5669_v8 }
   0xc   :  { %5256 = vmatpush3.bf16.msra.mxu1 %v5571_v17  ;;  %v5588_v17 = vld [vmem:[%s8043_s8 + $0x8] sm:$0xff]  }
   0xd   :  { %v408_v20 = vrot.slane %v4931_v18, %v5694_v16  ;;  %5257 = vmatprep.subr.bf16.mxu1 %v5573_v22  ;;  %v398_v46 = vpack.i.b16 %v390_v43, %v390_v43  ;;  %v4932_v60 = vpack.i.b16 %v5830_v58, %v5830_v58  ;;  %v392_v10 = vunpack.i.h.s16 %v5830_v58 }
   0xe   :  { %5242 = vmatpush3.bf16.msra.mxu0 %v5564_v14  ;;  %v5587_v14 = vld [vmem:[%s8043_s8] sm:$0xff]  }
   0xf   :  { %5243 = vmatprep.subr.bf16.mxu0 %v5595_v0  ;;  %v438_v23 = vpack.i.b16 %v408_v20, %v408_v20  ;;  %v412_v48 = vrot.slane %v398_v46, %v5694_v16  ;;  %v416_v62 = vrot.slane %v4932_v60, %v5694_v16  ;;  %v400_v12 = vpack.i.b16 %v392_v10, %v392_v10 }
  0x10   :  { %5258 = vmatpush3.bf16.msra.mxu1 %v5573_v22 }
  0x11   :  { %v5720_v26 = vrot.slane %v438_v23, %v5694_v16  ;;  %5259 = vmatprep.subr.bf16.mxu1 %v5575_v27  ;;  %v445_v50 = vpack.i.b16 %v412_v48, %v412_v48  ;;  %v420_v18 = vrot.slane %v400_v12, %v5694_v16 }
  0x12   :  { %5244 = vmatpush3.bf16.msra.mxu0 %v5565_v19  ;;  %v5589_v19 = vld [vmem:[%s8043_s8 + $0x10] sm:$0xff]  }
  0x13   :  { %5245 = vmatprep.subr.bf16.mxu0 %v5595_v0  ;;  %v501_v30 = vmul.bf16 %v5717_v25, %v5720_v26  ;;  %v502_v40 = vmul.bf16 %v5743_v32, %v5720_v26  ;;  %v503_v42 = vmul.bf16 %v5748_v33, %v5720_v26  ;;  %v504_v45 = vmul.bf16 %v5763_v36, %v5720_v26 }
  0x14   :  { %5260 = vmatpush3.bf16.msra.mxu1 %v5575_v27  ;;  %v505_v47 = vmul.bf16 %v5768_v37, %v5720_v26  ;;  %v506_v49 = vmul.bf16 %v5780_v39, %v5720_v26  ;;  %v507_v51 = vmul.bf16 %v5787_v41, %v5720_v26  ;;  %v450_v52 = vrot.slane %v445_v50, %v5694_v16  ;;  %v5590_v27 = vld [vmem:[%s8043_s8 + $0x18] sm:$0xff]  }
  0x15   :  { %5261 = vmatprep.subr.bf16.mxu1 %v5577_v28  ;;  %v508_v53 = vmul.bf16 %v5801_v44, %v5720_v26  ;;  %v452_v0 = vpack.i.b16 %v416_v62, %v416_v62 }
  0x16   :  { %5246 = vmatpush3.bf16.msra.mxu0 %v5566_v21  ;;  %v509_v54 = vmul.bf16 %v5717_v25, %v450_v52  ;;  %v510_v55 = vmul.bf16 %v5743_v32, %v450_v52  ;;  %v511_v57 = vmul.bf16 %v5748_v33, %v450_v52  ;;  %v512_v59 = vmul.bf16 %v5763_v36, %v450_v52 }
  0x17   :  { %5279 = vmatprep.subr.bf16.mxu0 %v5568_v24  ;;  %v513_v61 = vmul.bf16 %v5768_v37, %v450_v52  ;;  %v514_v63 = vmul.bf16 %v5780_v39, %v450_v52  ;;  %v515_v1 = vmul.bf16 %v5787_v41, %v450_v52  ;;  %v457_v2 = vrot.slane %v452_v0, %v5694_v16 }
  0x18   :  { %5262 = vmatpush3.bf16.msra.mxu1 %v5577_v28  ;;  %v516_v3 = vmul.bf16 %v5801_v44, %v450_v52  ;;  %v459_v21 = vpack.i.b16 %v420_v18, %v420_v18 }
  0x19   :  { %5248 = vmatmul.mubr.msk.bf16.vlgmr.msra.gmra.mrb[0].mxu0 %vm104_vm1, %v39_v11  ;;  %v517_v5 = vmul.bf16 %v5717_v25, %v457_v2  ;;  %v518_v6 = vmul.bf16 %v5743_v32, %v457_v2  ;;  %v519_v9 = vmul.bf16 %v5748_v33, %v457_v2  ;;  %v520_v11 = vmul.bf16 %v5763_v36, %v457_v2 }
  0x1a   :  { %5280 = vmatpush3.bf16.msra.mxu0 %v5568_v24  ;;  %5291 = vmatprep.mubr.msk.bf16.mxu0 %vm104_vm1, %v501_v30  ;;  %v521_v13 = vmul.bf16 %v5768_v37, %v457_v2  ;;  %v522_v20 = vmul.bf16 %v5780_v39, %v457_v2  ;;  %v523_v22 = vmul.bf16 %v5787_v41, %v457_v2 }
  0x1b   :  { %5281 = vmatprep.subr.bf16.mxu0 %v5570_v29  ;;  %5264 = vmatmul.mubr.msk.bf16.vlgmr.msra.gmra.mrb[0].mxu1 %vm104_vm1, %v5743_v32  ;;  %v464_v23 = vrot.slane %v459_v21, %v5694_v16  ;;  %v524_v24 = vmul.bf16 %v5801_v44, %v457_v2  ;;  %v387_v30 = vcombine.high %v5691_v15, %v5691_v15 }
  0x1c   :  { %5267 = vmatprep.mubr.msk.bf16.mxu1 %vm104_vm1, %v5748_v33  ;;  %5419 = vmatprep.subr.bf16.mxu1 %v5587_v14 }
  0x1d   :  { %5420 = vmatpush3.bf16.msra.mxu1 %v5587_v14  ;;  %v525_v26 = vmul.bf16 %v5717_v25, %v464_v23  ;;  %v526_v28 = vmul.bf16 %v5743_v32, %v464_v23  ;;  %v531_v43 = vmul.bf16 %v5787_v41, %v464_v23 }
  0x1e   :  { %5282 = vmatpush3.bf16.msra.mxu0 %v5570_v29  ;;  %5421 = vmatprep.subr.bf16.mxu1 %v5588_v17  ;;  %v527_v29 = vmul.bf16 %v5748_v33, %v464_v23 }
  0x1f   :  { %5283 = vmatprep.subr.bf16.mxu0 %v5572_v31 }
  0x21   :  { %5422 = vmatpush3.bf16.msra.mxu1 %v5588_v17 }
  0x22   :  { %5284 = vmatpush3.bf16.msra.mxu0 %v5572_v31  ;;  %5423 = vmatprep.subr.bf16.mxu1 %v5589_v19  ;;  %v528_v31 = vmul.bf16 %v5763_v36, %v464_v23 }
  0x23   :  { %5285 = vmatprep.subr.bf16.mxu0 %v5574_v34  ;;  %5268 = vmatmul.mubr.msk.bf16.gmra.mrb[4].mxu1 %vm104_vm1, %v5763_v36 }
  0x24   :  { %5271 = vmatprep.mubr.msk.bf16.mxu1 %vm104_vm1, %v5768_v37 }
  0x25   :  { %5424 = vmatpush3.bf16.msra.mxu1 %v5589_v19 }
  0x26   :  { %5286 = vmatpush3.bf16.msra.mxu0 %v5574_v34  ;;  %5425 = vmatprep.subr.bf16.mxu1 %v5590_v27  ;;  %v4933_v34 = vpack.i.b16 %v387_v30, %v387_v30 }
  0x27   :  { %5287 = vmatprep.subr.bf16.mxu0 %v5576_v35 }
  0x29   :  { %5426 = vmatpush3.bf16.msra.mxu1 %v5590_v27 }
  0x2a   :  { %5288 = vmatpush3.bf16.msra.mxu0 %v5576_v35  ;;  %v529_v35 = vmul.bf16 %v5768_v37, %v464_v23 }
  0x2b   :  { %5289 = vmatprep.subr.bf16.mxu0 %v5579_v38  ;;  %5272 = vmatmul.mubr.msk.bf16.gmra.mrb[8].mxu1 %vm104_vm1, %v5780_v39 }
  0x2c   :  { %5275 = vmatprep.mubr.msk.bf16.mxu1 %vm104_vm1, %v5787_v41 }
  0x2e   :  { %5290 = vmatpush3.bf16.msra.mxu0 %v5579_v38  ;;  %v424_v38 = vrot.slane %v4933_v34, %v5694_v16 }
  0x31   :  { %5292 = vmatmul.mubr.msk.bf16.vlgmr.msra.gmra.mrb[4].mxu0 %vm104_vm1, %v502_v40  ;;  %v530_v40 = vmul.bf16 %v5780_v39, %v464_v23 }
  0x32   :  { %5295 = vmatprep.mubr.msk.bf16.mxu0 %vm104_vm1, %v503_v42  ;;  %v466_v42 = vpack.i.b16 %v424_v38, %v424_v38 }
  0x33   :  { %5276 = vmatmul.mubr.msk.bf16.gmra.mrb[12].mxu1 %vm104_vm1, %v5801_v44 }
  0x34   :  { %v471_v15 = vrot.slane %v466_v42, %v5694_v16 }
  0x36   :  { %v533_v46 = vmul.bf16 %v5717_v25, %v471_v15  ;;  %v535_v48 = vmul.bf16 %v5748_v33, %v471_v15  ;;  %v536_v50 = vmul.bf16 %v5763_v36, %v471_v15  ;;  %v537_v52 = vmul.bf16 %v5768_v37, %v471_v15 }
  0x37   :  { %v539_v56 = vmul.bf16 %v5787_v41, %v471_v15 }
  0x39   :  { %5296 = vmatmul.mubr.msk.bf16.gmra.mrb[8].mxu0 %vm104_vm1, %v504_v45  ;;  %v532_v45 = vmul.bf16 %v5801_v44, %v464_v23 }
  0x3a   :  { %5299 = vmatprep.mubr.msk.bf16.mxu0 %vm104_vm1, %v505_v47  ;;  %v534_v47 = vmul.bf16 %v5743_v32, %v471_v15 }
  0x41   :  { %5300 = vmatmul.mubr.msk.bf16.gmra.mrb[12].mxu0 %vm104_vm1, %v506_v49  ;;  %v394_v49 = vunpack.i.h.s16 %v387_v30 }
  0x42   :  { %5303 = vmatprep.mubr.msk.bf16.mxu0 %vm104_vm1, %v507_v51 }
  0x43   :  { %v402_v51 = vpack.i.b16 %v394_v49, %v394_v49 }
  0x49   :  { %5304 = vmatmul.mubr.msk.bf16.gmra.mrb[16].mxu0 %vm104_vm1, %v508_v53  ;;  %v428_v53 = vrot.slane %v402_v51, %v5694_v16 }
  0x4a   :  { %5307 = vmatprep.mubr.msk.bf16.mxu0 %vm104_vm1, %v509_v54  ;;  %v538_v54 = vmul.bf16 %v5780_v39, %v471_v15 }
  0x51   :  { %5308 = vmatmul.mubr.msk.bf16.gmra.mrb[20].mxu0 %vm104_vm1, %v510_v55  ;;  %v473_v55 = vpack.i.b16 %v428_v53, %v428_v53 }
  0x52   :  { %5311 = vmatprep.mubr.msk.bf16.mxu0 %vm104_vm1, %v511_v57 }
  0x53   :  { %v478_v57 = vrot.slane %v473_v55, %v5694_v16 }
  0x55   :  { %v541_v60 = vmul.bf16 %v5717_v25, %v478_v57  ;;  %v543_v62 = vmul.bf16 %v5748_v33, %v478_v57  ;;  %v544_v0 = vmul.bf16 %v5763_v36, %v478_v57  ;;  %v545_v2 = vmul.bf16 %v5768_v37, %v478_v57 }
  0x56   :  { %v548_v10 = vmul.bf16 %v5801_v44, %v478_v57 }
  0x59   :  { %5312 = vmatmul.mubr.msk.bf16.gmra.mrb[24].mxu0 %vm104_vm1, %v512_v59  ;;  %v540_v59 = vmul.bf16 %v5801_v44, %v471_v15 }
  0x5a   :  { %5315 = vmatprep.mubr.msk.bf16.mxu0 %vm104_vm1, %v513_v61  ;;  %v542_v61 = vmul.bf16 %v5743_v32, %v478_v57 }
  0x61   :  { %5316 = vmatmul.mubr.msk.bf16.gmra.mrb[28].mxu0 %vm104_vm1, %v514_v63  ;;  %v388_v63 = vcombine.high %v5830_v58, %v5830_v58 }
  0x62   :  { %5319 = vmatprep.mubr.msk.bf16.mxu0 %vm104_vm1, %v515_v1 }
  0x63   :  { %v4934_v1 = vpack.i.b16 %v388_v63, %v388_v63 }
  0x69   :  { %5320 = vmatmul.mubr.msk.bf16.gmra.mrb[32].mxu0 %vm104_vm1, %v516_v3  ;;  %v432_v3 = vrot.slane %v4934_v1, %v5694_v16 }
  0x6a   :  { %5323 = vmatprep.mubr.msk.bf16.mxu0 %vm104_vm1, %v517_v5  ;;  %v546_v5 = vmul.bf16 %v5780_v39, %v478_v57 }
  0x71   :  { %5324 = vmatmul.mubr.msk.bf16.gmra.mrb[36].mxu0 %vm104_vm1, %v518_v6  ;;  %v480_v6 = vpack.i.b16 %v432_v3, %v432_v3 }
  0x72   :  { %5327 = vmatprep.mubr.msk.bf16.mxu0 %vm104_vm1, %v519_v9  ;;  %v547_v9 = vmul.bf16 %v5787_v41, %v478_v57 }
  0x73   :  { %v485_v58 = vrot.slane %v480_v6, %v5694_v16 }
  0x75   :  { %v550_v14 = vmul.bf16 %v5743_v32, %v485_v58  ;;  %v551_v18 = vmul.bf16 %v5748_v33, %v485_v58  ;;  %v552_v23 = vmul.bf16 %v5763_v36, %v485_v58  ;;  %v553_v27 = vmul.bf16 %v5768_v37, %v485_v58 }
  0x76   :  { %v555_v42 = vmul.bf16 %v5787_v41, %v485_v58  ;;  %v556_v55 = vmul.bf16 %v5801_v44, %v485_v58 }
  0x79   :  { %5328 = vmatmul.mubr.msk.bf16.gmra.mrb[40].mxu0 %vm104_vm1, %v520_v11  ;;  %v549_v11 = vmul.bf16 %v5717_v25, %v485_v58 }
  0x7a   :  { %5331 = vmatprep.mubr.msk.bf16.mxu0 %vm104_vm1, %v521_v13 }
  0x81   :  { %5332 = vmatmul.mubr.msk.bf16.gmra.mrb[44].mxu0 %vm104_vm1, %v522_v20  ;;  %v396_v20 = vunpack.i.h.s16 %v388_v63 }
  0x82   :  { %5335 = vmatprep.mubr.msk.bf16.mxu0 %vm104_vm1, %v523_v22 }
  0x89   :  { %5336 = vmatmul.mubr.msk.bf16.gmra.mrb[48].mxu0 %vm104_vm1, %v524_v24 }
  0x8a   :  { %5339 = vmatprep.mubr.msk.bf16.mxu0 %vm104_vm1, %v525_v26  ;;  %v404_v26 = vpack.i.b16 %v396_v20, %v396_v20 }
  0x91   :  { %5340 = vmatmul.mubr.msk.bf16.gmra.mrb[52].mxu0 %vm104_vm1, %v526_v28 }
  0x92   :  { %5343 = vmatprep.mubr.msk.bf16.mxu0 %vm104_vm1, %v527_v29  ;;  %v436_v29 = vrot.slane %v404_v26, %v5694_v16 }
  0x99   :  { %5344 = vmatmul.mubr.msk.bf16.gmra.mrb[56].mxu0 %vm104_vm1, %v528_v31 }
  0x9a   :  { %5347 = vmatprep.mubr.msk.bf16.mxu0 %vm104_vm1, %v529_v35  ;;  %v554_v35 = vmul.bf16 %v5780_v39, %v485_v58 }
  0xa1   :  { %5348 = vmatmul.mubr.msk.bf16.gmra.mrb[60].mxu0 %vm104_vm1, %v530_v40  ;;  %v487_v40 = vpack.i.b16 %v436_v29, %v436_v29 }
  0xa2   :  { %5351 = vmatprep.mubr.msk.bf16.mxu0 %vm104_vm1, %v531_v43 }
  0xa9   :  { %5352 = vmatmul.mubr.msk.bf16.gmra.mrb[64].mxu0 %vm104_vm1, %v532_v45  ;;  %v5962_v45 = vld [vmem:[%s8044_s7] ss:$0 sm:$0xff] }
  0xaa   :  { %5355 = vmatprep.mubr.msk.bf16.mxu0 %vm104_vm1, %v533_v46  ;;  %v5966_v46 = vrot.slane %v487_v40, %v5694_v16 }
  0xac   :  { %v559_v29 = vmul.bf16 %v5748_v33, %v5966_v46 }
  0xb1   :  { %5356 = vmatmul.mubr.msk.bf16.gmra.mrb[68].mxu0 %vm104_vm1, %v534_v47 }
  0xb2   :  { %5359 = vmatprep.mubr.msk.bf16.mxu0 %vm104_vm1, %v535_v48 }
  0xb9   :  { %5360 = vmatmul.mubr.msk.bf16.gmra.mrb[72].mxu0 %vm104_vm1, %v536_v50 }
  0xba   :  { %5363 = vmatprep.mubr.msk.bf16.mxu0 %vm104_vm1, %v537_v52 }
  0xc1   :  { %5364 = vmatmul.mubr.msk.bf16.gmra.mrb[76].mxu0 %vm104_vm1, %v538_v54 }
  0xc2   :  { %5367 = vmatprep.mubr.msk.bf16.mxu0 %vm104_vm1, %v539_v56 }
  0xc9   :  { %5368 = vmatmul.mubr.msk.bf16.gmra.mrb[80].mxu0 %vm104_vm1, %v540_v59 }
  0xca   :  { %5371 = vmatprep.mubr.msk.bf16.mxu0 %vm104_vm1, %v541_v60  ;;  %v557_v60 = vmul.bf16 %v5717_v25, %v5966_v46 }
  0xd1   :  { %5372 = vmatmul.mubr.msk.bf16.gmra.mrb[84].mxu0 %vm104_vm1, %v542_v61 }
  0xd2   :  { %5375 = vmatprep.mubr.msk.bf16.mxu0 %vm104_vm1, %v543_v62 }
  0xd9   :  { %5376 = vmatmul.mubr.msk.bf16.gmra.mrb[88].mxu0 %vm104_vm1, %v544_v0 }
  0xda   :  { %5379 = vmatprep.mubr.msk.bf16.mxu0 %vm104_vm1, %v545_v2 }
  0xe1   :  { %5380 = vmatmul.mubr.msk.bf16.gmra.mrb[92].mxu0 %vm104_vm1, %v546_v5 }
  0xe2   :  { %5383 = vmatprep.mubr.msk.bf16.mxu0 %vm104_vm1, %v547_v9 }
  0xe9   :  { %5384 = vmatmul.mubr.msk.bf16.gmra.mrb[96].mxu0 %vm104_vm1, %v548_v10 }
  0xea   :  { %5387 = vmatprep.mubr.msk.bf16.mxu0 %vm104_vm1, %v549_v11 }
  0xec   :  { %v5938_v12 = vpop.f32.mrb[0].mxu0 }
  0xed   :  { %v5249_v13 = vpop.f32.mrb[1].mxu0  ;;  %v5951_v30 = vrot.slane %v5938_v12, %v5669_v8 }
  0xee   :  { %v145_v17 = vpop.f32.mrb[2].mxu0  ;;  %v5265_v21 = vpop.f32.mrb[0].mxu1 }
  0xef   :  { %v5250_v19 = vpop.f32.mrb[3].mxu0  ;;  %v301_v22 = vpop.f32.mrb[1].mxu1  ;;  %v5957_v15 = vrot.slane %v5951_v30, %v5669_v8  ;;  %v5974_v48 = vadd.f32 %v5265_v21, %v5962_v45 }
  0xf0   :  { %v5266_v24 = vpop.f32.mrb[2].mxu1  ;;  %v5977_v50 = vadd.f32 %v5962_v45, %v301_v22 }
  0xf1   :  { %5388 = vmatmul.mubr.msk.bf16.gmra.mrb[100].mxu0 %vm104_vm1, %v550_v14  ;;  %v304_v28 = vpop.f32.mrb[3].mxu1  ;;  %v5971_v47 = vrot.slane %v5957_v15, %v5694_v16  ;;  %v5989_v62 = vadd.f32 %v5266_v24, %v5962_v45 }
  0xf2   :  { %5391 = vmatprep.mubr.msk.bf16.mxu0 %vm104_vm1, %v551_v18  ;;  %v5994_v2 = vadd.f32 %v5962_v45, %v304_v28 }
  0xf6   :  { %v5269_v31 = vpop.f32.mrb[4].mxu1 }
  0xf7   :  { %v317_v34 = vpop.f32.mrb[5].mxu1  ;;  %v6003_v10 = vadd.f32 %v5269_v31, %v5962_v45 }
  0xf8   :  { %v5270_v38 = vpop.f32.mrb[6].mxu1  ;;  %v6006_v17 = vadd.f32 %v5962_v45, %v317_v34 }
  0xf9   :  { %5392 = vmatmul.mubr.msk.bf16.gmra.mrb[104].mxu0 %vm104_vm1, %v552_v23  ;;  %v320_v43 = vpop.f32.mrb[7].mxu1  ;;  %v558_v23 = vmul.bf16 %v5743_v32, %v5966_v46  ;;  %v6019_v34 = vadd.f32 %v5270_v38, %v5962_v45 }
  0xfa   :  { %5395 = vmatprep.mubr.msk.bf16.mxu0 %vm104_vm1, %v553_v27  ;;  %v6024_v32 = vadd.f32 %v5962_v45, %v320_v43 }
  0xfe   :  { %v5273_v49 = vpop.f32.mrb[8].mxu1 }
  0xff   :  { %v333_v52 = vpop.f32.mrb[9].mxu1  ;;  %v6035_v43 = vadd.f32 %v5273_v49, %v5962_v45  ;;  %v561_v49 = vmul.bf16 %v5768_v37, %v5966_v46 }
 0x100   :  { %v5981_v56 = vpop.f32.mrb[10].mxu1 }
 0x101   :  { %5396 = vmatmul.mubr.msk.bf16.gmra.mrb[108].mxu0 %vm104_vm1, %v554_v35  ;;  %v5986_v61 = vpop.f32.mrb[11].mxu1 }
 0x102   :  { %5399 = vmatprep.mubr.msk.bf16.mxu0 %vm104_vm1, %v555_v42 }
 0x104   :  { %v5293_v51 = vpop.f32.mrb[4].mxu0 }
 0x105   :  { %v1442_v53 = vadd.f32 %v5293_v51, %v5971_v47  ;;  %v839_v54 = vpop.f32.mrb[5].mxu0 }
 0x106   :  { %v1440_v57 = vadd.f32 %v5971_v47, %v839_v54  ;;  %v5294_v59 = vpop.f32.mrb[6].mxu0  ;;  %v5277_v11 = vpop.f32.mrb[12].mxu1 }
 0x107   :  { %v1570_v63 = vadd.f32 %v1442_v53, %v5974_v48  ;;  %v1443_v0 = vadd.f32 %v5294_v59, %v5971_v47  ;;  %v842_v1 = vpop.f32.mrb[7].mxu0  ;;  %v349_v19 = vpop.f32.mrb[13].mxu1 }
 0x108   :  { %v1568_v3 = vadd.f32 %v1440_v57, %v5977_v50  ;;  %v1441_v5 = vadd.f32 %v5971_v47, %v842_v1  ;;  %v6011_v24 = vpop.f32.mrb[14].mxu1 }
 0x109   :  { %v1571_v6 = vadd.f32 %v1443_v0, %v5989_v62  ;;  %5400 = vmatmul.mubr.msk.bf16.gmra.mrb[112].mxu0 %vm104_vm1, %v556_v55  ;;  %v1698_v9 = vmax.f32 %v1570_v63, 0.0  ;;  %v6016_v31 = vpop.f32.mrb[15].mxu1 }
 0x10a   :  { %v1569_v25 = vadd.f32 %v1441_v5, %v5994_v2  ;;  %5403 = vmatprep.mubr.msk.bf16.mxu0 %vm104_vm1, %v557_v60  ;;  %v1696_v13 = vmax.f32 %v1568_v3, 0.0  ;;  %v6038_v60 = vadd.f32 %v5962_v45, %v333_v52  ;;  %v560_v5 = vmul.bf16 %v5763_v36, %v5966_v46 }
 0x10b   :  { %v1699_v58 = vmax.f32 %v1571_v6, 0.0 }
 0x10c   :  { %v1697_v14 = vmax.f32 %v1569_v25, 0.0  ;;  %v5297_v18 = vpop.f32.mrb[8].mxu0 }
 0x10d   :  { %v1825_v20 = vpack.c.bf16 %v1699_v58, %v1698_v9  ;;  %v1446_v21 = vadd.f32 %v5297_v18, %v5971_v47  ;;  %v855_v22 = vpop.f32.mrb[9].mxu0  ;;  %v6048_v58 = vadd.f32 %v5981_v56, %v5962_v45  ;;  %v6054_v18 = vadd.f32 %v5962_v45, %v5986_v61 }
 0x10e   :  { %v1824_v26 = vpack.c.bf16 %v1697_v14, %v1696_v13  ;;  %v1444_v27 = vadd.f32 %v5971_v47, %v855_v22  ;;  %v5298_v28 = vpop.f32.mrb[10].mxu0  ;;  %v1366_v61 = vcombine.high %v5951_v30, %v5951_v30 }
 0x10f   :  { %v1574_v35 = vadd.f32 %v1446_v21, %v6003_v10  ;;  %v1447_v40 = vadd.f32 %v5298_v28, %v5971_v47  ;;  %v858_v42 = vpop.f32.mrb[11].mxu0  ;;  %v6070_v28 = vadd.f32 %v5962_v45, %v349_v19  ;;  %v6083_v19 = vadd.f32 %v6011_v24, %v5962_v45 }
 0x110   :  { %v1572_v51 = vadd.f32 %v1444_v27, %v6006_v17  ;;  %v1445_v53 = vadd.f32 %v5971_v47, %v858_v42  ;;  %5427 = vmatprep.mubr.msk.bf16.mxu1 %vm1927_vm2, %v1824_v26 }
 0x111   :  { %v1575_v33 = vadd.f32 %v1447_v40, %v6019_v34  ;;  %5404 = vmatmul.mubr.msk.bf16.gmra.mrb[116].mxu0 %vm104_vm1, %v558_v23  ;;  %5428 = vmatmul.mubr.msk.bf16.vlgmr.msra.gmra.mrb[16].mxu1 %vm1927_vm2, %v1825_v20  ;;  %v1702_v54 = vmax.f32 %v1574_v35, 0.0  ;;  %v6067_v23 = vadd.f32 %v5277_v11, %v5962_v45  ;;  %v563_v11 = vmul.bf16 %v5787_v41, %v5966_v46 }
 0x112   :  { %v1573_v38 = vadd.f32 %v1445_v53, %v6024_v32  ;;  %5407 = vmatprep.mubr.msk.bf16.mxu0 %vm104_vm1, %v559_v29  ;;  %v1700_v57 = vmax.f32 %v1572_v51, 0.0  ;;  %v562_v51 = vmul.bf16 %v5780_v39, %v5966_v46  ;;  %v6089_v39 = vadd.f32 %v5962_v45, %v6016_v31 }
 0x113   :  { %v1703_v55 = vmax.f32 %v1575_v33, 0.0 }
 0x114   :  { %v1701_v59 = vmax.f32 %v1573_v38, 0.0  ;;  %v5301_v63 = vpop.f32.mrb[12].mxu0  ;;  %v6079_v38 = vrot.slane %v1366_v61, %v5669_v8 }
 0x115   :  { %v1827_v0 = vpack.c.bf16 %v1703_v55, %v1702_v54  ;;  %v1450_v1 = vadd.f32 %v5301_v63, %v5971_v47  ;;  %v871_v3 = vpop.f32.mrb[13].mxu0 }
 0x116   :  { %v1826_v6 = vpack.c.bf16 %v1701_v59, %v1700_v57  ;;  %v1448_v25 = vadd.f32 %v5971_v47, %v871_v3  ;;  %v5302_v9 = vpop.f32.mrb[14].mxu0  ;;  %v6101_v45 = vrot.slane %v6079_v38, %v5694_v16 }
 0x117   :  { %v1578_v52 = vadd.f32 %v1450_v1, %v6035_v43  ;;  %v1451_v13 = vadd.f32 %v5302_v9, %v5971_v47  ;;  %v874_v14 = vpop.f32.mrb[15].mxu0  ;;  %v564_v9 = vmul.bf16 %v5801_v44, %v5966_v46 }
 0x118   :  { %v1576_v36 = vadd.f32 %v1448_v25, %v6038_v60  ;;  %v1449_v20 = vadd.f32 %v5971_v47, %v874_v14  ;;  %5431 = vmatprep.mubr.msk.bf16.mxu1 %vm1927_vm2, %v1826_v6 }
 0x119   :  { %v1579_v37 = vadd.f32 %v1451_v13, %v6048_v58  ;;  %5408 = vmatmul.mubr.msk.bf16.gmra.mrb[120].mxu0 %vm104_vm1, %v560_v5  ;;  %5432 = vmatmul.mubr.msk.bf16.gmra.mrb[20].mxu1 %vm1927_vm2, %v1827_v0  ;;  %v1706_v21 = vmax.f32 %v1578_v52, 0.0 }
 0x11a   :  { %v1577_v56 = vadd.f32 %v1449_v20, %v6054_v18  ;;  %5411 = vmatprep.mubr.msk.bf16.mxu0 %vm104_vm1, %v561_v49  ;;  %v1704_v26 = vmax.f32 %v1576_v36, 0.0 }
 0x11b   :  { %v1707_v22 = vmax.f32 %v1579_v37, 0.0  ;;  %v6112_v37 = vld [vmem:[%s8045_s3] ss:$0 sm:$0xff] }
 0x11c   :  { %v1705_v27 = vmax.f32 %v1577_v56, 0.0  ;;  %v5305_v29 = vpop.f32.mrb[16].mxu0  ;;  %3323 = vbcast.lane.b32.xlu1 %v6112_v37, 264  ;;  %3319 = vbcast.lane.b32.xlu0 %v6112_v37, 256 }
 0x11d   :  { %v1829_v35 = vpack.c.bf16 %v1707_v22, %v1706_v21  ;;  %v1454_v40 = vadd.f32 %v5305_v29, %v5971_v47  ;;  %v887_v42 = vpop.f32.mrb[17].mxu0 }
 0x11e   :  { %v1828_v53 = vpack.c.bf16 %v1705_v27, %v1704_v26  ;;  %v1452_v30 = vadd.f32 %v5971_v47, %v887_v42  ;;  %v5306_v33 = vpop.f32.mrb[18].mxu0 }
 0x11f   :  { %v1582_v54 = vadd.f32 %v1454_v40, %v6067_v23  ;;  %v1455_v55 = vadd.f32 %v5306_v33, %v5971_v47  ;;  %v890_v57 = vpop.f32.mrb[19].mxu0 }
 0x120   :  { %v1580_v59 = vadd.f32 %v1452_v30, %v6070_v28  ;;  %v1453_v41 = vadd.f32 %v5971_v47, %v890_v57  ;;  %5435 = vmatprep.mubr.msk.bf16.mxu1 %vm1927_vm2, %v1828_v53  ;;  %3327 = vbcast.lane.b32.xlu1 %v6112_v37, 272 }
 0x121   :  { %v1583_v63 = vadd.f32 %v1455_v55, %v6083_v19  ;;  %5412 = vmatmul.mubr.msk.bf16.gmra.mrb[124].mxu0 %vm104_vm1, %v562_v51  ;;  %5436 = vmatmul.mubr.msk.bf16.gmra.mrb[24].mxu1 %vm1927_vm2, %v1829_v35  ;;  %v1710_v31 = vmax.f32 %v1582_v54, 0.0 }
 0x122   :  { %v1581_v24 = vadd.f32 %v1453_v41, %v6089_v39  ;;  %5415 = vmatprep.mubr.msk.bf16.mxu0 %vm104_vm1, %v563_v11  ;;  %v1708_v1 = vmax.f32 %v1580_v59, 0.0  ;;  %3335 = vbcast.lane.b32.xlu0 %v6112_v37, 288 }
 0x123   :  { %v1711_v0 = vmax.f32 %v1583_v63, 0.0 }
 0x124   :  { %v1709_v47 = vmax.f32 %v1581_v24, 0.0  ;;  %v5309_v3 = vpop.f32.mrb[20].mxu0  ;;  %3331 = vbcast.lane.b32.xlu1 %v6112_v37, 280 }
 0x125   :  { %v1831_v5 = vpack.c.bf16 %v1711_v0, %v1710_v31  ;;  %v1458_v6 = vadd.f32 %v5309_v3, %v6101_v45  ;;  %v903_v25 = vpop.f32.mrb[21].mxu0 }
 0x126   :  { %v1830_v49 = vpack.c.bf16 %v1709_v47, %v1708_v1  ;;  %v1456_v52 = vadd.f32 %v6101_v45, %v903_v25  ;;  %v5310_v13 = vpop.f32.mrb[22].mxu0  ;;  %3343 = vbcast.lane.b32.xlu0 %v6112_v37, 304 }
 0x127   :  { %v1586_v14 = vadd.f32 %v1458_v6, %v5974_v48  ;;  %v1459_v36 = vadd.f32 %v5310_v13, %v6101_v45  ;;  %v906_v20 = vpop.f32.mrb[23].mxu0 }
 0x128   :  { %v1584_v56 = vadd.f32 %v1456_v52, %v5977_v50  ;;  %v1457_v61 = vadd.f32 %v6101_v45, %v906_v20  ;;  %5439 = vmatprep.mubr.msk.bf16.mxu1 %vm1927_vm2, %v1830_v49  ;;  %3339 = vbcast.lane.b32.xlu1 %v6112_v37, 296 }
 0x129   :  { %v1587_v44 = vadd.f32 %v1459_v36, %v5989_v62  ;;  %5416 = vmatmul.mubr.msk.bf16.gmra.mrb[128].mxu0 %vm104_vm1, %v564_v9  ;;  %5440 = vmatmul.mubr.msk.bf16.gmra.mrb[28].mxu1 %vm1927_vm2, %v1831_v5  ;;  %v1714_v21 = vmax.f32 %v1586_v14, 0.0  ;;  %vm4325_vm1 = vcmask 1048512  }
 0x12a   :  { %v1585_v46 = vadd.f32 %v1457_v61, %v5994_v2  ;;  %v1712_v26 = vmax.f32 %v1584_v56, 0.0  ;;  %3351 = vbcast.lane.b32.xlu0 %v6112_v37, 320 }
 0x12b   :  { %v1715_v22 = vmax.f32 %v1587_v44, 0.0 }
 0x12c   :  { %v1713_v27 = vmax.f32 %v1585_v46, 0.0  ;;  %v5313_v29 = vpop.f32.mrb[24].mxu0  ;;  %3347 = vbcast.lane.b32.xlu1 %v6112_v37, 312 }
 0x12d   :  { %v1833_v35 = vpack.c.bf16 %v1715_v22, %v1714_v21  ;;  %v1462_v40 = vadd.f32 %v5313_v29, %v6101_v45  ;;  %v919_v42 = vpop.f32.mrb[25].mxu0 }
 0x12e   :  { %v1832_v51 = vpack.c.bf16 %v1713_v27, %v1712_v26  ;;  %v1460_v53 = vadd.f32 %v6101_v45, %v919_v42  ;;  %v5314_v30 = vpop.f32.mrb[26].mxu0  ;;  %3359 = vbcast.lane.b32.xlu0 %v6112_v37, 336 }
 0x12f   :  { %v1590_v33 = vadd.f32 %v1462_v40, %v6003_v10  ;;  %v1463_v11 = vadd.f32 %v5314_v30, %v6101_v45  ;;  %v922_v54 = vpop.f32.mrb[27].mxu0 }
 0x130   :  { %v1588_v55 = vadd.f32 %v1460_v53, %v6006_v17  ;;  %v1461_v57 = vadd.f32 %v6101_v45, %v922_v54  ;;  %5443 = vmatprep.mubr.msk.bf16.mxu1 %vm1927_vm2, %v1832_v51  ;;  %3355 = vbcast.lane.b32.xlu1 %v6112_v37, 328  ;;  %v1396_v51 = vcombine.high %v5957_v15, %v5957_v15 }
 0x131   :  { %v1591_v59 = vadd.f32 %v1463_v11, %v6019_v34  ;;  %5444 = vmatmul.mubr.msk.bf16.gmra.mrb[32].mxu1 %vm1927_vm2, %v1833_v35  ;;  %v1718_v63 = vmax.f32 %v1590_v33, 0.0 }
 0x132   :  { %v1589_v41 = vadd.f32 %v1461_v57, %v6024_v32  ;;  %v1716_v31 = vmax.f32 %v1588_v55, 0.0  ;;  %3367 = vbcast.lane.b32.xlu0 %v6112_v37, 352  ;;  %v6168_v15 = vrot.slane %v1396_v51, %v5694_v16 }
 0x133   :  { %v1719_v24 = vmax.f32 %v1591_v59, 0.0 }
 0x134   :  { %v1717_v0 = vmax.f32 %v1589_v41, 0.0  ;;  %v5317_v1 = vpop.f32.mrb[28].mxu0  ;;  %3363 = vbcast.lane.b32.xlu1 %v6112_v37, 344 }
 0x135   :  { %v1835_v47 = vpack.c.bf16 %v1719_v24, %v1718_v63  ;;  %v1466_v3 = vadd.f32 %v5317_v1, %v6101_v45  ;;  %v935_v5 = vpop.f32.mrb[29].mxu0 }
 0x136   :  { %v1834_v6 = vpack.c.bf16 %v1717_v0, %v1716_v31  ;;  %v1464_v25 = vadd.f32 %v6101_v45, %v935_v5  ;;  %v5318_v9 = vpop.f32.mrb[30].mxu0  ;;  %3375 = vbcast.lane.b32.xlu0 %v6112_v37, 368 }
 0x137   :  { %v1594_v49 = vadd.f32 %v1466_v3, %v6035_v43  ;;  %v1467_v52 = vadd.f32 %v5318_v9, %v6101_v45  ;;  %v938_v13 = vpop.f32.mrb[31].mxu0 }
 0x138   :  { %v1592_v14 = vadd.f32 %v1464_v25, %v6038_v60  ;;  %v1465_v36 = vadd.f32 %v6101_v45, %v938_v13  ;;  %5447 = vmatprep.mubr.msk.bf16.mxu1 %vm1927_vm2, %v1834_v6  ;;  %3371 = vbcast.lane.b32.xlu1 %v6112_v37, 360 }
 0x139   :  { %v1595_v20 = vadd.f32 %v1467_v52, %v6048_v58  ;;  %5448 = vmatmul.mubr.msk.bf16.gmra.mrb[36].mxu1 %vm1927_vm2, %v1835_v47  ;;  %v1722_v61 = vmax.f32 %v1594_v49, 0.0 }
 0x13a   :  { %v1593_v56 = vadd.f32 %v1465_v36, %v6054_v18  ;;  %v1720_v46 = vmax.f32 %v1592_v14, 0.0 }
 0x13b   :  { %v1723_v44 = vmax.f32 %v1595_v20, 0.0 }
 0x13c   :  { %v1721_v21 = vmax.f32 %v1593_v56, 0.0  ;;  %v5321_v22 = vpop.f32.mrb[32].mxu0  ;;  %3379 = vbcast.lane.b32.xlu1 %v6112_v37, 376  ;;  %v3525_v37 = vld [vmem:[%s8046_s2] sm:$0xff] }
 0x13d   :  { %v1837_v26 = vpack.c.bf16 %v1723_v44, %v1722_v61  ;;  %v1470_v27 = vadd.f32 %v5321_v22, %v6101_v45  ;;  %v951_v29 = vpop.f32.mrb[33].mxu0 }
 0x13e   :  { %v1836_v35 = vpack.c.bf16 %v1721_v21, %v1720_v46  ;;  %v1468_v40 = vadd.f32 %v6101_v45, %v951_v29  ;;  %v5322_v42 = vpop.f32.mrb[34].mxu0 }
 0x13f   :  { %v1598_v53 = vadd.f32 %v1470_v27, %v6067_v23  ;;  %v1471_v30 = vadd.f32 %v5322_v42, %v6101_v45  ;;  %v954_v33 = vpop.f32.mrb[35].mxu0 }
 0x140   :  { %v1596_v11 = vadd.f32 %v1468_v40, %v6070_v28  ;;  %v1469_v54 = vadd.f32 %v6101_v45, %v954_v33  ;;  %5451 = vmatprep.mubr.msk.bf16.mxu1 %vm1927_vm2, %v1836_v35 }
 0x141   :  { %v1599_v55 = vadd.f32 %v1471_v30, %v6083_v19  ;;  %5452 = vmatmul.mubr.msk.bf16.gmra.mrb[40].mxu1 %vm1927_vm2, %v1837_v26  ;;  %v1726_v59 = vmax.f32 %v1598_v53, 0.0  ;;  %v5598_v26 = vmov 0  }
 0x142   :  { %v1597_v57 = vadd.f32 %v1469_v54, %v6089_v39  ;;  %v1724_v63 = vmax.f32 %v1596_v11, 0.0  ;;  %5559 = vset.pattern.permute.xlu0 %v5598_v26  ;;  %5560 = vset.pattern.permute.xlu1 %v5598_v26  ;;  %v1398_v26 = vcombine.high %v6079_v38, %v6079_v38 }
 0x143   :  { %v1727_v41 = vmax.f32 %v1599_v55, 0.0  ;;  %3528 = vperm.xlu0 %5559, %v3525_v37  }
 0x144   :  { %v1725_v24 = vmax.f32 %v1597_v57, 0.0  ;;  %v5325_v45 = vpop.f32.mrb[36].mxu0 }
 0x145   :  { %v1839_v31 = vpack.c.bf16 %v1727_v41, %v1726_v59  ;;  %v1474_v0 = vadd.f32 %v5325_v45, %v6168_v15  ;;  %v967_v1 = vpop.f32.mrb[37].mxu0 }
 0x146   :  { %v1838_v47 = vpack.c.bf16 %v1725_v24, %v1724_v63  ;;  %v1472_v3 = vadd.f32 %v6168_v15, %v967_v1  ;;  %v5326_v5 = vpop.f32.mrb[38].mxu0 }
 0x147   :  { %v1602_v6 = vadd.f32 %v1474_v0, %v5974_v48  ;;  %v1475_v25 = vadd.f32 %v5326_v5, %v6168_v15  ;;  %v970_v9 = vpop.f32.mrb[39].mxu0 }
 0x148   :  { %v1600_v49 = vadd.f32 %v1472_v3, %v5977_v50  ;;  %v1473_v52 = vadd.f32 %v6168_v15, %v970_v9  ;;  %5455 = vmatprep.mubr.msk.bf16.mxu1 %vm1927_vm2, %v1838_v47 }
 0x149   :  { %v1603_v13 = vadd.f32 %v1475_v25, %v5989_v62  ;;  %5456 = vmatmul.mubr.msk.bf16.gmra.mrb[44].mxu1 %vm1927_vm2, %v1839_v31  ;;  %v1730_v36 = vmax.f32 %v1602_v6, 0.0 }
 0x14a   :  { %v1601_v14 = vadd.f32 %v1473_v52, %v5994_v2  ;;  %v1728_v56 = vmax.f32 %v1600_v49, 0.0 }
 0x14b   :  { %v1731_v20 = vmax.f32 %v1603_v13, 0.0 }
 0x14c   :  { %v1729_v61 = vmax.f32 %v1601_v14, 0.0  ;;  %v5329_v44 = vpop.f32.mrb[40].mxu0 }
 0x14d   :  { %v1841_v46 = vpack.c.bf16 %v1731_v20, %v1730_v36  ;;  %v1478_v21 = vadd.f32 %v5329_v44, %v6168_v15  ;;  %v983_v22 = vpop.f32.mrb[41].mxu0 }
 0x14e   :  { %v1840_v27 = vpack.c.bf16 %v1729_v61, %v1728_v56  ;;  %v1476_v29 = vadd.f32 %v6168_v15, %v983_v22  ;;  %v5330_v35 = vpop.f32.mrb[42].mxu0 }
 0x14f   :  { %v1606_v40 = vadd.f32 %v1478_v21, %v6003_v10  ;;  %v1479_v42 = vadd.f32 %v5330_v35, %v6168_v15  ;;  %v986_v51 = vpop.f32.mrb[43].mxu0 }
 0x150   :  { %v1604_v53 = vadd.f32 %v1476_v29, %v6006_v17  ;;  %v1477_v30 = vadd.f32 %v6168_v15, %v986_v51  ;;  %5459 = vmatprep.mubr.msk.bf16.mxu1 %vm1927_vm2, %v1840_v27 }
 0x151   :  { %v1607_v33 = vadd.f32 %v1479_v42, %v6019_v34  ;;  %5460 = vmatmul.mubr.msk.bf16.gmra.mrb[48].mxu1 %vm1927_vm2, %v1841_v46  ;;  %v1734_v54 = vmax.f32 %v1606_v40, 0.0 }
 0x152   :  { %v1605_v11 = vadd.f32 %v1477_v30, %v6024_v32  ;;  %v1732_v57 = vmax.f32 %v1604_v53, 0.0  ;;  %v6218_v53 = vrot.slane %v1398_v26, %v5694_v16 }
 0x153   :  { %v1735_v55 = vmax.f32 %v1607_v33, 0.0 }
 0x154   :  { %v1733_v59 = vmax.f32 %v1605_v11, 0.0  ;;  %v5333_v41 = vpop.f32.mrb[44].mxu0 }
 0x155   :  { %v1843_v63 = vpack.c.bf16 %v1735_v55, %v1734_v54  ;;  %v1482_v24 = vadd.f32 %v5333_v41, %v6168_v15  ;;  %v999_v45 = vpop.f32.mrb[45].mxu0 }
 0x156   :  { %v1842_v31 = vpack.c.bf16 %v1733_v59, %v1732_v57  ;;  %v1480_v0 = vadd.f32 %v6168_v15, %v999_v45  ;;  %v5334_v1 = vpop.f32.mrb[46].mxu0 }
 0x157   :  { %v1610_v47 = vadd.f32 %v1482_v24, %v6035_v43  ;;  %v1483_v3 = vadd.f32 %v5334_v1, %v6168_v15  ;;  %v1002_v5 = vpop.f32.mrb[47].mxu0 }
 0x158   :  { %v1608_v6 = vadd.f32 %v1480_v0, %v6038_v60  ;;  %v1481_v25 = vadd.f32 %v6168_v15, %v1002_v5  ;;  %5463 = vmatprep.mubr.msk.bf16.mxu1 %vm1927_vm2, %v1842_v31 }
 0x159   :  { %v1611_v9 = vadd.f32 %v1483_v3, %v6048_v58  ;;  %5464 = vmatmul.mubr.msk.bf16.gmra.mrb[52].mxu1 %vm1927_vm2, %v1843_v63  ;;  %v1738_v52 = vmax.f32 %v1610_v47, 0.0 }
 0x15a   :  { %v1609_v49 = vadd.f32 %v1481_v25, %v6054_v18  ;;  %v1736_v14 = vmax.f32 %v1608_v6, 0.0 }
 0x15b   :  { %v1739_v13 = vmax.f32 %v1611_v9, 0.0 }
 0x15c   :  { %v1737_v36 = vmax.f32 %v1609_v49, 0.0  ;;  %v5337_v20 = vpop.f32.mrb[48].mxu0 }
 0x15d   :  { %v1845_v56 = vpack.c.bf16 %v1739_v13, %v1738_v52  ;;  %v1486_v61 = vadd.f32 %v5337_v20, %v6168_v15  ;;  %v1015_v44 = vpop.f32.mrb[49].mxu0 }
 0x15e   :  { %v1844_v46 = vpack.c.bf16 %v1737_v36, %v1736_v14  ;;  %v1484_v21 = vadd.f32 %v6168_v15, %v1015_v44  ;;  %v5338_v22 = vpop.f32.mrb[50].mxu0 }
 0x15f   :  { %v1614_v37 = vadd.f32 %v1486_v61, %v6067_v23  ;;  %v1487_v27 = vadd.f32 %v5338_v22, %v6168_v15  ;;  %v1018_v29 = vpop.f32.mrb[51].mxu0 }
 0x160   :  { %v1612_v35 = vadd.f32 %v1484_v21, %v6070_v28  ;;  %v1485_v40 = vadd.f32 %v6168_v15, %v1018_v29  ;;  %5467 = vmatprep.mubr.msk.bf16.mxu1 %vm1927_vm2, %v1844_v46 }
 0x161   :  { %v1615_v42 = vadd.f32 %v1487_v27, %v6083_v19  ;;  %5468 = vmatmul.mubr.msk.bf16.gmra.mrb[56].mxu1 %vm1927_vm2, %v1845_v56  ;;  %v1742_v38 = vmax.f32 %v1614_v37, 0.0 }
 0x162   :  { %v1613_v51 = vadd.f32 %v1485_v40, %v6089_v39  ;;  %v1740_v33 = vmax.f32 %v1612_v35, 0.0 }
 0x163   :  { %v1743_v30 = vmax.f32 %v1615_v42, 0.0 }
 0x164   :  { %v1741_v11 = vmax.f32 %v1613_v51, 0.0  ;;  %v5341_v54 = vpop.f32.mrb[52].mxu0 }
 0x165   :  { %v1847_v55 = vpack.c.bf16 %v1743_v30, %v1742_v38  ;;  %v1490_v57 = vadd.f32 %v5341_v54, %v6218_v53  ;;  %v1031_v15 = vpop.f32.mrb[53].mxu0 }
 0x166   :  { %v1846_v59 = vpack.c.bf16 %v1741_v11, %v1740_v33  ;;  %v1488_v41 = vadd.f32 %v6218_v53, %v1031_v15  ;;  %v5342_v63 = vpop.f32.mrb[54].mxu0 }
 0x167   :  { %v1618_v24 = vadd.f32 %v1490_v57, %v5974_v48  ;;  %v1491_v45 = vadd.f32 %v5342_v63, %v6218_v53  ;;  %v1034_v31 = vpop.f32.mrb[55].mxu0 }
 0x168   :  { %v1616_v0 = vadd.f32 %v1488_v41, %v5977_v50  ;;  %v1489_v1 = vadd.f32 %v6218_v53, %v1034_v31  ;;  %5471 = vmatprep.mubr.msk.bf16.mxu1 %vm1927_vm2, %v1846_v59 }
 0x169   :  { %v1619_v47 = vadd.f32 %v1491_v45, %v5989_v62  ;;  %5472 = vmatmul.mubr.msk.bf16.gmra.mrb[60].mxu1 %vm1927_vm2, %v1847_v55  ;;  %v1746_v5 = vmax.f32 %v1618_v24, 0.0  ;;  %v1351_v55 = vcombine.high %v5938_v12, %v5938_v12 }
 0x16a   :  { %v1617_v3 = vadd.f32 %v1489_v1, %v5994_v2  ;;  %v1744_v25 = vmax.f32 %v1616_v0, 0.0 }
 0x16b   :  { %v1747_v6 = vmax.f32 %v1619_v47, 0.0  ;;  %v6253_v31 = vrot.slane %v1351_v55, %v5669_v8 }
 0x16c   :  { %v1745_v9 = vmax.f32 %v1617_v3, 0.0  ;;  %v5345_v49 = vpop.f32.mrb[56].mxu0 }
 0x16d   :  { %v1849_v52 = vpack.c.bf16 %v1747_v6, %v1746_v5  ;;  %v1494_v13 = vadd.f32 %v5345_v49, %v6218_v53  ;;  %v1047_v14 = vpop.f32.mrb[57].mxu0 }
 0x16e   :  { %v1848_v36 = vpack.c.bf16 %v1745_v9, %v1744_v25  ;;  %v1492_v20 = vadd.f32 %v6218_v53, %v1047_v14  ;;  %v5346_v56 = vpop.f32.mrb[58].mxu0 }
 0x16f   :  { %v1622_v61 = vadd.f32 %v1494_v13, %v6003_v10  ;;  %v1495_v44 = vadd.f32 %v5346_v56, %v6218_v53  ;;  %v1050_v46 = vpop.f32.mrb[59].mxu0  ;;  %v6259_v13 = vrot.slane %v6253_v31, %v5669_v8 }
 0x170   :  { %v1620_v21 = vadd.f32 %v1492_v20, %v6006_v17  ;;  %v1493_v22 = vadd.f32 %v6218_v53, %v1050_v46  ;;  %5475 = vmatprep.mubr.msk.bf16.mxu1 %vm1927_vm2, %v1848_v36 }
 0x171   :  { %v1623_v26 = vadd.f32 %v1495_v44, %v6019_v34  ;;  %5476 = vmatmul.mubr.msk.bf16.gmra.mrb[64].mxu1 %vm1927_vm2, %v1849_v52  ;;  %v1750_v27 = vmax.f32 %v1622_v61, 0.0 }
 0x172   :  { %v1621_v37 = vadd.f32 %v1493_v22, %v6024_v32  ;;  %v1748_v35 = vmax.f32 %v1620_v21, 0.0  ;;  %v6271_v21 = vrot.slane %v6259_v13, %v5694_v16 }
 0x173   :  { %v1751_v29 = vmax.f32 %v1623_v26, 0.0 }
 0x174   :  { %v1749_v40 = vmax.f32 %v1621_v37, 0.0  ;;  %v5349_v42 = vpop.f32.mrb[60].mxu0 }
 0x175   :  { %v1851_v51 = vpack.c.bf16 %v1751_v29, %v1750_v27  ;;  %v1498_v38 = vadd.f32 %v5349_v42, %v6218_v53  ;;  %v1063_v30 = vpop.f32.mrb[61].mxu0 }
 0x176   :  { %v1850_v33 = vpack.c.bf16 %v1749_v40, %v1748_v35  ;;  %v1496_v11 = vadd.f32 %v6218_v53, %v1063_v30  ;;  %v5350_v54 = vpop.f32.mrb[62].mxu0 }
 0x177   :  { %v1626_v57 = vadd.f32 %v1498_v38, %v6035_v43  ;;  %v1499_v15 = vadd.f32 %v5350_v54, %v6218_v53  ;;  %v1066_v59 = vpop.f32.mrb[63].mxu0 }
 0x178   :  { %v1624_v41 = vadd.f32 %v1496_v11, %v6038_v60  ;;  %v1497_v63 = vadd.f32 %v6218_v53, %v1066_v59  ;;  %5479 = vmatprep.mubr.msk.bf16.mxu1 %vm1927_vm2, %v1850_v33 }
 0x179   :  { %v1627_v24 = vadd.f32 %v1499_v15, %v6048_v58  ;;  %5480 = vmatmul.mubr.msk.bf16.gmra.mrb[68].mxu1 %vm1927_vm2, %v1851_v51  ;;  %v1754_v12 = vmax.f32 %v1626_v57, 0.0 }
 0x17a   :  { %v1625_v45 = vadd.f32 %v1497_v63, %v6054_v18  ;;  %v1752_v1 = vmax.f32 %v1624_v41, 0.0 }
 0x17b   :  { %v1755_v0 = vmax.f32 %v1627_v24, 0.0 }
 0x17c   :  { %v1753_v47 = vmax.f32 %v1625_v45, 0.0  ;;  %v5353_v3 = vpop.f32.mrb[64].mxu0 }
 0x17d   :  { %v1853_v5 = vpack.c.bf16 %v1755_v0, %v1754_v12  ;;  %v1502_v6 = vadd.f32 %v5353_v3, %v6218_v53  ;;  %v1079_v25 = vpop.f32.mrb[65].mxu0 }
 0x17e   :  { %v1852_v9 = vpack.c.bf16 %v1753_v47, %v1752_v1  ;;  %v1500_v49 = vadd.f32 %v6218_v53, %v1079_v25  ;;  %v5354_v52 = vpop.f32.mrb[66].mxu0 }
 0x17f   :  { %v1630_v14 = vadd.f32 %v1502_v6, %v6067_v23  ;;  %v1503_v36 = vadd.f32 %v5354_v52, %v6218_v53  ;;  %v1082_v20 = vpop.f32.mrb[67].mxu0 }
 0x180   :  { %v1628_v56 = vadd.f32 %v1500_v49, %v6070_v28  ;;  %v1501_v61 = vadd.f32 %v6218_v53, %v1082_v20  ;;  %5483 = vmatprep.mubr.msk.bf16.mxu1 %vm1927_vm2, %v1852_v9 }
 0x181   :  { %v1631_v44 = vadd.f32 %v1503_v36, %v6083_v19  ;;  %5484 = vmatmul.mubr.msk.bf16.gmra.mrb[72].mxu1 %vm1927_vm2, %v1853_v5  ;;  %v1758_v22 = vmax.f32 %v1630_v14, 0.0 }
 0x182   :  { %v1629_v46 = vadd.f32 %v1501_v61, %v6089_v39  ;;  %v1756_v37 = vmax.f32 %v1628_v56, 0.0 }
 0x183   :  { %v1759_v26 = vmax.f32 %v1631_v44, 0.0 }
 0x184   :  { %v1757_v27 = vmax.f32 %v1629_v46, 0.0  ;;  %v5357_v29 = vpop.f32.mrb[68].mxu0 }
 0x185   :  { %v1855_v35 = vpack.c.bf16 %v1759_v26, %v1758_v22  ;;  %v1506_v53 = vadd.f32 %v5357_v29, %v6271_v21  ;;  %v1095_v40 = vpop.f32.mrb[69].mxu0 }
 0x186   :  { %v1854_v42 = vpack.c.bf16 %v1757_v27, %v1756_v37  ;;  %v1504_v51 = vadd.f32 %v6271_v21, %v1095_v40  ;;  %v5358_v38 = vpop.f32.mrb[70].mxu0 }
 0x187   :  { %v1634_v30 = vadd.f32 %v1506_v53, %v5974_v48  ;;  %v1507_v33 = vadd.f32 %v5358_v38, %v6271_v21  ;;  %v1098_v11 = vpop.f32.mrb[71].mxu0 }
 0x188   :  { %v1632_v54 = vadd.f32 %v1504_v51, %v5977_v50  ;;  %v1505_v55 = vadd.f32 %v6271_v21, %v1098_v11  ;;  %5487 = vmatprep.mubr.msk.bf16.mxu1 %vm1927_vm2, %v1854_v42  ;;  %v1367_v11 = vcombine.high %v6253_v31, %v6253_v31 }
 0x189   :  { %v1635_v57 = vadd.f32 %v1507_v33, %v5989_v62  ;;  %5488 = vmatmul.mubr.msk.bf16.gmra.mrb[76].mxu1 %vm1927_vm2, %v1855_v35  ;;  %v1762_v59 = vmax.f32 %v1634_v30, 0.0 }
 0x18a   :  { %v1633_v15 = vadd.f32 %v1505_v55, %v5994_v2  ;;  %v1760_v63 = vmax.f32 %v1632_v54, 0.0 }
 0x18b   :  { %v1763_v41 = vmax.f32 %v1635_v57, 0.0 }
 0x18c   :  { %v1761_v24 = vmax.f32 %v1633_v15, 0.0  ;;  %v5361_v45 = vpop.f32.mrb[72].mxu0 }
 0x18d   :  { %v1857_v12 = vpack.c.bf16 %v1763_v41, %v1762_v59  ;;  %v1510_v0 = vadd.f32 %v5361_v45, %v6271_v21  ;;  %v1111_v1 = vpop.f32.mrb[73].mxu0 }
 0x18e   :  { %v1856_v47 = vpack.c.bf16 %v1761_v24, %v1760_v63  ;;  %v1508_v3 = vadd.f32 %v6271_v21, %v1111_v1  ;;  %v5362_v5 = vpop.f32.mrb[74].mxu0  ;;  %v6308_v1 = vrot.slane %v1367_v11, %v5669_v8 }
 0x18f   :  { %v1638_v6 = vadd.f32 %v1510_v0, %v6003_v10  ;;  %v1511_v25 = vadd.f32 %v5362_v5, %v6271_v21  ;;  %v1114_v9 = vpop.f32.mrb[75].mxu0 }
 0x190   :  { %v1636_v49 = vadd.f32 %v1508_v3, %v6006_v17  ;;  %v1509_v52 = vadd.f32 %v6271_v21, %v1114_v9  ;;  %5491 = vmatprep.mubr.msk.bf16.mxu1 %vm1927_vm2, %v1856_v47  ;;  %v6320_v8 = vrot.slane %v6308_v1, %v5694_v16 }
 0x191   :  { %v1639_v14 = vadd.f32 %v1511_v25, %v6019_v34  ;;  %5492 = vmatmul.mubr.msk.bf16.gmra.mrb[80].mxu1 %vm1927_vm2, %v1857_v12  ;;  %v1766_v20 = vmax.f32 %v1638_v6, 0.0 }
 0x192   :  { %v1637_v36 = vadd.f32 %v1509_v52, %v6024_v32  ;;  %v1764_v61 = vmax.f32 %v1636_v49, 0.0 }
 0x193   :  { %v1767_v56 = vmax.f32 %v1639_v14, 0.0 }
 0x194   :  { %v1765_v44 = vmax.f32 %v1637_v36, 0.0  ;;  %v5365_v46 = vpop.f32.mrb[76].mxu0 }
 0x195   :  { %v1859_v22 = vpack.c.bf16 %v1767_v56, %v1766_v20  ;;  %v1514_v26 = vadd.f32 %v5365_v46, %v6271_v21  ;;  %v1127_v37 = vpop.f32.mrb[77].mxu0 }
 0x196   :  { %v1858_v27 = vpack.c.bf16 %v1765_v44, %v1764_v61  ;;  %v1512_v29 = vadd.f32 %v6271_v21, %v1127_v37  ;;  %v5366_v35 = vpop.f32.mrb[78].mxu0 }
 0x197   :  { %v1642_v53 = vadd.f32 %v1514_v26, %v6035_v43  ;;  %v1515_v40 = vadd.f32 %v5366_v35, %v6271_v21  ;;  %v1130_v42 = vpop.f32.mrb[79].mxu0 }
 0x198   :  { %v1640_v51 = vadd.f32 %v1512_v29, %v6038_v60  ;;  %v1513_v38 = vadd.f32 %v6271_v21, %v1130_v42  ;;  %5495 = vmatprep.mubr.msk.bf16.mxu1 %vm1927_vm2, %v1858_v27 }
 0x199   :  { %v1643_v30 = vadd.f32 %v1515_v40, %v6048_v58  ;;  %5496 = vmatmul.mubr.msk.bf16.gmra.mrb[84].mxu1 %vm1927_vm2, %v1859_v22  ;;  %v1770_v54 = vmax.f32 %v1642_v53, 0.0 }
 0x19a   :  { %v1641_v33 = vadd.f32 %v1513_v38, %v6054_v18  ;;  %v1768_v57 = vmax.f32 %v1640_v51, 0.0 }
 0x19b   :  { %v1771_v55 = vmax.f32 %v1643_v30, 0.0 }
 0x19c   :  { %v1769_v15 = vmax.f32 %v1641_v33, 0.0  ;;  %v5369_v59 = vpop.f32.mrb[80].mxu0 }
 0x19d   :  { %v1861_v41 = vpack.c.bf16 %v1771_v55, %v1770_v54  ;;  %v1518_v63 = vadd.f32 %v5369_v59, %v6271_v21  ;;  %v1143_v24 = vpop.f32.mrb[81].mxu0 }
 0x19e   :  { %v1860_v45 = vpack.c.bf16 %v1769_v15, %v1768_v57  ;;  %v1516_v12 = vadd.f32 %v6271_v21, %v1143_v24  ;;  %v5370_v0 = vpop.f32.mrb[82].mxu0 }
 0x19f   :  { %v1646_v47 = vadd.f32 %v1518_v63, %v6067_v23  ;;  %v1519_v31 = vadd.f32 %v5370_v0, %v6271_v21  ;;  %v1146_v3 = vpop.f32.mrb[83].mxu0 }
 0x1a0   :  { %v1644_v5 = vadd.f32 %v1516_v12, %v6070_v28  ;;  %v1517_v6 = vadd.f32 %v6271_v21, %v1146_v3  ;;  %5499 = vmatprep.mubr.msk.bf16.mxu1 %vm1927_vm2, %v1860_v45 }
 0x1a1   :  { %v1647_v25 = vadd.f32 %v1519_v31, %v6083_v19  ;;  %5500 = vmatmul.mubr.msk.bf16.gmra.mrb[88].mxu1 %vm1927_vm2, %v1861_v41  ;;  %v1774_v49 = vmax.f32 %v1646_v47, 0.0 }
 0x1a2   :  { %v1645_v9 = vadd.f32 %v1517_v6, %v6089_v39  ;;  %v1772_v14 = vmax.f32 %v1644_v5, 0.0 }
 0x1a3   :  { %v1775_v52 = vmax.f32 %v1647_v25, 0.0 }
 0x1a4   :  { %v1773_v36 = vmax.f32 %v1645_v9, 0.0  ;;  %v5373_v20 = vpop.f32.mrb[84].mxu0 }
 0x1a5   :  { %v1863_v56 = vpack.c.bf16 %v1775_v52, %v1774_v49  ;;  %v1522_v21 = vadd.f32 %v5373_v20, %v6320_v8  ;;  %v1159_v61 = vpop.f32.mrb[85].mxu0 }
 0x1a6   :  { %v1862_v44 = vpack.c.bf16 %v1773_v36, %v1772_v14  ;;  %v1520_v46 = vadd.f32 %v6320_v8, %v1159_v61  ;;  %v5374_v22 = vpop.f32.mrb[86].mxu0 }
 0x1a7   :  { %v1650_v26 = vadd.f32 %v1522_v21, %v5974_v48  ;;  %v1523_v37 = vadd.f32 %v5374_v22, %v6320_v8  ;;  %v1162_v27 = vpop.f32.mrb[87].mxu0 }
 0x1a8   :  { %v1648_v29 = vadd.f32 %v1520_v46, %v5977_v50  ;;  %v1521_v35 = vadd.f32 %v6320_v8, %v1162_v27  ;;  %5503 = vmatprep.mubr.msk.bf16.mxu1 %vm1927_vm2, %v1862_v44 }
 0x1a9   :  { %v1651_v53 = vadd.f32 %v1523_v37, %v5989_v62  ;;  %5504 = vmatmul.mubr.msk.bf16.gmra.mrb[92].mxu1 %vm1927_vm2, %v1863_v56  ;;  %v1778_v42 = vmax.f32 %v1650_v26, 0.0 }
 0x1aa   :  { %v1649_v40 = vadd.f32 %v1521_v35, %v5994_v2  ;;  %v1776_v38 = vmax.f32 %v1648_v29, 0.0 }
 0x1ab   :  { %v1779_v51 = vmax.f32 %v1651_v53, 0.0 }
 0x1ac   :  { %v1777_v30 = vmax.f32 %v1649_v40, 0.0  ;;  %v5377_v33 = vpop.f32.mrb[88].mxu0 }
 0x1ad   :  { %v1865_v11 = vpack.c.bf16 %v1779_v51, %v1778_v42  ;;  %v1526_v54 = vadd.f32 %v5377_v33, %v6320_v8  ;;  %v1175_v55 = vpop.f32.mrb[89].mxu0 }
 0x1ae   :  { %v1864_v57 = vpack.c.bf16 %v1777_v30, %v1776_v38  ;;  %v1524_v15 = vadd.f32 %v6320_v8, %v1175_v55  ;;  %v5378_v59 = vpop.f32.mrb[90].mxu0 }
 0x1af   :  { %v1654_v41 = vadd.f32 %v1526_v54, %v6003_v10  ;;  %v1527_v63 = vadd.f32 %v5378_v59, %v6320_v8  ;;  %v1178_v24 = vpop.f32.mrb[91].mxu0 }
 0x1b0   :  { %v1652_v45 = vadd.f32 %v1524_v15, %v6006_v17  ;;  %v1525_v12 = vadd.f32 %v6320_v8, %v1178_v24  ;;  %5507 = vmatprep.mubr.msk.bf16.mxu1 %vm1927_vm2, %v1864_v57 }
 0x1b1   :  { %v1655_v0 = vadd.f32 %v1527_v63, %v6019_v34  ;;  %5508 = vmatmul.mubr.msk.bf16.gmra.mrb[96].mxu1 %vm1927_vm2, %v1865_v11  ;;  %v1782_v31 = vmax.f32 %v1654_v41, 0.0  ;;  %v1397_v11 = vcombine.high %v6259_v13, %v6259_v13 }
 0x1b2   :  { %v1653_v47 = vadd.f32 %v1525_v12, %v6024_v32  ;;  %v1780_v5 = vmax.f32 %v1652_v45, 0.0 }
 0x1b3   :  { %v1783_v3 = vmax.f32 %v1655_v0, 0.0  ;;  %v6365_v24 = vrot.slane %v1397_v11, %v5694_v16 }
 0x1b4   :  { %v1781_v6 = vmax.f32 %v1653_v47, 0.0  ;;  %v5381_v25 = vpop.f32.mrb[92].mxu0 }
 0x1b5   :  { %v1867_v9 = vpack.c.bf16 %v1783_v3, %v1782_v31  ;;  %v1530_v49 = vadd.f32 %v5381_v25, %v6320_v8  ;;  %v1191_v52 = vpop.f32.mrb[93].mxu0 }
 0x1b6   :  { %v1866_v14 = vpack.c.bf16 %v1781_v6, %v1780_v5  ;;  %v1528_v36 = vadd.f32 %v6320_v8, %v1191_v52  ;;  %v5382_v20 = vpop.f32.mrb[94].mxu0 }
 0x1b7   :  { %v1658_v56 = vadd.f32 %v1530_v49, %v6035_v43  ;;  %v1531_v21 = vadd.f32 %v5382_v20, %v6320_v8  ;;  %v1194_v61 = vpop.f32.mrb[95].mxu0 }
 0x1b8   :  { %v1656_v44 = vadd.f32 %v1528_v36, %v6038_v60  ;;  %v1529_v46 = vadd.f32 %v6320_v8, %v1194_v61  ;;  %5511 = vmatprep.mubr.msk.bf16.mxu1 %vm1927_vm2, %v1866_v14 }
 0x1b9   :  { %v1659_v22 = vadd.f32 %v1531_v21, %v6048_v58  ;;  %5512 = vmatmul.mubr.msk.bf16.gmra.mrb[100].mxu1 %vm1927_vm2, %v1867_v9  ;;  %v1786_v37 = vmax.f32 %v1658_v56, 0.0 }
 0x1ba   :  { %v1657_v26 = vadd.f32 %v1529_v46, %v6054_v18  ;;  %v1784_v29 = vmax.f32 %v1656_v44, 0.0 }
 0x1bb   :  { %v1787_v27 = vmax.f32 %v1659_v22, 0.0 }
 0x1bc   :  { %v1785_v35 = vmax.f32 %v1657_v26, 0.0  ;;  %v5385_v53 = vpop.f32.mrb[96].mxu0 }
 0x1bd   :  { %v1869_v40 = vpack.c.bf16 %v1787_v27, %v1786_v37  ;;  %v1534_v42 = vadd.f32 %v5385_v53, %v6320_v8  ;;  %v1207_v51 = vpop.f32.mrb[97].mxu0 }
 0x1be   :  { %v1868_v38 = vpack.c.bf16 %v1785_v35, %v1784_v29  ;;  %v1532_v30 = vadd.f32 %v6320_v8, %v1207_v51  ;;  %v5386_v33 = vpop.f32.mrb[98].mxu0 }
 0x1bf   :  { %v1662_v54 = vadd.f32 %v1534_v42, %v6067_v23  ;;  %v1535_v55 = vadd.f32 %v5386_v33, %v6320_v8  ;;  %v1210_v57 = vpop.f32.mrb[99].mxu0 }
 0x1c0   :  { %v1660_v15 = vadd.f32 %v1532_v30, %v6070_v28  ;;  %v1533_v59 = vadd.f32 %v6320_v8, %v1210_v57  ;;  %5515 = vmatprep.mubr.msk.bf16.mxu1 %vm1927_vm2, %v1868_v38 }
 0x1c1   :  { %v1663_v41 = vadd.f32 %v1535_v55, %v6083_v19  ;;  %5516 = vmatmul.mubr.msk.bf16.gmra.mrb[104].mxu1 %vm1927_vm2, %v1869_v40  ;;  %v1790_v13 = vmax.f32 %v1662_v54, 0.0 }
 0x1c2   :  { %v1661_v63 = vadd.f32 %v1533_v59, %v6089_v39  ;;  %v1788_v12 = vmax.f32 %v1660_v15, 0.0 }
 0x1c3   :  { %v1791_v45 = vmax.f32 %v1663_v41, 0.0 }
 0x1c4   :  { %v1789_v0 = vmax.f32 %v1661_v63, 0.0  ;;  %v5389_v47 = vpop.f32.mrb[100].mxu0 }
 0x1c5   :  { %v1871_v31 = vpack.c.bf16 %v1791_v45, %v1790_v13  ;;  %v1538_v3 = vadd.f32 %v5389_v47, %v6365_v24  ;;  %v1223_v8 = vpop.f32.mrb[101].mxu0 }
 0x1c6   :  { %v1870_v5 = vpack.c.bf16 %v1789_v0, %v1788_v12  ;;  %v1536_v6 = vadd.f32 %v6365_v24, %v1223_v8  ;;  %v5390_v25 = vpop.f32.mrb[102].mxu0 }
 0x1c7   :  { %v1666_v9 = vadd.f32 %v1538_v3, %v5974_v48  ;;  %v1539_v49 = vadd.f32 %v5390_v25, %v6365_v24  ;;  %v1226_v52 = vpop.f32.mrb[103].mxu0 }
 0x1c8   :  { %v1664_v14 = vadd.f32 %v1536_v6, %v5977_v50  ;;  %v1537_v36 = vadd.f32 %v6365_v24, %v1226_v52  ;;  %5519 = vmatprep.mubr.msk.bf16.mxu1 %vm1927_vm2, %v1870_v5 }
 0x1c9   :  { %v1667_v20 = vadd.f32 %v1539_v49, %v5989_v62  ;;  %5520 = vmatmul.mubr.msk.bf16.gmra.mrb[108].mxu1 %vm1927_vm2, %v1871_v31  ;;  %v1794_v21 = vmax.f32 %v1666_v9, 0.0 }
 0x1ca   :  { %v1665_v56 = vadd.f32 %v1537_v36, %v5994_v2  ;;  %v1792_v44 = vmax.f32 %v1664_v14, 0.0 }
 0x1cb   :  { %v1795_v61 = vmax.f32 %v1667_v20, 0.0 }
 0x1cc   :  { %v1793_v46 = vmax.f32 %v1665_v56, 0.0  ;;  %v5393_v22 = vpop.f32.mrb[104].mxu0 }
 0x1cd   :  { %v1873_v26 = vpack.c.bf16 %v1795_v61, %v1794_v21  ;;  %v1542_v37 = vadd.f32 %v5393_v22, %v6365_v24  ;;  %v1239_v27 = vpop.f32.mrb[105].mxu0  ;;  %v1399_v22 = vcombine.high %v6308_v1, %v6308_v1  ;;  %v6412_v1 = vld [vmem:[%s8047_s9] ss:$0 sm:$0xff] }
 0x1ce   :  { %v1872_v29 = vpack.c.bf16 %v1793_v46, %v1792_v44  ;;  %v1540_v35 = vadd.f32 %v6365_v24, %v1239_v27  ;;  %v5394_v53 = vpop.f32.mrb[106].mxu0 }
 0x1cf   :  { %v1670_v40 = vadd.f32 %v1542_v37, %v6003_v10  ;;  %v1543_v42 = vadd.f32 %v5394_v53, %v6365_v24  ;;  %v1242_v51 = vpop.f32.mrb[107].mxu0 }
 0x1d0   :  { %v1668_v38 = vadd.f32 %v1540_v35, %v6006_v17  ;;  %v1541_v30 = vadd.f32 %v6365_v24, %v1242_v51  ;;  %5523 = vmatprep.mubr.msk.bf16.mxu1 %vm1927_vm2, %v1872_v29 }
 0x1d1   :  { %v1671_v33 = vadd.f32 %v1543_v42, %v6019_v34  ;;  %5524 = vmatmul.mubr.msk.bf16.gmra.mrb[112].mxu1 %vm1927_vm2, %v1873_v26  ;;  %v1798_v54 = vmax.f32 %v1670_v40, 0.0  ;;  %v6415_v42 = vrot.slane %v1399_v22, %v5694_v16 }
 0x1d2   :  { %v1669_v11 = vadd.f32 %v1541_v30, %v6024_v32  ;;  %v1796_v57 = vmax.f32 %v1668_v38, 0.0 }
 0x1d3   :  { %v1799_v55 = vmax.f32 %v1671_v33, 0.0 }
 0x1d4   :  { %v1797_v15 = vmax.f32 %v1669_v11, 0.0  ;;  %v5397_v59 = vpop.f32.mrb[108].mxu0 }
 0x1d5   :  { %v1875_v41 = vpack.c.bf16 %v1799_v55, %v1798_v54  ;;  %v1546_v63 = vadd.f32 %v5397_v59, %v6365_v24  ;;  %v1255_v13 = vpop.f32.mrb[109].mxu0 }
 0x1d6   :  { %v1874_v45 = vpack.c.bf16 %v1797_v15, %v1796_v57  ;;  %v1544_v12 = vadd.f32 %v6365_v24, %v1255_v13  ;;  %v5398_v0 = vpop.f32.mrb[110].mxu0 }
 0x1d7   :  { %v1674_v47 = vadd.f32 %v1546_v63, %v6035_v43  ;;  %v1547_v31 = vadd.f32 %v5398_v0, %v6365_v24  ;;  %v1258_v3 = vpop.f32.mrb[111].mxu0  ;;  %v6424_v0 = vld [vmem:[%s8048_s10] ss:$0 sm:$0xff] }
 0x1d8   :  { %v1672_v8 = vadd.f32 %v1544_v12, %v6038_v60  ;;  %v1545_v5 = vadd.f32 %v6365_v24, %v1258_v3  ;;  %5527 = vmatprep.mubr.msk.bf16.mxu1 %vm1927_vm2, %v1874_v45 }
 0x1d9   :  { %v1675_v6 = vadd.f32 %v1547_v31, %v6048_v58  ;;  %5528 = vmatmul.mubr.msk.bf16.gmra.mrb[116].mxu1 %vm1927_vm2, %v1875_v41  ;;  %v1802_v9 = vmax.f32 %v1674_v47, 0.0 }
 0x1da   :  { %v1673_v25 = vadd.f32 %v1545_v5, %v6054_v18  ;;  %v1800_v52 = vmax.f32 %v1672_v8, 0.0 }
 0x1db   :  { %v1803_v49 = vmax.f32 %v1675_v6, 0.0 }
 0x1dc   :  { %v1801_v14 = vmax.f32 %v1673_v25, 0.0  ;;  %v5401_v36 = vpop.f32.mrb[112].mxu0 }
 0x1dd   :  { %v1877_v20 = vpack.c.bf16 %v1803_v49, %v1802_v9  ;;  %v1550_v56 = vadd.f32 %v5401_v36, %v6365_v24  ;;  %v1271_v21 = vpop.f32.mrb[113].mxu0 }
 0x1de   :  { %v1876_v61 = vpack.c.bf16 %v1801_v14, %v1800_v52  ;;  %v1548_v44 = vadd.f32 %v6365_v24, %v1271_v21  ;;  %v5402_v46 = vpop.f32.mrb[114].mxu0 }
 0x1df   :  { %v1678_v26 = vadd.f32 %v1550_v56, %v6067_v23  ;;  %v1551_v37 = vadd.f32 %v5402_v46, %v6365_v24  ;;  %v1274_v27 = vpop.f32.mrb[115].mxu0 }
 0x1e0   :  { %v1676_v29 = vadd.f32 %v1548_v44, %v6070_v28  ;;  %v1549_v35 = vadd.f32 %v6365_v24, %v1274_v27  ;;  %5531 = vmatprep.mubr.msk.bf16.mxu1 %vm1927_vm2, %v1876_v61 }
 0x1e1   :  { %v1679_v53 = vadd.f32 %v1551_v37, %v6083_v19  ;;  %5532 = vmatmul.mubr.msk.bf16.gmra.mrb[120].mxu1 %vm1927_vm2, %v1877_v20  ;;  %v1806_v51 = vmax.f32 %v1678_v26, 0.0 }
 0x1e2   :  { %v1677_v40 = vadd.f32 %v1549_v35, %v6089_v39  ;;  %v1804_v30 = vmax.f32 %v1676_v29, 0.0 }
 0x1e3   :  { %v1807_v38 = vmax.f32 %v1679_v53, 0.0 }
 0x1e4   :  { %v1805_v24 = vmax.f32 %v1677_v40, 0.0  ;;  %v5405_v33 = vpop.f32.mrb[116].mxu0  ;;  %v5429_v11 = vpop.f32.mrb[16].mxu1 }
 0x1e5   :  { %v1879_v54 = vpack.c.bf16 %v1807_v38, %v1806_v51  ;;  %v1554_v55 = vadd.f32 %v5405_v33, %v6415_v42  ;;  %v2163_v57 = vadd.f32 %v5429_v11, %v6412_v1  ;;  %v1287_v15 = vpop.f32.mrb[117].mxu0  ;;  %v2154_v59 = vpop.f32.mrb[17].mxu1 }
 0x1e6   :  { %v1878_v41 = vpack.c.bf16 %v1805_v24, %v1804_v30  ;;  %v1552_v63 = vadd.f32 %v6415_v42, %v1287_v15  ;;  %v2155_v13 = vadd.f32 %v6412_v1, %v2154_v59  ;;  %v5406_v45 = vpop.f32.mrb[118].mxu0  ;;  %v5430_v12 = vpop.f32.mrb[18].mxu1 }
 0x1e7   :  { %v1682_v47 = vadd.f32 %v1554_v55, %v5974_v48  ;;  %v2667_v31 = vmax.f32 %v2163_v57, 0.0  ;;  %v1555_v3 = vadd.f32 %v5406_v45, %v6415_v42  ;;  %v2166_v8 = vadd.f32 %v5430_v12, %v6412_v1  ;;  %v1290_v5 = vpop.f32.mrb[119].mxu0  ;;  %v2157_v6 = vpop.f32.mrb[19].mxu1 }
 0x1e8   :  { %v1680_v25 = vadd.f32 %v1552_v63, %v5977_v50  ;;  %v2665_v9 = vmax.f32 %v2155_v13, 0.0  ;;  %v1553_v49 = vadd.f32 %v6415_v42, %v1290_v5  ;;  %v2158_v52 = vadd.f32 %v6412_v1, %v2157_v6  ;;  %5535 = vmatprep.mubr.msk.bf16.mxu1 %vm1927_vm2, %v1878_v41 }
 0x1e9   :  { %v1683_v14 = vadd.f32 %v1555_v3, %v5989_v62  ;;  %v2668_v36 = vmax.f32 %v2166_v8, 0.0  ;;  %5536 = vmatmul.mubr.msk.bf16.gmra.mrb[124].mxu1 %vm1927_vm2, %v1879_v54  ;;  %v2802_v48 = vmul.f32 %v6424_v0, %v2667_v31  ;;  %v1810_v50 = vmax.f32 %v1682_v47, 0.0 }
 0x1ea   :  { %v1681_v20 = vadd.f32 %v1553_v49, %v5994_v2  ;;  %v2666_v56 = vmax.f32 %v2158_v52, 0.0  ;;  %v2800_v21 = vmul.f32 %v6424_v0, %v2665_v9  ;;  %v1808_v22 = vmax.f32 %v1680_v25, 0.0 }
 0x1eb   :  { %v1811_v61 = vmax.f32 %v1683_v14, 0.0  ;;  %v2934_v44 = vsel %vm1927_vm2, %v2802_v48, 0.0  ;;  %v2803_v46 = vmul.f32 %v6424_v0, %v2668_v36 }
 0x1ec   :  { %v1809_v26 = vmax.f32 %v1681_v20, 0.0  ;;  %2935 = vadd.xlane.f32.xlu1 %v2934_v44  ;;  %v5409_v62 = vpop.f32.mrb[120].mxu0  ;;  %v5433_v37 = vpop.f32.mrb[20].mxu1  ;;  %v2928_v27 = vsel %vm1927_vm2, %v2800_v21, 0.0  ;;  %v2801_v29 = vmul.f32 %v6424_v0, %v2666_v56 }
 0x1ed   :  { %v1881_v35 = vpack.c.bf16 %v1811_v61, %v1810_v50  ;;  %v1558_v2 = vadd.f32 %v5409_v62, %v6415_v42  ;;  %v2179_v53 = vadd.f32 %v5433_v37, %v6412_v1  ;;  %2929 = vadd.xlane.f32.xlu0 %v2928_v27  ;;  %v1303_v40 = vpop.f32.mrb[121].mxu0  ;;  %v2170_v51 = vpop.f32.mrb[21].mxu1  ;;  %v2937_v38 = vsel %vm1927_vm2, %v2803_v46, 0.0 }
 0x1ee   :  { %v1880_v30 = vpack.c.bf16 %v1809_v26, %v1808_v22  ;;  %v1556_v24 = vadd.f32 %v6415_v42, %v1303_v40  ;;  %v2171_v33 = vadd.f32 %v6412_v1, %v2170_v51  ;;  %v5410_v11 = vpop.f32.mrb[122].mxu0  ;;  %v5434_v54 = vpop.f32.mrb[22].mxu1  ;;  %v2931_v55 = vsel %vm1927_vm2, %v2801_v29, 0.0 }
 0x1ef   :  { %v1686_v57 = vadd.f32 %v1558_v2, %v6003_v10  ;;  %v2671_v15 = vmax.f32 %v2179_v53, 0.0  ;;  %v1559_v59 = vadd.f32 %v5410_v11, %v6415_v42  ;;  %v2182_v41 = vadd.f32 %v5434_v54, %v6412_v1  ;;  %v1306_v63 = vpop.f32.mrb[123].mxu0  ;;  %v2173_v13 = vpop.f32.mrb[23].mxu1 }
 0x1f0   :  { %v1684_v45 = vadd.f32 %v1556_v24, %v6006_v17  ;;  %v2669_v12 = vmax.f32 %v2171_v33, 0.0  ;;  %v1557_v47 = vadd.f32 %v6415_v42, %v1306_v63  ;;  %v2174_v31 = vadd.f32 %v6412_v1, %v2173_v13  ;;  %2938 = vadd.xlane.f32.xlu1 %v2937_v38  ;;  %5539 = vmatprep.mubr.msk.bf16.mxu1 %vm1927_vm2, %v1880_v30 }
 0x1f1   :  { %v1687_v3 = vadd.f32 %v1559_v59, %v6019_v34  ;;  %v2672_v10 = vmax.f32 %v2182_v41, 0.0  ;;  %2932 = vadd.xlane.f32.xlu0 %v2931_v55  ;;  %5540 = vmatmul.mubr.msk.bf16.gmra.mrb[128].mxu1 %vm1927_vm2, %v1881_v35  ;;  %v2806_v8 = vmul.f32 %v6424_v0, %v2671_v15  ;;  %v1814_v25 = vmax.f32 %v1686_v57, 0.0 }
 0x1f2   :  { %v1685_v5 = vadd.f32 %v1557_v47, %v6024_v32  ;;  %v2670_v6 = vmax.f32 %v2174_v31, 0.0  ;;  %v2804_v17 = vmul.f32 %v6424_v0, %v2669_v12  ;;  %v1812_v14 = vmax.f32 %v1684_v45, 0.0 }
 0x1f3   :  { %v1815_v9 = vmax.f32 %v1687_v3, 0.0  ;;  %v2946_v49 = vsel %vm1927_vm2, %v2806_v8, 0.0  ;;  %v2807_v52 = vmul.f32 %v6424_v0, %v2672_v10 }
 0x1f4   :  { %v1813_v36 = vmax.f32 %v1685_v5, 0.0  ;;  %v5413_v34 = vpop.f32.mrb[124].mxu0  ;;  %v5437_v48 = vpop.f32.mrb[24].mxu1  ;;  %v2805_v20 = vmul.f32 %v6424_v0, %v2670_v6  ;;  %v2940_v27 = vsel %vm1927_vm2, %v2804_v17, 0.0 }
 0x1f5   :  { %v1883_v56 = vpack.c.bf16 %v1815_v9, %v1814_v25  ;;  %v1562_v21 = vadd.f32 %v5413_v34, %v6415_v42  ;;  %v2195_v32 = vadd.f32 %v5437_v48, %v6412_v1  ;;  %2947 = vadd.xlane.f32.xlu0 %v2946_v49  ;;  %v1319_v50 = vpop.f32.mrb[125].mxu0  ;;  %v2186_v61 = vpop.f32.mrb[25].mxu1  ;;  %v2949_v44 = vsel %vm1927_vm2, %v2807_v52, 0.0 }
 0x1f6   :  { %v1882_v46 = vpack.c.bf16 %v1813_v36, %v1812_v14  ;;  %v1560_v22 = vadd.f32 %v6415_v42, %v1319_v50  ;;  %v2187_v26 = vadd.f32 %v6412_v1, %v2186_v61  ;;  %2950 = vadd.xlane.f32.xlu1 %v2949_v44  ;;  %v5414_v62 = vpop.f32.mrb[126].mxu0  ;;  %v5438_v37 = vpop.f32.mrb[26].mxu1 }
 0x1f7   :  { %v1690_v29 = vadd.f32 %v1562_v21, %v6035_v43  ;;  %v2675_v35 = vmax.f32 %v2195_v32, 0.0  ;;  %v1563_v2 = vadd.f32 %v5414_v62, %v6415_v42  ;;  %v2198_v53 = vadd.f32 %v5438_v37, %v6412_v1  ;;  %v1322_v40 = vpop.f32.mrb[127].mxu0  ;;  %v2189_v51 = vpop.f32.mrb[27].mxu1 }
 0x1f8   :  { %v1688_v38 = vadd.f32 %v1560_v22, %v6038_v60  ;;  %v2673_v30 = vmax.f32 %v2187_v26, 0.0  ;;  %v1561_v24 = vadd.f32 %v6415_v42, %v1322_v40  ;;  %v2190_v33 = vadd.f32 %v6412_v1, %v2189_v51  ;;  %5543 = vmatprep.mubr.msk.bf16.mxu1 %vm1927_vm2, %v1882_v46 }
 0x1f9   :  { %v1691_v11 = vadd.f32 %v1563_v2, %v6048_v58  ;;  %v2676_v54 = vmax.f32 %v2198_v53, 0.0  ;;  %2941 = vadd.xlane.f32.xlu0 %v2940_v27  ;;  %5544 = vmatmul.mubr.msk.bf16.gmra.mrb[132].mxu1 %vm1927_vm2, %v1883_v56  ;;  %v2943_v43 = vsel %vm1927_vm2, %v2805_v20, 0.0  ;;  %v2810_v55 = vmul.f32 %v6424_v0, %v2675_v35 }
 0x1fa   :  { %v1689_v57 = vadd.f32 %v1561_v24, %v6054_v18  ;;  %v2674_v60 = vmax.f32 %v2190_v33, 0.0  ;;  %2944 = vadd.xlane.f32.xlu1 %v2943_v43  ;;  %v2808_v15 = vmul.f32 %v6424_v0, %v2673_v30  ;;  %v1818_v59 = vmax.f32 %v1690_v29, 0.0 }
 0x1fb   :  { %v1819_v41 = vmax.f32 %v1691_v11, 0.0  ;;  %v2958_v63 = vsel %vm1927_vm2, %v2810_v55, 0.0  ;;  %v2811_v58 = vmul.f32 %v6424_v0, %v2676_v54  ;;  %v1816_v13 = vmax.f32 %v1688_v38, 0.0 }
 0x1fc   :  { %v1817_v45 = vmax.f32 %v1689_v57, 0.0  ;;  %v5417_v12 = vpop.f32.mrb[128].mxu0  ;;  %v5441_v47 = vpop.f32.mrb[28].mxu1  ;;  %v2809_v31 = vmul.f32 %v6424_v0, %v2674_v60  ;;  %v2952_v14 = vsel %vm1927_vm2, %v2808_v15, 0.0 }
 0x1fd   :  { %v1885_v3 = vpack.c.bf16 %v1819_v41, %v1818_v59  ;;  %v1566_v10 = vadd.f32 %v5417_v12, %v6415_v42  ;;  %v2211_v18 = vadd.f32 %v5441_v47, %v6412_v1  ;;  %2959 = vadd.xlane.f32.xlu0 %v2958_v63  ;;  %v1335_v8 = vpop.f32.mrb[129].mxu0  ;;  %v2202_v5 = vpop.f32.mrb[29].mxu1  ;;  %v2961_v6 = vsel %vm1927_vm2, %v2811_v58, 0.0 }
 0x1fe   :  { %v1884_v17 = vpack.c.bf16 %v1817_v45, %v1816_v13  ;;  %v1564_v25 = vadd.f32 %v6415_v42, %v1335_v8  ;;  %v2203_v9 = vadd.f32 %v6412_v1, %v2202_v5  ;;  %2962 = vadd.xlane.f32.xlu1 %v2961_v6  ;;  %v5418_v49 = vpop.f32.mrb[130].mxu0  ;;  %v5442_v52 = vpop.f32.mrb[30].mxu1 }
 0x1ff   :  { %v1694_v36 = vadd.f32 %v1566_v10, %v6067_v23  ;;  %v2679_v34 = vmax.f32 %v2211_v18, 0.0  ;;  %v1567_v48 = vadd.f32 %v5418_v49, %v6415_v42  ;;  %v2214_v20 = vadd.f32 %v5442_v52, %v6412_v1  ;;  %v1338_v56 = vpop.f32.mrb[131].mxu0  ;;  %v2205_v21 = vpop.f32.mrb[31].mxu1 }
 0x200   :  { %v1692_v32 = vadd.f32 %v1564_v25, %v6070_v28  ;;  %v2677_v50 = vmax.f32 %v2203_v9, 0.0  ;;  %v1565_v61 = vadd.f32 %v6415_v42, %v1338_v56  ;;  %v2206_v44 = vadd.f32 %v6412_v1, %v2205_v21  ;;  %5547 = vmatprep.mubr.msk.bf16.mxu1 %vm1927_vm2, %v1884_v17 }
 0x201   :  { %v1695_v46 = vadd.f32 %v1567_v48, %v6083_v19  ;;  %v2680_v22 = vmax.f32 %v2214_v20, 0.0  ;;  %2953 = vadd.xlane.f32.xlu0 %v2952_v14  ;;  %5548 = vmatmul.mubr.msk.bf16.gmra.mrb[136].mxu1 %vm1927_vm2, %v1885_v3  ;;  %v2955_v23 = vsel %vm1927_vm2, %v2809_v31, 0.0  ;;  %v2814_v26 = vmul.f32 %v6424_v0, %v2679_v34 }
 0x202   :  { %v1693_v62 = vadd.f32 %v1565_v61, %v6089_v39  ;;  %v2678_v28 = vmax.f32 %v2206_v44, 0.0  ;;  %2956 = vadd.xlane.f32.xlu1 %v2955_v23  ;;  %v1822_v37 = vmax.f32 %v1694_v36, 0.0  ;;  %v1820_v35 = vmax.f32 %v1692_v32, 0.0 }
 0x203   :  { %v1823_v42 = vmax.f32 %v1695_v46, 0.0  ;;  %v2970_v27 = vsel %vm1927_vm2, %v2814_v26, 0.0  ;;  %v2815_v29 = vmul.f32 %v6424_v0, %v2680_v22  ;;  %v2812_v53 = vmul.f32 %v6424_v0, %v2677_v50 }
 0x204   :  { %v1821_v19 = vmax.f32 %v1693_v62, 0.0  ;;  %v5445_v2 = vpop.f32.mrb[32].mxu1  ;;  %v2813_v30 = vmul.f32 %v6424_v0, %v2678_v28 }
 0x205   :  { %v1887_v40 = vpack.c.bf16 %v1823_v42, %v1822_v37  ;;  %v2227_v51 = vadd.f32 %v5445_v2, %v6412_v1  ;;  %2971 = vadd.xlane.f32.xlu0 %v2970_v27  ;;  %v2218_v38 = vpop.f32.mrb[33].mxu1  ;;  %v2973_v39 = vsel %vm1927_vm2, %v2815_v29, 0.0  ;;  %v2964_v15 = vsel %vm1927_vm2, %v2812_v53, 0.0 }
 0x206   :  { %v1886_v24 = vpack.c.bf16 %v1821_v19, %v1820_v35  ;;  %v2219_v33 = vadd.f32 %v6412_v1, %v2218_v38  ;;  %2974 = vadd.xlane.f32.xlu1 %v2973_v39  ;;  %v5446_v11 = vpop.f32.mrb[34].mxu1  ;;  %v2967_v41 = vsel %vm1927_vm2, %v2813_v30, 0.0 }
 0x207   :  { %v2683_v54 = vmax.f32 %v2227_v51, 0.0  ;;  %v2230_v43 = vadd.f32 %v5446_v11, %v6412_v1  ;;  %v2221_v55 = vpop.f32.mrb[35].mxu1 }
 0x208   :  { %v2681_v57 = vmax.f32 %v2219_v33, 0.0  ;;  %v2222_v60 = vadd.f32 %v6412_v1, %v2221_v55  ;;  %5551 = vmatprep.mubr.msk.bf16.mxu1 %vm1927_vm2, %v1886_v24 }
 0x209   :  { %v2684_v59 = vmax.f32 %v2230_v43, 0.0  ;;  %2965 = vadd.xlane.f32.xlu0 %v2964_v15  ;;  %5552 = vmatmul.mubr.msk.bf16.gmra.mrb[140].mxu1 %vm1927_vm2, %v1887_v40  ;;  %v2818_v63 = vmul.f32 %v6424_v0, %v2683_v54 }
 0x20a   :  { %v2682_v58 = vmax.f32 %v2222_v60, 0.0  ;;  %2968 = vadd.xlane.f32.xlu1 %v2967_v41  ;;  %v2816_v47 = vmul.f32 %v6424_v0, %v2681_v57 }
 0x20b   :  { %v2982_v13 = vsel %vm1927_vm2, %v2818_v63, 0.0  ;;  %v2819_v45 = vmul.f32 %v6424_v0, %v2684_v59 }
 0x20c   :  { %v5449_v12 = vpop.f32.mrb[36].mxu1  ;;  %v2817_v18 = vmul.f32 %v6424_v0, %v2682_v58  ;;  %v2976_v52 = vsel %vm1927_vm2, %v2816_v47, 0.0 }
 0x20d   :  { %v2243_v31 = vadd.f32 %v5449_v12, %v6412_v1  ;;  %2983 = vadd.xlane.f32.xlu0 %v2982_v13  ;;  %v2234_v3 = vpop.f32.mrb[37].mxu1  ;;  %v2985_v10 = vsel %vm1927_vm2, %v2819_v45, 0.0 }
 0x20e   :  { %v2235_v8 = vadd.f32 %v6412_v1, %v2234_v3  ;;  %2986 = vadd.xlane.f32.xlu1 %v2985_v10  ;;  %v5450_v5 = vpop.f32.mrb[38].mxu1  ;;  %v2979_v36 = vsel %vm1927_vm2, %v2817_v18, 0.0 }
 0x20f   :  { %v2687_v6 = vmax.f32 %v2243_v31, 0.0  ;;  %v2246_v17 = vadd.f32 %v5450_v5, %v6412_v1  ;;  %v2237_v25 = vpop.f32.mrb[39].mxu1 }
 0x210   :  { %v2685_v9 = vmax.f32 %v2235_v8, 0.0  ;;  %v2238_v49 = vadd.f32 %v6412_v1, %v2237_v25 }
 0x211   :  { %v2688_v14 = vmax.f32 %v2246_v17, 0.0  ;;  %2977 = vadd.xlane.f32.xlu0 %v2976_v52  ;;  %v2822_v34 = vmul.f32 %v6424_v0, %v2687_v6 }
 0x212   :  { %v2686_v48 = vmax.f32 %v2238_v49, 0.0  ;;  %2980 = vadd.xlane.f32.xlu1 %v2979_v36  ;;  %v2820_v32 = vmul.f32 %v6424_v0, %v2685_v9 }
 0x213   :  { %v2994_v20 = vsel %vm1927_vm2, %v2822_v34, 0.0  ;;  %v2823_v56 = vmul.f32 %v6424_v0, %v2688_v14 }
 0x214   :  { %v5453_v21 = vpop.f32.mrb[40].mxu1  ;;  %v2821_v46 = vmul.f32 %v6424_v0, %v2686_v48  ;;  %v2988_v27 = vsel %vm1927_vm2, %v2820_v32, 0.0 }
 0x215   :  { %v2259_v50 = vadd.f32 %v5453_v21, %v6412_v1  ;;  %2995 = vadd.xlane.f32.xlu0 %v2994_v20  ;;  %v2250_v61 = vpop.f32.mrb[41].mxu1  ;;  %v2997_v44 = vsel %vm1927_vm2, %v2823_v56, 0.0 }
 0x216   :  { %v2251_v22 = vadd.f32 %v6412_v1, %v2250_v61  ;;  %2998 = vadd.xlane.f32.xlu1 %v2997_v44  ;;  %v5454_v23 = vpop.f32.mrb[42].mxu1  ;;  %v2991_v35 = vsel %vm1927_vm2, %v2821_v46, 0.0 }
 0x217   :  { %v2691_v26 = vmax.f32 %v2259_v50, 0.0  ;;  %v2262_v62 = vadd.f32 %v5454_v23, %v6412_v1  ;;  %v2253_v28 = vpop.f32.mrb[43].mxu1 }
 0x218   :  { %v2689_v37 = vmax.f32 %v2251_v22, 0.0  ;;  %v2254_v42 = vadd.f32 %v6412_v1, %v2253_v28 }
 0x219   :  { %v2692_v29 = vmax.f32 %v2262_v62, 0.0  ;;  %2989 = vadd.xlane.f32.xlu0 %v2988_v27  ;;  %v2826_v19 = vmul.f32 %v6424_v0, %v2691_v26 }
 0x21a   :  { %v2690_v2 = vmax.f32 %v2254_v42, 0.0  ;;  %2992 = vadd.xlane.f32.xlu1 %v2991_v35  ;;  %v2824_v38 = vmul.f32 %v6424_v0, %v2689_v37 }
 0x21b   :  { %v3006_v53 = vsel %vm1927_vm2, %v2826_v19, 0.0  ;;  %v2827_v40 = vmul.f32 %v6424_v0, %v2692_v29 }
 0x21c   :  { %v5457_v51 = vpop.f32.mrb[44].mxu1  ;;  %v2825_v33 = vmul.f32 %v6424_v0, %v2690_v2  ;;  %v3000_v59 = vsel %vm1927_vm2, %v2824_v38, 0.0 }
 0x21d   :  { %v2275_v39 = vadd.f32 %v5457_v51, %v6412_v1  ;;  %3007 = vadd.xlane.f32.xlu0 %v3006_v53  ;;  %v2266_v30 = vpop.f32.mrb[45].mxu1  ;;  %v3009_v24 = vsel %vm1927_vm2, %v2827_v40, 0.0 }
 0x21e   :  { %v2267_v11 = vadd.f32 %v6412_v1, %v2266_v30  ;;  %3010 = vadd.xlane.f32.xlu1 %v3009_v24  ;;  %v5458_v54 = vpop.f32.mrb[46].mxu1  ;;  %v3003_v63 = vsel %vm1927_vm2, %v2825_v33, 0.0 }
 0x21f   :  { %v2695_v43 = vmax.f32 %v2275_v39, 0.0  ;;  %v2278_v55 = vadd.f32 %v5458_v54, %v6412_v1  ;;  %v2269_v57 = vpop.f32.mrb[47].mxu1 }
 0x220   :  { %v2693_v60 = vmax.f32 %v2267_v11, 0.0  ;;  %v2270_v15 = vadd.f32 %v6412_v1, %v2269_v57 }
 0x221   :  { %v2696_v41 = vmax.f32 %v2278_v55, 0.0  ;;  %3001 = vadd.xlane.f32.xlu0 %v3000_v59  ;;  %v2830_v58 = vmul.f32 %v6424_v0, %v2695_v43 }
 0x222   :  { %v2694_v13 = vmax.f32 %v2270_v15, 0.0  ;;  %3004 = vadd.xlane.f32.xlu1 %v3003_v63  ;;  %v2828_v31 = vmul.f32 %v6424_v0, %v2693_v60 }
 0x223   :  { %v3018_v45 = vsel %vm1927_vm2, %v2830_v58, 0.0  ;;  %v2831_v12 = vmul.f32 %v6424_v0, %v2696_v41 }
 0x224   :  { %v5461_v47 = vpop.f32.mrb[48].mxu1  ;;  %v2829_v8 = vmul.f32 %v6424_v0, %v2694_v13  ;;  %v3012_v14 = vsel %vm1927_vm2, %v2828_v31, 0.0 }
 0x225   :  { %v2291_v3 = vadd.f32 %v5461_v47, %v6412_v1  ;;  %3019 = vadd.xlane.f32.xlu0 %v3018_v45  ;;  %v2282_v10 = vpop.f32.mrb[49].mxu1  ;;  %v3021_v18 = vsel %vm1927_vm2, %v2831_v12, 0.0 }
 0x226   :  { %v2283_v5 = vadd.f32 %v6412_v1, %v2282_v10  ;;  %3022 = vadd.xlane.f32.xlu1 %v3021_v18  ;;  %v5462_v6 = vpop.f32.mrb[50].mxu1  ;;  %v3015_v34 = vsel %vm1927_vm2, %v2829_v8, 0.0 }
 0x227   :  { %v2699_v17 = vmax.f32 %v2291_v3, 0.0  ;;  %v2294_v25 = vadd.f32 %v5462_v6, %v6412_v1  ;;  %v2285_v9 = vpop.f32.mrb[51].mxu1 }
 0x228   :  { %v2697_v49 = vmax.f32 %v2283_v5, 0.0  ;;  %v2286_v52 = vadd.f32 %v6412_v1, %v2285_v9 }
 0x229   :  { %v2700_v36 = vmax.f32 %v2294_v25, 0.0  ;;  %3013 = vadd.xlane.f32.xlu0 %v3012_v14  ;;  %v2834_v48 = vmul.f32 %v6424_v0, %v2699_v17 }
 0x22a   :  { %v2698_v20 = vmax.f32 %v2286_v52, 0.0  ;;  %3016 = vadd.xlane.f32.xlu1 %v3015_v34  ;;  %v2832_v50 = vmul.f32 %v6424_v0, %v2697_v49 }
 0x22b   :  { %v3030_v56 = vsel %vm1927_vm2, %v2834_v48, 0.0  ;;  %v2835_v21 = vmul.f32 %v6424_v0, %v2700_v36 }
 0x22c   :  { %v5465_v32 = vpop.f32.mrb[52].mxu1  ;;  %v2833_v22 = vmul.f32 %v6424_v0, %v2698_v20  ;;  %v3024_v29 = vsel %vm1927_vm2, %v2832_v50, 0.0 }
 0x22d   :  { %v2307_v61 = vadd.f32 %v5465_v32, %v6412_v1  ;;  %3031 = vadd.xlane.f32.xlu0 %v3030_v56  ;;  %v2298_v44 = vpop.f32.mrb[53].mxu1  ;;  %v3033_v46 = vsel %vm1927_vm2, %v2835_v21, 0.0 }
 0x22e   :  { %v2299_v23 = vadd.f32 %v6412_v1, %v2298_v44  ;;  %3034 = vadd.xlane.f32.xlu1 %v3033_v46  ;;  %v5466_v26 = vpop.f32.mrb[54].mxu1  ;;  %v3027_v19 = vsel %vm1927_vm2, %v2833_v22, 0.0 }
 0x22f   :  { %v2703_v62 = vmax.f32 %v2307_v61, 0.0  ;;  %v2310_v28 = vadd.f32 %v5466_v26, %v6412_v1  ;;  %v2301_v37 = vpop.f32.mrb[55].mxu1 }
 0x230   :  { %v2701_v42 = vmax.f32 %v2299_v23, 0.0  ;;  %v2302_v27 = vadd.f32 %v6412_v1, %v2301_v37 }
 0x231   :  { %v2704_v35 = vmax.f32 %v2310_v28, 0.0  ;;  %3025 = vadd.xlane.f32.xlu0 %v3024_v29  ;;  %v2838_v2 = vmul.f32 %v6424_v0, %v2703_v62 }
 0x232   :  { %v2702_v53 = vmax.f32 %v2302_v27, 0.0  ;;  %3028 = vadd.xlane.f32.xlu1 %v3027_v19  ;;  %v2836_v39 = vmul.f32 %v6424_v0, %v2701_v42 }
 0x233   :  { %v3042_v40 = vsel %vm1927_vm2, %v2838_v2, 0.0  ;;  %v2839_v51 = vmul.f32 %v6424_v0, %v2704_v35 }
 0x234   :  { %v5469_v38 = vpop.f32.mrb[56].mxu1  ;;  %v2837_v11 = vmul.f32 %v6424_v0, %v2702_v53  ;;  %v3036_v41 = vsel %vm1927_vm2, %v2836_v39, 0.0 }
 0x235   :  { %v2323_v30 = vadd.f32 %v5469_v38, %v6412_v1  ;;  %3043 = vadd.xlane.f32.xlu0 %v3042_v40  ;;  %v2314_v24 = vpop.f32.mrb[57].mxu1  ;;  %v3045_v33 = vsel %vm1927_vm2, %v2839_v51, 0.0 }
 0x236   :  { %v2315_v54 = vadd.f32 %v6412_v1, %v2314_v24  ;;  %3046 = vadd.xlane.f32.xlu1 %v3045_v33  ;;  %v5470_v43 = vpop.f32.mrb[58].mxu1  ;;  %v3039_v58 = vsel %vm1927_vm2, %v2837_v11, 0.0 }
 0x237   :  { %v2707_v55 = vmax.f32 %v2323_v30, 0.0  ;;  %v2326_v57 = vadd.f32 %v5470_v43, %v6412_v1  ;;  %v2317_v60 = vpop.f32.mrb[59].mxu1 }
 0x238   :  { %v2705_v15 = vmax.f32 %v2315_v54, 0.0  ;;  %v2318_v59 = vadd.f32 %v6412_v1, %v2317_v60 }
 0x239   :  { %v2708_v63 = vmax.f32 %v2326_v57, 0.0  ;;  %3037 = vadd.xlane.f32.xlu0 %v3036_v41  ;;  %v2842_v13 = vmul.f32 %v6424_v0, %v2707_v55 }
 0x23a   :  { %v2706_v45 = vmax.f32 %v2318_v59, 0.0  ;;  %3040 = vadd.xlane.f32.xlu1 %v3039_v58  ;;  %v2840_v3 = vmul.f32 %v6424_v0, %v2705_v15 }
 0x23b   :  { %v3054_v12 = vsel %vm1927_vm2, %v2842_v13, 0.0  ;;  %v2843_v47 = vmul.f32 %v6424_v0, %v2708_v63 }
 0x23c   :  { %v5473_v31 = vpop.f32.mrb[60].mxu1  ;;  %v2841_v5 = vmul.f32 %v6424_v0, %v2706_v45  ;;  %v3048_v36 = vsel %vm1927_vm2, %v2840_v3, 0.0  ;;  %v6627_v3 = vpop.permute.xlu1 %3323 }
 0x23d   :  { %v2339_v10 = vadd.f32 %v5473_v31, %v6412_v1  ;;  %3055 = vadd.xlane.f32.xlu0 %v3054_v12  ;;  %v2330_v18 = vpop.f32.mrb[61].mxu1  ;;  %v3057_v8 = vsel %vm1927_vm2, %v2843_v47, 0.0 }
 0x23e   :  { %v2331_v6 = vadd.f32 %v6412_v1, %v2330_v18  ;;  %3058 = vadd.xlane.f32.xlu1 %v3057_v8  ;;  %v5474_v17 = vpop.f32.mrb[62].mxu1  ;;  %v3051_v48 = vsel %vm1927_vm2, %v2841_v5, 0.0 }
 0x23f   :  { %v2711_v25 = vmax.f32 %v2339_v10, 0.0  ;;  %v2342_v9 = vadd.f32 %v5474_v17, %v6412_v1  ;;  %v2333_v49 = vpop.f32.mrb[63].mxu1 }
 0x240   :  { %v2709_v52 = vmax.f32 %v2331_v6, 0.0  ;;  %v2334_v14 = vadd.f32 %v6412_v1, %v2333_v49 }
 0x241   :  { %v2712_v34 = vmax.f32 %v2342_v9, 0.0  ;;  %3049 = vadd.xlane.f32.xlu0 %v3048_v36  ;;  %v2846_v20 = vmul.f32 %v6424_v0, %v2711_v25 }
 0x242   :  { %v2710_v56 = vmax.f32 %v2334_v14, 0.0  ;;  %3052 = vadd.xlane.f32.xlu1 %v3051_v48  ;;  %v2844_v61 = vmul.f32 %v6424_v0, %v2709_v52 }
 0x243   :  { %v3066_v21 = vsel %vm1927_vm2, %v2846_v20, 0.0  ;;  %v2847_v32 = vmul.f32 %v6424_v0, %v2712_v34 }
 0x244   :  { %v5477_v50 = vpop.f32.mrb[64].mxu1  ;;  %v2845_v23 = vmul.f32 %v6424_v0, %v2710_v56  ;;  %v3060_v35 = vsel %vm1927_vm2, %v2844_v61, 0.0 }
 0x245   :  { %v2355_v44 = vadd.f32 %v5477_v50, %v6412_v1  ;;  %3067 = vadd.xlane.f32.xlu0 %v3066_v21  ;;  %v2346_v46 = vpop.f32.mrb[65].mxu1  ;;  %v3069_v22 = vsel %vm1927_vm2, %v2847_v32, 0.0  ;;  %v6639_v32 = vpop.permute.xlu1 %3327 }
 0x246   :  { %v2347_v26 = vadd.f32 %v6412_v1, %v2346_v46  ;;  %3070 = vadd.xlane.f32.xlu1 %v3069_v22  ;;  %v5478_v62 = vpop.f32.mrb[66].mxu1  ;;  %v3063_v2 = vsel %vm1927_vm2, %v2845_v23, 0.0 }
 0x247   :  { %v2715_v28 = vmax.f32 %v2355_v44, 0.0  ;;  %v2358_v37 = vadd.f32 %v5478_v62, %v6412_v1  ;;  %v2349_v42 = vpop.f32.mrb[67].mxu1 }
 0x248   :  { %v2713_v27 = vmax.f32 %v2347_v26, 0.0  ;;  %v2350_v29 = vadd.f32 %v6412_v1, %v2349_v42 }
 0x249   :  { %v2716_v19 = vmax.f32 %v2358_v37, 0.0  ;;  %3061 = vadd.xlane.f32.xlu0 %v3060_v35  ;;  %v2850_v53 = vmul.f32 %v6424_v0, %v2715_v28  ;;  %v6647_v37 = vpop.permute.xlu0 %3319 }
 0x24a   :  { %v2714_v40 = vmax.f32 %v2350_v29, 0.0  ;;  %3064 = vadd.xlane.f32.xlu1 %v3063_v2  ;;  %v2848_v30 = vmul.f32 %v6424_v0, %v2713_v27  ;;  %v6651_v2 = vpop.permute.xlu1 %3331 }
 0x24b   :  { %v3078_v51 = vsel %vm1927_vm2, %v2850_v53, 0.0  ;;  %v2851_v38 = vmul.f32 %v6424_v0, %v2716_v19 }
 0x24c   :  { %v5481_v39 = vpop.f32.mrb[68].mxu1  ;;  %v2849_v54 = vmul.f32 %v6424_v0, %v2714_v40  ;;  %v3072_v63 = vsel %vm1927_vm2, %v2848_v30, 0.0 }
 0x24d   :  { %v2371_v24 = vadd.f32 %v5481_v39, %v6412_v1  ;;  %3079 = vadd.xlane.f32.xlu0 %v3078_v51  ;;  %v2362_v33 = vpop.f32.mrb[69].mxu1  ;;  %v3081_v11 = vsel %vm1927_vm2, %v2851_v38, 0.0 }
 0x24e   :  { %v2363_v43 = vadd.f32 %v6412_v1, %v2362_v33  ;;  %3082 = vadd.xlane.f32.xlu1 %v3081_v11  ;;  %v5482_v55 = vpop.f32.mrb[70].mxu1  ;;  %v3075_v13 = vsel %vm1927_vm2, %v2849_v54, 0.0  ;;  %v6659_v54 = vpop.permute.xlu0 %3335 }
 0x24f   :  { %v2719_v57 = vmax.f32 %v2371_v24, 0.0  ;;  %v2374_v60 = vadd.f32 %v5482_v55, %v6412_v1  ;;  %v2365_v15 = vpop.f32.mrb[71].mxu1 }
 0x250   :  { %v2717_v59 = vmax.f32 %v2363_v43, 0.0  ;;  %v2366_v41 = vadd.f32 %v6412_v1, %v2365_v15 }
 0x251   :  { %v2720_v58 = vmax.f32 %v2374_v60, 0.0  ;;  %3073 = vadd.xlane.f32.xlu0 %v3072_v63  ;;  %v2854_v45 = vmul.f32 %v6424_v0, %v2719_v57 }
 0x252   :  { %v2718_v12 = vmax.f32 %v2366_v41, 0.0  ;;  %3076 = vadd.xlane.f32.xlu1 %v3075_v13  ;;  %v2852_v18 = vmul.f32 %v6424_v0, %v2717_v59  ;;  %v6665_v41 = vpop.permute.xlu1 %3339 }
 0x253   :  { %v3090_v47 = vsel %vm1927_vm2, %v2854_v45, 0.0  ;;  %v2855_v31 = vmul.f32 %v6424_v0, %v2720_v58 }
 0x254   :  { %v5485_v10 = vpop.f32.mrb[72].mxu1  ;;  %v2853_v17 = vmul.f32 %v6424_v0, %v2718_v12  ;;  %v3084_v48 = vsel %vm1927_vm2, %v2852_v18, 0.0 }
 0x255   :  { %v2387_v8 = vadd.f32 %v5485_v10, %v6412_v1  ;;  %3091 = vadd.xlane.f32.xlu0 %v3090_v47  ;;  %v2378_v5 = vpop.f32.mrb[73].mxu1  ;;  %v3093_v6 = vsel %vm1927_vm2, %v2855_v31, 0.0 }
 0x256   :  { %v2379_v25 = vadd.f32 %v6412_v1, %v2378_v5  ;;  %3094 = vadd.xlane.f32.xlu1 %v3093_v6  ;;  %v5486_v9 = vpop.f32.mrb[74].mxu1  ;;  %v3087_v56 = vsel %vm1927_vm2, %v2853_v17, 0.0  ;;  %v6673_v6 = vpop.permute.xlu0 %3343 }
 0x257   :  { %v2723_v49 = vmax.f32 %v2387_v8, 0.0  ;;  %v2390_v52 = vadd.f32 %v5486_v9, %v6412_v1  ;;  %v2381_v14 = vpop.f32.mrb[75].mxu1 }
 0x258   :  { %v2721_v36 = vmax.f32 %v2379_v25, 0.0  ;;  %v2382_v34 = vadd.f32 %v6412_v1, %v2381_v14 }
 0x259   :  { %v2724_v20 = vmax.f32 %v2390_v52, 0.0  ;;  %3085 = vadd.xlane.f32.xlu0 %v3084_v48  ;;  %v2858_v21 = vmul.f32 %v6424_v0, %v2723_v49  ;;  %v6677_v49 = vpop.permute.xlu1 %3347 }
 0x25a   :  { %v2722_v50 = vmax.f32 %v2382_v34, 0.0  ;;  %3088 = vadd.xlane.f32.xlu1 %v3087_v56  ;;  %v2856_v22 = vmul.f32 %v6424_v0, %v2721_v36 }
 0x25b   :  { %v3102_v61 = vsel %vm1927_vm2, %v2858_v21, 0.0  ;;  %v2859_v44 = vmul.f32 %v6424_v0, %v2724_v20 }
 0x25c   :  { %v5489_v46 = vpop.f32.mrb[76].mxu1  ;;  %v2857_v28 = vmul.f32 %v6424_v0, %v2722_v50  ;;  %v3096_v51 = vsel %vm1927_vm2, %v2856_v22, 0.0 }
 0x25d   :  { %v2403_v23 = vadd.f32 %v5489_v46, %v6412_v1  ;;  %3103 = vadd.xlane.f32.xlu0 %v3102_v61  ;;  %v2394_v26 = vpop.f32.mrb[77].mxu1  ;;  %v3105_v62 = vsel %vm1927_vm2, %v2859_v44, 0.0  ;;  %v6685_v46 = vpop.permute.xlu0 %3351 }
 0x25e   :  { %v2395_v42 = vadd.f32 %v6412_v1, %v2394_v26  ;;  %3106 = vadd.xlane.f32.xlu1 %v3105_v62  ;;  %v5490_v27 = vpop.f32.mrb[78].mxu1  ;;  %v3099_v39 = vsel %vm1927_vm2, %v2857_v28, 0.0 }
 0x25f   :  { %v2727_v29 = vmax.f32 %v2403_v23, 0.0  ;;  %v2406_v35 = vadd.f32 %v5490_v27, %v6412_v1  ;;  %v2397_v19 = vpop.f32.mrb[79].mxu1  ;;  %v6690_v23 = vld [vmem:[%s8047_s9] ss:$0 sm:$0xff] }
 0x260   :  { %v2725_v53 = vmax.f32 %v2395_v42, 0.0  ;;  %v2398_v40 = vadd.f32 %v6412_v1, %v2397_v19 }
 0x261   :  { %v2728_v38 = vmax.f32 %v2406_v35, 0.0  ;;  %3097 = vadd.xlane.f32.xlu0 %v3096_v51  ;;  %v2862_v30 = vmul.f32 %v6424_v0, %v2727_v29 }
 0x262   :  { %v2726_v24 = vmax.f32 %v2398_v40, 0.0  ;;  %3100 = vadd.xlane.f32.xlu1 %v3099_v39  ;;  %v2860_v55 = vmul.f32 %v6424_v0, %v2725_v53 }
 0x263   :  { %v3114_v33 = vsel %vm1927_vm2, %v2862_v30, 0.0  ;;  %v2863_v11 = vmul.f32 %v6424_v0, %v2728_v38  ;;  %v6706_v30 = vld [vmem:[%s8048_s10] ss:$0 sm:$0xff] }
 0x264   :  { %v5493_v43 = vpop.f32.mrb[80].mxu1  ;;  %v2861_v59 = vmul.f32 %v6424_v0, %v2726_v24  ;;  %v3108_v10 = vsel %vm1927_vm2, %v2860_v55, 0.0 }
 0x265   :  { %v2419_v57 = vadd.f32 %v5493_v43, %v6412_v1  ;;  %3115 = vadd.xlane.f32.xlu0 %v3114_v33  ;;  %v2410_v60 = vpop.f32.mrb[81].mxu1  ;;  %v3117_v15 = vsel %vm1927_vm2, %v2863_v11, 0.0  ;;  %v6709_v33 = vpop.permute.xlu0 %3359 }
 0x266   :  { %v2411_v63 = vadd.f32 %v6412_v1, %v2410_v60  ;;  %3118 = vadd.xlane.f32.xlu1 %v3117_v15  ;;  %v5494_v58 = vpop.f32.mrb[82].mxu1  ;;  %v3111_v8 = vsel %vm1927_vm2, %v2861_v59, 0.0 }
 0x267   :  { %v2731_v13 = vmax.f32 %v2419_v57, 0.0  ;;  %v2422_v45 = vadd.f32 %v5494_v58, %v6412_v1  ;;  %v2413_v12 = vpop.f32.mrb[83].mxu1 }
 0x268   :  { %v2729_v47 = vmax.f32 %v2411_v63, 0.0  ;;  %v2414_v31 = vadd.f32 %v6412_v1, %v2413_v12 }
 0x269   :  { %v2732_v18 = vmax.f32 %v2422_v45, 0.0  ;;  %3109 = vadd.xlane.f32.xlu0 %v3108_v10  ;;  %v2866_v5 = vmul.f32 %v6424_v0, %v2731_v13  ;;  %v6721_v10 = vpop.permute.xlu0 %3367 }
 0x26a   :  { %v2730_v17 = vmax.f32 %v2414_v31, 0.0  ;;  %3112 = vadd.xlane.f32.xlu1 %v3111_v8  ;;  %v2864_v14 = vmul.f32 %v6424_v0, %v2729_v47 }
 0x26b   :  { %v3126_v25 = vsel %vm1927_vm2, %v2866_v5, 0.0  ;;  %v2867_v9 = vmul.f32 %v6424_v0, %v2732_v18 }
 0x26c   :  { %v5497_v52 = vpop.f32.mrb[84].mxu1  ;;  %v2865_v20 = vmul.f32 %v6424_v0, %v2730_v17  ;;  %v3120_v62 = vsel %vm1927_vm2, %v2864_v14, 0.0 }
 0x26d   :  { %v2435_v36 = vadd.f32 %v5497_v52, %v6412_v1  ;;  %3127 = vadd.xlane.f32.xlu0 %v3126_v25  ;;  %v2426_v34 = vpop.f32.mrb[85].mxu1  ;;  %v3129_v48 = vsel %vm1927_vm2, %v2867_v9, 0.0 }
 0x26e   :  { %v2427_v56 = vadd.f32 %v6412_v1, %v2426_v34  ;;  %3130 = vadd.xlane.f32.xlu1 %v3129_v48  ;;  %v5498_v21 = vpop.f32.mrb[86].mxu1  ;;  %v3123_v42 = vsel %vm1927_vm2, %v2865_v20, 0.0  ;;  %v6730_v48 = vpop.permute.xlu0 %3375 }
 0x26f   :  { %v2735_v50 = vmax.f32 %v2435_v36, 0.0  ;;  %v2438_v61 = vadd.f32 %v5498_v21, %v6412_v1  ;;  %v2429_v44 = vpop.f32.mrb[87].mxu1  ;;  %v6696_v1 = vpop.permute.xlu1 %3355 }
 0x270   :  { %v2733_v22 = vmax.f32 %v2427_v56, 0.0  ;;  %v2430_v26 = vadd.f32 %v6690_v23, %v2429_v44 }
 0x271   :  { %v2736_v28 = vmax.f32 %v2438_v61, 0.0  ;;  %3121 = vadd.xlane.f32.xlu0 %v3120_v62  ;;  %v2870_v27 = vmul.f32 %v6424_v0, %v2735_v50 }
 0x272   :  { %v2734_v29 = vmax.f32 %v2430_v26, 0.0  ;;  %3124 = vadd.xlane.f32.xlu1 %v3123_v42  ;;  %v2868_v40 = vmul.f32 %v6424_v0, %v2733_v22  ;;  %v6738_v50 = vpop.permute.xlu0 %3528 }
 0x273   :  { %v3138_v35 = vsel %vm1927_vm2, %v2870_v27, 0.0  ;;  %v2871_v19 = vmul.f32 %v6424_v0, %v2736_v28  ;;  %v6713_v60 = vpop.permute.xlu1 %3363 }
 0x274   :  { %v5501_v53 = vpop.f32.mrb[88].mxu1  ;;  %v2869_v24 = vmul.f32 %v6706_v30, %v2734_v29  ;;  %v3132_v63 = vsel %vm1927_vm2, %v2868_v40, 0.0 }
 0x275   :  { %v2451_v51 = vadd.f32 %v6690_v23, %v5501_v53  ;;  %3139 = vadd.xlane.f32.xlu0 %v3138_v35  ;;  %v2442_v38 = vpop.f32.mrb[89].mxu1  ;;  %v3141_v39 = vsel %vm1927_vm2, %v2871_v19, 0.0  ;;  %v6753_v35 = vrot.slane %v6738_v50, %v5694_v16 }
 0x276   :  { %v2443_v11 = vadd.f32 %v6690_v23, %v2442_v38  ;;  %3142 = vadd.xlane.f32.xlu1 %v3141_v39  ;;  %v5502_v43 = vpop.f32.mrb[90].mxu1  ;;  %v3135_v13 = vsel %vm1927_vm2, %v2869_v24, 0.0 }
 0x277   :  { %v2739_v0 = vmax.f32 %v2451_v51, 0.0  ;;  %v2454_v55 = vadd.f32 %v6690_v23, %v5502_v43  ;;  %v2445_v57 = vpop.f32.mrb[91].mxu1  ;;  %v6726_v9 = vpop.permute.xlu1 %3371 }
 0x278   :  { %v2737_v15 = vmax.f32 %v2443_v11, 0.0  ;;  %v2446_v59 = vadd.f32 %v6690_v23, %v2445_v57 }
 0x279   :  { %v2740_v58 = vmax.f32 %v2454_v55, 0.0  ;;  %3133 = vadd.xlane.f32.xlu0 %v3132_v63  ;;  %v2874_v45 = vmul.f32 %v6706_v30, %v2739_v0 }
 0x27a   :  { %v2738_v12 = vmax.f32 %v2446_v59, 0.0  ;;  %3136 = vadd.xlane.f32.xlu1 %v3135_v13  ;;  %v2872_v8 = vmul.f32 %v6706_v30, %v2737_v15  ;;  %v2930_v26 = vpop.xlane.xlu0 %2929 }
 0x27b   :  { %v3150_v47 = vsel %vm1927_vm2, %v2874_v45, 0.0  ;;  %v2875_v31 = vmul.f32 %v6706_v30, %v2740_v58  ;;  %v6732_v20 = vpop.permute.xlu1 %3379  ;;  %v3397_v28 = vadd.f32 %v6647_v37, %v2930_v26 }
 0x27c   :  { %v5505_v18 = vpop.f32.mrb[92].mxu1  ;;  %v2873_v25 = vmul.f32 %v6706_v30, %v2738_v12  ;;  %v3144_v36 = vsel %vm1927_vm2, %v2872_v8, 0.0 }
 0x27d   :  { %3151 = vadd.xlane.f32.xlu0 %v3150_v47  ;;  %v2458_v5 = vpop.f32.mrb[93].mxu1  ;;  %v3153_v17 = vsel %vm1927_vm2, %v2875_v31, 0.0  ;;  %v3570_v40 = vadd.f32 %v6753_v35, %v3397_v28  ;;  %v2467_v31 = vadd.f32 %v6690_v23, %v5505_v18 }
 0x27e   :  { %3154 = vadd.xlane.f32.xlu1 %v3153_v17  ;;  %v5506_v52 = vpop.f32.mrb[94].mxu1  ;;  %v3147_v34 = vsel %vm1927_vm2, %v2873_v25, 0.0  ;;  %v2933_v38 = vpop.xlane.xlu0 %2932  ;;  %v2459_v25 = vadd.f32 %v6690_v23, %v2458_v5 }
 0x27f   :  { %v2461_v14 = vpop.f32.mrb[95].mxu1  ;;  %v2936_v22 = vpop.xlane.xlu1 %2935  ;;  %v3398_v43 = vadd.f32 %v6627_v3, %v2933_v38  ;;  %v2743_v17 = vmax.f32 %v2467_v31, 0.0 }
 0x280   :  { %v3399_v53 = vadd.f32 %v6639_v32, %v2936_v22  ;;  %v2741_v26 = vmax.f32 %v2459_v25, 0.0  ;;  %v2462_v38 = vadd.f32 %v6690_v23, %v2461_v14 }
 0x281   :  { %3145 = vadd.xlane.f32.xlu0 %v3144_v36  ;;  %v3571_v57 = vadd.f32 %v6753_v35, %v3398_v43  ;;  %v2878_v28 = vmul.f32 %v6706_v30, %v2743_v17 }
 0x282   :  { %3148 = vadd.xlane.f32.xlu1 %v3147_v34  ;;  %v3572_v24 = vadd.f32 %v6753_v35, %v3399_v53 }
 0x283   :  { %v2939_v27 = vpop.xlane.xlu1 %2938  ;;  %v3162_v18 = vsel %vm1927_vm2, %v2878_v28, 0.0 }
 0x284   :  { %v6734_v56 = vpop.f32.mrb[96].mxu1  ;;  %v3400_v51 = vadd.f32 %v6651_v2, %v2939_v27  ;;  %v2470_v27 = vadd.f32 %v6690_v23, %v5506_v52 }
 0x285   :  { %v6736_v21 = vpop.f32.mrb[97].mxu1 }
 0x286   :  { %v6740_v61 = vpop.f32.mrb[98].mxu1  ;;  %v3573_v11 = vadd.f32 %v6753_v35, %v3400_v51  ;;  %v2876_v51 = vmul.f32 %v6706_v30, %v2741_v26  ;;  %v2744_v5 = vmax.f32 %v2470_v27, 0.0 }
 0x287   :  { %v6742_v44 = vpop.f32.mrb[99].mxu1 }
 0x288   :  { %v3156_v43 = vsel %vm1927_vm2, %v2876_v51, 0.0  ;;  %v2879_v52 = vmul.f32 %v6706_v30, %v2744_v5  ;;  %v2948_v51 = vpop.xlane.xlu0 %2947 }
 0x289   :  { %v3403_v4 = vadd.f32 %v6673_v6, %v2948_v51 }
 0x28a   :  { %v3165_v14 = vsel %vm1927_vm2, %v2879_v52, 0.0 }
 0x28c   :  { %v6744_v62 = vpop.f32.mrb[100].mxu1 }
 0x28d   :  { %v6747_v42 = vpop.f32.mrb[101].mxu1 }
 0x28e   :  { %v6749_v29 = vpop.f32.mrb[102].mxu1 }
 0x28f   :  { %v6755_v19 = vpop.f32.mrb[103].mxu1 }
 0x293   :  { %3835 = vperm.xlu1 %5560, %v3570_v40  }
 0x294   :  { %v6760_v39 = vpop.f32.mrb[104].mxu1 }
 0x295   :  { %v6765_v16 = vpop.f32.mrb[105].mxu1 }
 0x296   :  { %v6767_v0 = vpop.f32.mrb[106].mxu1 }
 0x297   :  { %3844 = vperm.xlu1 %5560, %v3573_v11   ;;  %3841 = vperm.xlu0 %5559, %v3572_v24   ;;  %v6769_v55 = vpop.f32.mrb[107].mxu1 }
 0x29b   :  { %3838 = vperm.xlu1 %5560, %v3571_v57   ;;  %v2742_v57 = vmax.f32 %v2462_v38, 0.0 }
 0x29c   :  { %v6772_v15 = vpop.f32.mrb[108].mxu1 }
 0x29d   :  { %v6774_v59 = vpop.f32.mrb[109].mxu1  ;;  %v2877_v25 = vmul.f32 %v6706_v30, %v2742_v57  ;;  %v2951_v57 = vpop.xlane.xlu1 %2950 }
 0x29e   :  { %v6776_v63 = vpop.f32.mrb[110].mxu1 }
 0x29f   :  { %v6778_v58 = vpop.f32.mrb[111].mxu1  ;;  %v3159_v27 = vsel %vm1927_vm2, %v2877_v25, 0.0  ;;  %v3576_v25 = vadd.f32 %v6753_v35, %v3403_v4 }
 0x2a4   :  { %v6780_v13 = vpop.f32.mrb[112].mxu1 }
 0x2a5   :  { %v6782_v45 = vpop.f32.mrb[113].mxu1 }
 0x2a6   :  { %v6784_v12 = vpop.f32.mrb[114].mxu1 }
 0x2a7   :  { %v6786_v47 = vpop.f32.mrb[115].mxu1 }
 0x2ac   :  { %v6789_v8 = vpop.f32.mrb[116].mxu1 }
 0x2ad   :  { %v6792_v36 = vpop.f32.mrb[117].mxu1 }
 0x2ae   :  { %v6794_v34 = vpop.f32.mrb[118].mxu1 }
 0x2af   :  { %v6796_v22 = vpop.f32.mrb[119].mxu1 }
 0x2b4   :  { %v6800_v53 = vpop.f32.mrb[120].mxu1 }
 0x2b5   :  { %v6802_v40 = vpop.f32.mrb[121].mxu1 }
 0x2b6   :  { %3163 = vadd.xlane.f32.xlu0 %v3162_v18  ;;  %v6807_v24 = vpop.f32.mrb[122].mxu1 }
 0x2b7   :  { %v6809_v11 = vpop.f32.mrb[123].mxu1 }
 0x2ba   :  { %3157 = vadd.xlane.f32.xlu0 %v3156_v43 }
 0x2bc   :  { %v6813_v31 = vpop.f32.mrb[124].mxu1 }
 0x2bd   :  { %v6815_v17 = vpop.f32.mrb[125].mxu1 }
 0x2be   :  { %v6818_v26 = vpop.f32.mrb[126].mxu1 }
 0x2bf   :  { %8063 = vst [vmem:[#allocation2_spill] sm:$0xff] %v6818_v26  ;;  %3166 = vadd.xlane.f32.xlu1 %v3165_v14  ;;  %v6821_v28 = vpop.f32.mrb[127].mxu1  ;;  %v2942_v26 = vpop.xlane.xlu0 %2941 }
 0x2c0   :  { %8064 = vst [vmem:[#allocation3_spill] sm:$0xff] %v6821_v28 }
 0x2c3   :  { %3160 = vadd.xlane.f32.xlu1 %v3159_v27  ;;  %v3404_v27 = vadd.f32 %v6677_v49, %v2951_v57 }
 0x2c4   :  { %v6824_v18 = vpop.f32.mrb[128].mxu1 }
 0x2c5   :  { %8065 = vst [vmem:[#allocation4_spill] sm:$0xff] %v6824_v18  ;;  %v6826_v5 = vpop.f32.mrb[129].mxu1  ;;  %v3401_v18 = vadd.f32 %v6659_v54, %v2942_v26 }
 0x2c6   :  { %8066 = vst [vmem:[#allocation5_spill] sm:$0xff] %v6826_v5  ;;  %v6828_v38 = vpop.f32.mrb[130].mxu1  ;;  %v2945_v5 = vpop.xlane.xlu1 %2944 }
 0x2c7   :  { %8067 = vst [vmem:[#allocation6_spill] sm:$0xff] %v6828_v38  ;;  %v6830_v43 = vpop.f32.mrb[131].mxu1  ;;  %v3574_v51 = vadd.f32 %v6753_v35, %v3401_v18 }
 0x2c8   :  { %8068 = vst [vmem:[#allocation7_spill] sm:$0xff] %v6830_v43  ;;  %v3577_v43 = vadd.f32 %v6753_v35, %v3404_v27 }
 0x2cc   :  { %v6833_v52 = vpop.f32.mrb[132].mxu1 }
 0x2cd   :  { %8069 = vst [vmem:[#allocation8_spill] sm:$0xff] %v6833_v52  ;;  %v6835_v14 = vpop.f32.mrb[133].mxu1  ;;  %v3402_v52 = vadd.f32 %v6665_v41, %v2945_v5 }
 0x2ce   :  { %8070 = vst [vmem:[#allocation9_spill] sm:$0xff] %v6835_v14  ;;  %v6840_v28 = vpop.f32.mrb[134].mxu1 }
 0x2cf   :  { %8071 = vst [vmem:[#allocation10_spill] sm:$0xff] %v6840_v28  ;;  %v6842_v38 = vpop.f32.mrb[135].mxu1  ;;  %v3575_v26 = vadd.f32 %v6753_v35, %v3402_v52  ;;  %v2475_v52 = vadd.f32 %v6690_v23, %v6736_v21 }
 0x2d0   :  { %3853 = vperm.xlu0 %5559, %v3576_v25  }
 0x2d4   :  { %3856 = vperm.xlu1 %5560, %v3577_v43   ;;  %3847 = vperm.xlu0 %5559, %v3574_v51   ;;  %v6847_v14 = vpop.f32.mrb[136].mxu1  ;;  %v2483_v43 = vadd.f32 %v6690_v23, %v6734_v56 }
 0x2d5   :  { %v6849_v4 = vpop.f32.mrb[137].mxu1 }
 0x2d6   :  { %8072 = vst [vmem:[#allocation11_spill] sm:$0xff] %v6849_v4  ;;  %v6852_v57 = vpop.f32.mrb[138].mxu1  ;;  %v2747_v51 = vmax.f32 %v2483_v43, 0.0  ;;  %v2745_v4 = vmax.f32 %v2475_v52, 0.0 }
 0x2d7   :  { %8073 = vst [vmem:[#allocation12_spill] sm:$0xff] %v6852_v57  ;;  %v6854_v28 = vpop.f32.mrb[139].mxu1 }
 0x2d8   :  { %3850 = vperm.xlu1 %5560, %v3575_v26   ;;  %v2882_v57 = vmul.f32 %v6706_v30, %v2747_v51  ;;  %v2486_v26 = vadd.f32 %v6690_v23, %v6740_v61 }
 0x2dc   :  { %v6856_v25 = vpop.f32.mrb[140].mxu1 }
 0x2dd   :  { %8074 = vst [vmem:[#allocation13_spill] sm:$0xff] %v6856_v25  ;;  %v6858_v27 = vpop.f32.mrb[141].mxu1  ;;  %v2880_v25 = vmul.f32 %v6706_v30, %v2745_v4  ;;  %v2960_v4 = vpop.xlane.xlu0 %2959 }
 0x2de   :  { %8075 = vst [vmem:[#allocation14_spill] sm:$0xff] %v6858_v27  ;;  %v6860_v18 = vpop.f32.mrb[142].mxu1  ;;  %v3174_v27 = vsel %vm1927_vm2, %v2882_v57, 0.0  ;;  %v2963_v57 = vpop.xlane.xlu1 %2962 }
 0x2df   :  { %8076 = vst [vmem:[#allocation15_spill] sm:$0xff] %v6860_v18  ;;  %v6862_v5 = vpop.f32.mrb[143].mxu1  ;;  %v2748_v18 = vmax.f32 %v2486_v26, 0.0  ;;  %v3168_v56 = vsel %vm1927_vm2, %v2880_v25, 0.0  ;;  %v3407_v26 = vadd.f32 %v6709_v33, %v2960_v4  ;;  %v3408_v25 = vadd.f32 %v6713_v60, %v2963_v57 }
 0x2e0   :  { %8077 = vst [vmem:[#allocation16_spill] sm:$0xff] %v6862_v5  ;;  %v2478_v5 = vadd.f32 %v6690_v23, %v6742_v44  ;;  %v2491_v4 = vadd.f32 %v6690_v23, %v6747_v42 }
 0x2e1   :  { %v2883_v43 = vmul.f32 %v6706_v30, %v2748_v18  ;;  %v2954_v44 = vpop.xlane.xlu0 %2953 }
 0x2e2   :  { %v2746_v21 = vmax.f32 %v2478_v5, 0.0  ;;  %v3405_v18 = vadd.f32 %v6685_v46, %v2954_v44  ;;  %v2957_v5 = vpop.xlane.xlu1 %2956  ;;  %v2502_v44 = vadd.f32 %v6690_v23, %v6749_v29 }
 0x2e3   :  { %v3177_v52 = vsel %vm1927_vm2, %v2883_v43, 0.0 }
 0x2e4   :  { %v2881_v51 = vmul.f32 %v6706_v30, %v2746_v21  ;;  %v3578_v43 = vadd.f32 %v6753_v35, %v3405_v18  ;;  %v3406_v21 = vadd.f32 %v6696_v1, %v2957_v5  ;;  %v2752_v18 = vmax.f32 %v2502_v44, 0.0 }
 0x2e5   :  { %v2494_v5 = vadd.f32 %v6690_v23, %v6755_v19 }
 0x2e6   :  { %v3171_v61 = vsel %vm1927_vm2, %v2881_v51, 0.0  ;;  %v3579_v51 = vadd.f32 %v6753_v35, %v3406_v21 }
 0x2e7   :  { %v2750_v42 = vmax.f32 %v2494_v5, 0.0 }
 0x2f3   :  { %3175 = vadd.xlane.f32.xlu0 %v3174_v27  ;;  %v3580_v27 = vadd.f32 %v6753_v35, %v3407_v26  ;;  %v2749_v26 = vmax.f32 %v2491_v4, 0.0 }
 0x2f7   :  { %3169 = vadd.xlane.f32.xlu0 %v3168_v56  ;;  %v3581_v56 = vadd.f32 %v6753_v35, %v3408_v25 }
 0x2fc   :  { %3178 = vadd.xlane.f32.xlu1 %v3177_v52  ;;  %v2499_v52 = vadd.f32 %v6690_v23, %v6744_v62 }
 0x300   :  { %3172 = vadd.xlane.f32.xlu1 %v3171_v61  ;;  %v2751_v61 = vmax.f32 %v2499_v52, 0.0  ;;  %v2975_v52 = vpop.xlane.xlu1 %2974 }
 0x302   :  { %v2886_v57 = vmul.f32 %v6706_v30, %v2751_v61 }
 0x304   :  { %v3186_v25 = vsel %vm1927_vm2, %v2886_v57, 0.0  ;;  %v3412_v57 = vadd.f32 %v6732_v20, %v2975_v52  ;;  %v2969_v44 = vpop.xlane.xlu1 %2968 }
 0x30d   :  { %3865 = vperm.xlu0 %5559, %v3580_v27   ;;  %v2884_v27 = vmul.f32 %v6706_v30, %v2749_v26 }
 0x30f   :  { %v3180_v62 = vsel %vm1927_vm2, %v2884_v27, 0.0  ;;  %v3585_v27 = vadd.f32 %v6753_v35, %v3412_v57 }
 0x311   :  { %3868 = vperm.xlu1 %5560, %v3581_v56   ;;  %3859 = vperm.xlu0 %5559, %v3578_v43   ;;  %v2887_v56 = vmul.f32 %v6706_v30, %v2752_v18  ;;  %v2885_v43 = vmul.f32 %v6706_v30, %v2750_v42  ;;  %v3410_v18 = vadd.f32 %v6726_v9, %v2969_v44  ;;  %v3536_v44 = vsub.s32 1, %v5666_v7 }
 0x312   :  { %v2507_v42 = vadd.f32 %v6690_v23, %v6765_v16 }
 0x313   :  { %v3189_v21 = vsel %vm1927_vm2, %v2887_v56, 0.0  ;;  %v3183_v29 = vsel %vm1927_vm2, %v2885_v43, 0.0  ;;  %v3583_v5 = vadd.f32 %v6753_v35, %v3410_v18  ;;  %v6931_v18 = vrot.slane %v6738_v50, %v3536_v44 }
 0x315   :  { %3862 = vperm.xlu1 %5560, %v3579_v51   ;;  %v2972_v51 = vpop.xlane.xlu0 %2971 }
 0x316   :  { %v3411_v61 = vadd.f32 %v6730_v48, %v2972_v51 }
 0x318   :  { %v3584_v4 = vadd.f32 %v6753_v35, %v3411_v61 }
 0x319   :  { %v2966_v19 = vpop.xlane.xlu0 %2965 }
 0x31a   :  { %v3409_v26 = vadd.f32 %v6721_v10, %v2966_v19 }
 0x330   :  { %3187 = vadd.xlane.f32.xlu0 %v3186_v25  ;;  %v3582_v25 = vadd.f32 %v6753_v35, %v3409_v26  ;;  %v2510_v35 = vadd.f32 %v6690_v23, %v6769_v55  ;;  %v2984_v26 = vpop.xlane.xlu0 %2983 }
 0x331   :  { %v3415_v55 = vadd.f32 %v6639_v32, %v2984_v26  ;;  %v2526_v26 = vadd.f32 %v6690_v23, %v6778_v58 }
 0x332   :  { %v2754_v16 = vmax.f32 %v2510_v35, 0.0  ;;  %v2523_v35 = vadd.f32 %v6690_v23, %v6774_v59 }
 0x333   :  { %v2758_v59 = vmax.f32 %v2526_v26, 0.0 }
 0x334   :  { %3181 = vadd.xlane.f32.xlu0 %v3180_v62  ;;  %v2515_v62 = vadd.f32 %v6690_v23, %v6760_v39 }
 0x336   :  { %v2755_v56 = vmax.f32 %v2515_v62, 0.0 }
 0x338   :  { %v2890_v43 = vmul.f32 %v6706_v30, %v2755_v56 }
 0x339   :  { %3190 = vadd.xlane.f32.xlu1 %v3189_v21  ;;  %v2753_v21 = vmax.f32 %v2507_v42, 0.0 }
 0x33a   :  { %v3198_v52 = vsel %vm1927_vm2, %v2890_v43, 0.0 }
 0x33b   :  { %v2888_v51 = vmul.f32 %v6706_v30, %v2753_v21 }
 0x33d   :  { %3184 = vadd.xlane.f32.xlu1 %v3183_v29  ;;  %v2518_v29 = vadd.f32 %v6690_v23, %v6767_v0  ;;  %v3192_v39 = vsel %vm1927_vm2, %v2888_v51, 0.0 }
 0x33f   :  { %v2756_v61 = vmax.f32 %v2518_v29, 0.0 }
 0x341   :  { %v2891_v19 = vmul.f32 %v6706_v30, %v2756_v61 }
 0x343   :  { %v3201_v57 = vsel %vm1927_vm2, %v2891_v19, 0.0  ;;  %v2757_v19 = vmax.f32 %v2523_v35, 0.0  ;;  %v2547_v35 = vadd.f32 %v6690_v23, %v6780_v13 }
 0x34a   :  { %3877 = vperm.xlu0 %5559, %v3584_v4   ;;  %v2889_v4 = vmul.f32 %v6706_v30, %v2754_v16  ;;  %v2534_v16 = vadd.f32 %v6690_v23, %v6776_v63 }
 0x34c   :  { %v3195_v0 = vsel %vm1927_vm2, %v2889_v4, 0.0  ;;  %v2892_v4 = vmul.f32 %v6706_v30, %v2757_v19  ;;  %v2539_v19 = vadd.f32 %v6690_v23, %v6782_v45 }
 0x34e   :  { %3880 = vperm.xlu1 %5560, %v3585_v27   ;;  %3871 = vperm.xlu0 %5559, %v3582_v25   ;;  %v2987_v27 = vpop.xlane.xlu1 %2986  ;;  %v2978_v25 = vpop.xlane.xlu0 %2977 }
 0x34f   :  { %v3416_v62 = vadd.f32 %v6651_v2, %v2987_v27  ;;  %v3413_v56 = vadd.f32 %v6647_v37, %v2978_v25  ;;  %v2893_v27 = vmul.f32 %v6706_v30, %v2758_v59 }
 0x351   :  { %v3589_v43 = vadd.f32 %v6931_v18, %v3416_v62  ;;  %v3586_v21 = vadd.f32 %v6931_v18, %v3413_v56  ;;  %v3207_v63 = vsel %vm1927_vm2, %v2893_v27, 0.0 }
 0x352   :  { %3874 = vperm.xlu1 %5560, %v3583_v5   ;;  %v3588_v5 = vadd.f32 %v6931_v18, %v3415_v55  ;;  %v2981_v42 = vpop.xlane.xlu1 %2980  ;;  %v2996_v25 = vpop.xlane.xlu0 %2995 }
 0x353   :  { %v3414_v29 = vadd.f32 %v6627_v3, %v2981_v42  ;;  %v3419_v62 = vadd.f32 %v6673_v6, %v2996_v25 }
 0x355   :  { %v3587_v51 = vadd.f32 %v6931_v18, %v3414_v29  ;;  %v3592_v56 = vadd.f32 %v6931_v18, %v3419_v62 }
 0x356   :  { %v2990_v58 = vpop.xlane.xlu0 %2989 }
 0x36d   :  { %3199 = vadd.xlane.f32.xlu0 %v3198_v52  ;;  %v2531_v52 = vadd.f32 %v6690_v23, %v6772_v15  ;;  %v3204_v15 = vsel %vm1927_vm2, %v2892_v4, 0.0  ;;  %v2761_v4 = vmax.f32 %v2539_v19, 0.0 }
 0x36f   :  { %v2759_v61 = vmax.f32 %v2531_v52, 0.0 }
 0x371   :  { %3193 = vadd.xlane.f32.xlu0 %v3192_v39  ;;  %v2894_v39 = vmul.f32 %v6706_v30, %v2759_v61 }
 0x376   :  { %3202 = vadd.xlane.f32.xlu1 %v3201_v57  ;;  %v3210_v57 = vsel %vm1927_vm2, %v2894_v39, 0.0  ;;  %v2763_v39 = vmax.f32 %v2547_v35, 0.0  ;;  %v2563_v35 = vadd.f32 %v6690_v23, %v6789_v8 }
 0x378   :  { %v2767_v19 = vmax.f32 %v2563_v35, 0.0 }
 0x37a   :  { %3196 = vadd.xlane.f32.xlu1 %v3195_v0  ;;  %v2760_v0 = vmax.f32 %v2534_v16, 0.0  ;;  %v2898_v16 = vmul.f32 %v6706_v30, %v2763_v39 }
 0x37c   :  { %v2895_v44 = vmul.f32 %v6706_v30, %v2760_v0  ;;  %v2896_v0 = vmul.f32 %v6706_v30, %v2761_v4  ;;  %v3222_v26 = vsel %vm1927_vm2, %v2898_v16, 0.0  ;;  %v2555_v16 = vadd.f32 %v6690_v23, %v6792_v36 }
 0x37e   :  { %v3213_v55 = vsel %vm1927_vm2, %v2895_v44, 0.0  ;;  %v2542_v44 = vadd.f32 %v6690_v23, %v6786_v47  ;;  %v3216_v13 = vsel %vm1927_vm2, %v2896_v0, 0.0  ;;  %v2765_v0 = vmax.f32 %v2555_v16, 0.0 }
 0x380   :  { %v2762_v45 = vmax.f32 %v2542_v44, 0.0  ;;  %v2900_v44 = vmul.f32 %v6706_v30, %v2765_v0 }
 0x382   :  { %v3228_v36 = vsel %vm1927_vm2, %v2900_v44, 0.0 }
 0x387   :  { %3889 = vperm.xlu0 %5559, %v3588_v5   ;;  %v2999_v5 = vpop.xlane.xlu1 %2998 }
 0x388   :  { %v3420_v42 = vadd.f32 %v6677_v49, %v2999_v5  ;;  %v3008_v5 = vpop.xlane.xlu0 %3007 }
 0x389   :  { %v3423_v47 = vadd.f32 %v6709_v33, %v3008_v5 }
 0x38a   :  { %v3593_v29 = vadd.f32 %v6931_v18, %v3420_v42 }
 0x38b   :  { %3892 = vperm.xlu1 %5560, %v3589_v43   ;;  %3883 = vperm.xlu0 %5559, %v3586_v21   ;;  %v3417_v43 = vadd.f32 %v6659_v54, %v2990_v58  ;;  %v2993_v21 = vpop.xlane.xlu1 %2992  ;;  %v3596_v58 = vadd.f32 %v6931_v18, %v3423_v47 }
 0x38c   :  { %v3418_v52 = vadd.f32 %v6665_v41, %v2993_v21  ;;  %v3002_v62 = vpop.xlane.xlu0 %3001 }
 0x38d   :  { %v3421_v42 = vadd.f32 %v6685_v46, %v3002_v62 }
 0x38e   :  { %v3591_v61 = vadd.f32 %v6931_v18, %v3418_v52 }
 0x38f   :  { %3886 = vperm.xlu1 %5560, %v3587_v51   ;;  %v3590_v51 = vadd.f32 %v6931_v18, %v3417_v43  ;;  %v3011_v27 = vpop.xlane.xlu1 %3010  ;;  %v3594_v21 = vadd.f32 %v6931_v18, %v3421_v42 }
 0x393   :  { %v3005_v25 = vpop.xlane.xlu1 %3004 }
 0x3aa   :  { %3211 = vadd.xlane.f32.xlu0 %v3210_v57  ;;  %v2550_v57 = vadd.f32 %v6690_v23, %v6784_v12 }
 0x3ae   :  { %3205 = vadd.xlane.f32.xlu0 %v3204_v15  ;;  %v2764_v15 = vmax.f32 %v2550_v57, 0.0  ;;  %v2902_v57 = vmul.f32 %v6706_v30, %v2767_v19 }
 0x3b0   :  { %v2899_v59 = vmul.f32 %v6706_v30, %v2764_v15  ;;  %v3020_v15 = vpop.xlane.xlu0 %3019  ;;  %v3234_v8 = vsel %vm1927_vm2, %v2902_v57, 0.0 }
 0x3b2   :  { %v3225_v12 = vsel %vm1927_vm2, %v2899_v59, 0.0 }
 0x3b3   :  { %3214 = vadd.xlane.f32.xlu1 %v3213_v55  ;;  %v2897_v55 = vmul.f32 %v6706_v30, %v2762_v45  ;;  %v2558_v45 = vadd.f32 %v6690_v23, %v6796_v22 }
 0x3b7   :  { %3208 = vadd.xlane.f32.xlu1 %v3207_v63  ;;  %v3219_v63 = vsel %vm1927_vm2, %v2897_v55, 0.0  ;;  %v2766_v55 = vmax.f32 %v2558_v45, 0.0 }
 0x3c4   :  { %3901 = vperm.xlu0 %5559, %v3592_v56   ;;  %v3424_v56 = vadd.f32 %v6713_v60, %v3011_v27 }
 0x3c6   :  { %v3597_v43 = vadd.f32 %v6931_v18, %v3424_v56  ;;  %v3427_v56 = vadd.f32 %v6730_v48, %v3020_v15 }
 0x3c8   :  { %3904 = vperm.xlu1 %5560, %v3593_v29   ;;  %3895 = vperm.xlu0 %5559, %v3590_v51   ;;  %v3422_v29 = vadd.f32 %v6696_v1, %v3005_v25  ;;  %v3023_v51 = vpop.xlane.xlu1 %3022 }
 0x3ca   :  { %v3595_v52 = vadd.f32 %v6931_v18, %v3422_v29 }
 0x3cc   :  { %3898 = vperm.xlu1 %5560, %v3591_v61   ;;  %v3017_v61 = vpop.xlane.xlu1 %3016 }
 0x3cd   :  { %v3426_v16 = vadd.f32 %v6726_v9, %v3017_v61  ;;  %v2579_v61 = vadd.f32 %v6690_v23, %v6800_v53 }
 0x3d0   :  { %v6990_v39 = vpop.xlane.xlu1 %3034 }
 0x3d4   :  { %v6994_v4 = vpop.xlane.xlu1 %3028 }
 0x3e7   :  { %3223 = vadd.xlane.f32.xlu0 %v3222_v26  ;;  %v2566_v26 = vadd.f32 %v6690_v23, %v6794_v34 }
 0x3e9   :  { %v2768_v59 = vmax.f32 %v2566_v26, 0.0  ;;  %v3599_v26 = vadd.f32 %v6931_v18, %v3426_v16 }
 0x3eb   :  { %3217 = vadd.xlane.f32.xlu0 %v3216_v13  ;;  %v7000_v13 = vpop.xlane.xlu1 %3046  ;;  %v2903_v27 = vmul.f32 %v6706_v30, %v2768_v59 }
 0x3ed   :  { %v3237_v25 = vsel %vm1927_vm2, %v2903_v27, 0.0 }
 0x3ef   :  { %v7007_v34 = vpop.xlane.xlu1 %3040 }
 0x3f0   :  { %3226 = vadd.xlane.f32.xlu1 %v3225_v12  ;;  %v3014_v12 = vpop.xlane.xlu0 %3013 }
 0x3f1   :  { %v3425_v29 = vadd.f32 %v6721_v10, %v3014_v12 }
 0x3f3   :  { %v7011_v5 = vpop.xlane.xlu1 %3058  ;;  %v3598_v19 = vadd.f32 %v6931_v18, %v3425_v29 }
 0x3f4   :  { %3220 = vadd.xlane.f32.xlu1 %v3219_v63  ;;  %v2901_v63 = vmul.f32 %v6706_v30, %v2766_v55  ;;  %v3032_v47 = vpop.xlane.xlu0 %3031 }
 0x3f6   :  { %v3231_v22 = vsel %vm1927_vm2, %v2901_v63, 0.0 }
 0x3f7   :  { %v7014_v62 = vpop.xlane.xlu1 %3052 }
 0x3fb   :  { %v7017_v42 = vpop.xlane.xlu1 %3070 }
 0x3ff   :  { %v7027_v57 = vpop.xlane.xlu1 %3064 }
 0x401   :  { %3913 = vperm.xlu0 %5559, %v3596_v58   ;;  %v3026_v58 = vpop.xlane.xlu0 %3025 }
 0x405   :  { %3916 = vperm.xlu1 %5560, %v3597_v43   ;;  %3907 = vperm.xlu0 %5559, %v3594_v21   ;;  %v3600_v43 = vadd.f32 %v6931_v18, %v3427_v56  ;;  %v3428_v21 = vadd.f32 %v6732_v20, %v3023_v51  ;;  %v7032_v51 = vpop.xlane.xlu1 %3082 }
 0x407   :  { %v3601_v35 = vadd.f32 %v6931_v18, %v3428_v21  ;;  %v2571_v18 = vadd.f32 %v6690_v23, %v6802_v40  ;;  %v2574_v40 = vadd.f32 %v6690_v23, %v6809_v11 }
 0x409   :  { %3910 = vperm.xlu1 %5560, %v3595_v52   ;;  %v7022_v52 = vpop.xlane.xlu0 %3043  ;;  %v7036_v44 = vpop.xlane.xlu1 %3076  ;;  %v2769_v63 = vmax.f32 %v2571_v18, 0.0 }
 0x40b   :  { %v2904_v53 = vmul.f32 %v6706_v30, %v2769_v63 }
 0x40d   :  { %v7029_v0 = vpop.xlane.xlu0 %3037  ;;  %v7040_v59 = vpop.xlane.xlu1 %3094  ;;  %v3240_v29 = vsel %vm1927_vm2, %v2904_v53, 0.0  ;;  %v3431_v53 = vadd.f32 %v6639_v32, %v3032_v47  ;;  %v3430_v47 = vadd.f32 %v6627_v3, %v6994_v4 }
 0x411   :  { %v7034_v15 = vpop.xlane.xlu0 %3055  ;;  %v7048_v27 = vpop.xlane.xlu1 %3088 }
 0x424   :  { %3235 = vadd.xlane.f32.xlu0 %v3234_v8  ;;  %v7038_v8 = vpop.xlane.xlu0 %3049 }
 0x428   :  { %3229 = vadd.xlane.f32.xlu0 %v3228_v36  ;;  %v7044_v45 = vpop.xlane.xlu0 %3067  ;;  %v2771_v36 = vmax.f32 %v2579_v61, 0.0 }
 0x42a   :  { %v2906_v12 = vmul.f32 %v6706_v30, %v2771_v36 }
 0x42c   :  { %v7050_v55 = vpop.xlane.xlu0 %3061 }
 0x42d   :  { %3238 = vadd.xlane.f32.xlu1 %v3237_v25  ;;  %v2582_v25 = vadd.f32 %v6690_v23, %v6807_v24 }
 0x42f   :  { %v2772_v21 = vmax.f32 %v2582_v25, 0.0  ;;  %v3540_v25 = vsub.s32 2, %v5666_v7 }
 0x430   :  { %v7058_v56 = vpop.xlane.xlu0 %3079 }
 0x431   :  { %3232 = vadd.xlane.f32.xlu1 %v3231_v22  ;;  %v7055_v22 = vpop.xlane.xlu1 %3106 }
 0x434   :  { %v7067_v24 = vpop.xlane.xlu0 %3073 }
 0x435   :  { %v7065_v16 = vpop.xlane.xlu1 %3100 }
 0x438   :  { %v7073_v18 = vpop.xlane.xlu0 %3091 }
 0x439   :  { %v7071_v36 = vpop.xlane.xlu1 %3118 }
 0x43a   :  { %8078 = vst [vmem:[#allocation17_spill] sm:$0xff] %v7071_v36 }
 0x43c   :  { %v7078_v63 = vpop.xlane.xlu0 %3085 }
 0x43e   :  { %3925 = vperm.xlu0 %5559, %v3600_v43   ;;  %v3246_v43 = vsel %vm1927_vm2, %v2906_v12, 0.0  ;;  %v7076_v12 = vpop.xlane.xlu1 %3112 }
 0x43f   :  { %8079 = vst [vmem:[#allocation18_spill] sm:$0xff] %v7076_v12 }
 0x442   :  { %3928 = vperm.xlu1 %5560, %v3601_v35   ;;  %3919 = vperm.xlu0 %5559, %v3598_v19   ;;  %v2907_v35 = vmul.f32 %v6706_v30, %v2772_v21  ;;  %v2770_v19 = vmax.f32 %v2574_v40, 0.0  ;;  %v7085_v21 = vpop.xlane.xlu1 %3130  ;;  %v7087_v40 = vpop.xlane.xlu0 %3103 }
 0x443   :  { %8080 = vst [vmem:[#allocation19_spill] sm:$0xff] %v7085_v21 }
 0x444   :  { %v3249_v61 = vsel %vm1927_vm2, %v2907_v35, 0.0  ;;  %v3432_v35 = vadd.f32 %v6651_v2, %v6990_v39 }
 0x446   :  { %3922 = vperm.xlu1 %5560, %v3599_v26   ;;  %v2905_v26 = vmul.f32 %v6706_v30, %v2770_v19  ;;  %v3429_v19 = vadd.f32 %v6647_v37, %v3026_v58 }
 0x448   :  { %v3243_v11 = vsel %vm1927_vm2, %v2905_v26, 0.0 }
 0x461   :  { %3247 = vadd.xlane.f32.xlu0 %v3246_v43  ;;  %v7083_v43 = vrot.slane %v6738_v50, %v3540_v25  ;;  %v7099_v25 = vpop.xlane.xlu0 %3097 }
 0x463   :  { %v3605_v26 = vadd.f32 %v7083_v43, %v3432_v35 }
 0x465   :  { %3241 = vadd.xlane.f32.xlu0 %v3240_v29  ;;  %v3604_v29 = vadd.f32 %v7083_v43, %v3431_v53  ;;  %v3603_v53 = vadd.f32 %v7083_v43, %v3430_v47  ;;  %v7104_v39 = vpop.xlane.xlu0 %3115 }
 0x46a   :  { %3250 = vadd.xlane.f32.xlu1 %v3249_v61  ;;  %v3602_v61 = vadd.f32 %v7083_v43, %v3429_v19  ;;  %v2595_v19 = vadd.f32 %v6690_v23, %v6813_v31 }
 0x46e   :  { %3244 = vadd.xlane.f32.xlu1 %v3243_v11  ;;  %v7097_v11 = vpop.xlane.xlu1 %3124 }
 0x46f   :  { %8081 = vst [vmem:[#allocation20_spill] sm:$0xff] %v7097_v11  ;;  %v8089_v11 = vld [vmem:[#allocation2_spill] sm:$0xff] }
 0x470   :  { %v2598_v12 = vadd.f32 %v6690_v23, %v8089_v11 }
 0x472   :  { %v7102_v21 = vpop.xlane.xlu1 %3142 }
 0x473   :  { %8082 = vst [vmem:[#allocation21_spill] sm:$0xff] %v7102_v21 }
 0x476   :  { %v7106_v58 = vpop.xlane.xlu1 %3136 }
 0x477   :  { %8083 = vst [vmem:[#allocation22_spill] sm:$0xff] %v7106_v58 }
 0x47a   :  { %v7110_v35 = vpop.xlane.xlu1 %3154 }
 0x47b   :  { %3937 = vperm.xlu0 %5559, %v3604_v29   ;;  %v7108_v29 = vpop.xlane.xlu0 %3109  ;;  %8085 = vst [vmem:[#allocation24_spill] sm:$0xff] %v7110_v35 }
 0x47c   :  { %8084 = vst [vmem:[#allocation23_spill] sm:$0xff] %v7108_v29  ;;  %v2776_v29 = vmax.f32 %v2598_v12, 0.0 }
 0x47e   :  { %v7118_v47 = vpop.xlane.xlu1 %3148 }
 0x47f   :  { %3940 = vperm.xlu1 %5560, %v3605_v26   ;;  %3931 = vperm.xlu0 %5559, %v3602_v61   ;;  %v7112_v4 = vpop.xlane.xlu0 %3127  ;;  %v2775_v26 = vmax.f32 %v2595_v19, 0.0  ;;  %v2587_v61 = vadd.f32 %v6690_v23, %v6815_v17  ;;  %8087 = vst [vmem:[#allocation26_spill] sm:$0xff] %v7118_v47  ;;  %v8091_v17 = vld [vmem:[#allocation3_spill] sm:$0xff] }
 0x480   :  { %8086 = vst [vmem:[#allocation25_spill] sm:$0xff] %v7112_v4  ;;  %v2590_v47 = vadd.f32 %v6690_v23, %v8091_v17 }
 0x481   :  { %v2910_v21 = vmul.f32 %v6706_v30, %v2775_v26  ;;  %v2773_v58 = vmax.f32 %v2587_v61, 0.0  ;;  %v2911_v61 = vmul.f32 %v6706_v30, %v2776_v29 }
 0x482   :  { %v7125_v35 = vpop.permute.xlu1 %3835  ;;  %v2774_v11 = vmax.f32 %v2590_v47, 0.0  ;;  %v3435_v47 = vadd.f32 %v6673_v6, %v7022_v52  ;;  %v3434_v52 = vadd.f32 %v6665_v41, %v7007_v34 }
 0x483   :  { %3934 = vperm.xlu1 %5560, %v3603_v53   ;;  %v7120_v53 = vpop.xlane.xlu0 %3121  ;;  %8090 = vst [vmem:[#allocation2_spill] sm:$0xff] %v7125_v35  ;;  %v2908_v31 = vmul.f32 %v6706_v30, %v2773_v58  ;;  %v3258_v19 = vsel %vm1927_vm2, %v2910_v21, 0.0  ;;  %v3261_v58 = vsel %vm1927_vm2, %v2911_v61, 0.0 }
 0x484   :  { %8088 = vst [vmem:[#allocation27_spill] sm:$0xff] %v7120_v53  ;;  %v2909_v35 = vmul.f32 %v6706_v30, %v2774_v11  ;;  %v3608_v61 = vadd.f32 %v7083_v43, %v3435_v47  ;;  %v3436_v11 = vadd.f32 %v6677_v49, %v7000_v13 }
 0x485   :  { %v3252_v26 = vsel %vm1927_vm2, %v2908_v31, 0.0 }
 0x486   :  { %v7133_v53 = vpop.permute.xlu1 %3844 }
 0x487   :  { %v7127_v4 = vpop.xlane.xlu0 %3139  ;;  %8092 = vst [vmem:[#allocation3_spill] sm:$0xff] %v7133_v53  ;;  %v3609_v53 = vadd.f32 %v7083_v43, %v3436_v11 }
 0x48a   :  { %v7141_v21 = vpop.permute.xlu1 %3838 }
 0x48b   :  { %v7137_v36 = vpop.xlane.xlu0 %3133  ;;  %8093 = vst [vmem:[#allocation28_spill] sm:$0xff] %v7141_v21 }
 0x48e   :  { %v7146_v17 = vpop.xlane.xlu1 %3166 }
 0x48f   :  { %v7143_v12 = vpop.xlane.xlu0 %3151  ;;  %8094 = vst [vmem:[#allocation29_spill] sm:$0xff] %v7146_v17  ;;  %v8111_v17 = vld [vmem:[#allocation6_spill] sm:$0xff] }
 0x492   :  { %v7150_v29 = vpop.xlane.xlu1 %3160 }
 0x493   :  { %v7148_v31 = vpop.xlane.xlu0 %3145  ;;  %8095 = vst [vmem:[#allocation30_spill] sm:$0xff] %v7150_v29  ;;  %v8106_v29 = vld [vmem:[#allocation4_spill] sm:$0xff] }
 0x49e   :  { %3259 = vadd.xlane.f32.xlu0 %v3258_v19  ;;  %v3255_v19 = vsel %vm1927_vm2, %v2909_v35, 0.0  ;;  %v3433_v35 = vadd.f32 %v6659_v54, %v7029_v0  ;;  %v3607_v0 = vadd.f32 %v7083_v43, %v3434_v52  ;;  %v8108_v52 = vld [vmem:[#allocation5_spill] sm:$0xff] }
 0x4a0   :  { %v3606_v21 = vadd.f32 %v7083_v43, %v3433_v35 }
 0x4a2   :  { %3253 = vadd.xlane.f32.xlu0 %v3252_v26  ;;  %v7154_v26 = vpop.permute.xlu0 %3841 }
 0x4a3   :  { %8096 = vst [vmem:[#allocation31_spill] sm:$0xff] %v7154_v26 }
 0x4a7   :  { %3262 = vadd.xlane.f32.xlu1 %v3261_v58  ;;  %v7161_v58 = vpop.xlane.xlu0 %3163 }
 0x4ab   :  { %3256 = vadd.xlane.f32.xlu1 %v3255_v19  ;;  %v7163_v19 = vpop.permute.xlu1 %3856  ;;  %v7169_v26 = vpop.xlane.xlu0 %3157 }
 0x4ac   :  { %8097 = vst [vmem:[#allocation32_spill] sm:$0xff] %v7163_v19  ;;  %8098 = vst [vmem:[#allocation33_spill] sm:$0xff] %v7169_v26 }
 0x4af   :  { %v7171_v13 = vpop.permute.xlu1 %3850  ;;  %v7174_v47 = vpop.permute.xlu0 %3853 }
 0x4b0   :  { %8099 = vst [vmem:[#allocation34_spill] sm:$0xff] %v7171_v13  ;;  %8100 = vst [vmem:[#allocation35_spill] sm:$0xff] %v7174_v47  ;;  %v2603_v47 = vadd.f32 %v6690_v23, %v8108_v52  ;;  %v7208_v52 = vld [vmem:[%s8047_s9] ss:$0 sm:$0xff] }
 0x4b3   :  { %v7176_v19 = vpop.xlane.xlu1 %3178 }
 0x4b4   :  { %8101 = vst [vmem:[#allocation36_spill] sm:$0xff] %v7176_v19 }
 0x4b7   :  { %v7180_v11 = vpop.xlane.xlu1 %3172 }
 0x4b8   :  { %3949 = vperm.xlu0 %5559, %v3608_v61   ;;  %v7178_v61 = vpop.permute.xlu0 %3847  ;;  %8103 = vst [vmem:[#allocation38_spill] sm:$0xff] %v7180_v11  ;;  %v2777_v11 = vmax.f32 %v2603_v47, 0.0 }
 0x4b9   :  { %8102 = vst [vmem:[#allocation37_spill] sm:$0xff] %v7178_v61 }
 0x4bb   :  { %v7184_v34 = vpop.permute.xlu1 %3868 }
 0x4bc   :  { %3952 = vperm.xlu1 %5560, %v3609_v53   ;;  %3943 = vperm.xlu0 %5559, %v3606_v21   ;;  %v7182_v35 = vpop.xlane.xlu0 %3175  ;;  %8105 = vst [vmem:[#allocation40_spill] sm:$0xff] %v7184_v34  ;;  %v2611_v53 = vadd.f32 %v6690_v23, %v8106_v29  ;;  %v2912_v29 = vmul.f32 %v6706_v30, %v2777_v11 }
 0x4bd   :  { %8104 = vst [vmem:[#allocation39_spill] sm:$0xff] %v7182_v35  ;;  %v2614_v35 = vadd.f32 %v6690_v23, %v8111_v17 }
 0x4be   :  { %v2779_v13 = vmax.f32 %v2611_v53, 0.0  ;;  %v3264_v17 = vsel %vm1927_vm2, %v2912_v29, 0.0 }
 0x4c0   :  { %3946 = vperm.xlu1 %5560, %v3607_v0   ;;  %v7188_v21 = vpop.xlane.xlu0 %3169  ;;  %v7192_v0 = vpop.permute.xlu1 %3862  ;;  %v2914_v61 = vmul.f32 %v6706_v30, %v2779_v13 }
 0x4c1   :  { %8107 = vst [vmem:[#allocation4_spill] sm:$0xff] %v7188_v21  ;;  %8109 = vst [vmem:[#allocation5_spill] sm:$0xff] %v7192_v0  ;;  %v2780_v21 = vmax.f32 %v2614_v35, 0.0 }
 0x4c2   :  { %v3270_v53 = vsel %vm1927_vm2, %v2914_v61, 0.0 }
 0x4c3   :  { %v2915_v11 = vmul.f32 %v6706_v30, %v2780_v21 }
 0x4c4   :  { %v7194_v19 = vpop.permute.xlu0 %3865  ;;  %v7199_v34 = vpop.xlane.xlu1 %3190 }
 0x4c5   :  { %8110 = vst [vmem:[#allocation41_spill] sm:$0xff] %v7194_v19  ;;  %8112 = vst [vmem:[#allocation6_spill] sm:$0xff] %v7199_v34  ;;  %v8114_v19 = vld [vmem:[#allocation7_spill] sm:$0xff] }
 0x4c6   :  { %v2606_v13 = vadd.f32 %v7208_v52, %v8114_v19 }
 0x4c8   :  { %v7202_v26 = vpop.permute.xlu0 %3859  ;;  %v7212_v47 = vpop.xlane.xlu1 %3184  ;;  %v2778_v0 = vmax.f32 %v2606_v13, 0.0 }
 0x4c9   :  { %8113 = vst [vmem:[#allocation42_spill] sm:$0xff] %v7202_v26  ;;  %8115 = vst [vmem:[#allocation7_spill] sm:$0xff] %v7212_v47  ;;  %v3273_v26 = vsel %vm1927_vm2, %v2915_v11, 0.0 }
 0x4ca   :  { %v2913_v61 = vmul.f32 %v6706_v30, %v2778_v0  ;;  %v3439_v30 = vadd.f32 %v6709_v33, %v7034_v15  ;;  %v3438_v15 = vadd.f32 %v6696_v1, %v7014_v62 }
 0x4cc   :  { %v7214_v23 = vpop.xlane.xlu0 %3187  ;;  %v7219_v35 = vpop.permute.xlu1 %3880  ;;  %v3267_v19 = vsel %vm1927_vm2, %v2913_v61, 0.0  ;;  %v3612_v13 = vadd.f32 %v7083_v43, %v3439_v30 }
 0x4cd   :  { %8116 = vst [vmem:[#allocation43_spill] sm:$0xff] %v7219_v35 }
 0x4d0   :  { %v7222_v34 = vpop.xlane.xlu0 %3181  ;;  %v7227_v47 = vpop.permute.xlu1 %3874 }
 0x4d1   :  { %8118 = vst [vmem:[#allocation45_spill] sm:$0xff] %v7227_v47  ;;  %v8130_v47 = vld [vmem:[#allocation8_spill] sm:$0xff] }
 0x4d4   :  { %v7229_v29 = vpop.xlane.xlu1 %3202 }
 0x4d5   :  { %8119 = vst [vmem:[#allocation46_spill] sm:$0xff] %v7229_v29 }
 0x4d8   :  { %v7242_v11 = vpop.xlane.xlu1 %3196 }
 0x4d9   :  { %8121 = vst [vmem:[#allocation48_spill] sm:$0xff] %v7242_v11 }
 0x4db   :  { %3271 = vadd.xlane.f32.xlu0 %v3270_v53  ;;  %v7225_v53 = vpop.permute.xlu0 %3877 }
 0x4dc   :  { %8117 = vst [vmem:[#allocation44_spill] sm:$0xff] %v7225_v53  ;;  %v7250_v53 = vpop.permute.xlu1 %3892 }
 0x4dd   :  { %8123 = vst [vmem:[#allocation50_spill] sm:$0xff] %v7250_v53 }
 0x4df   :  { %3265 = vadd.xlane.f32.xlu0 %v3264_v17  ;;  %v7231_v21 = vpop.permute.xlu0 %3871  ;;  %v3437_v17 = vadd.f32 %v6685_v46, %v7038_v8 }
 0x4e0   :  { %8120 = vst [vmem:[#allocation47_spill] sm:$0xff] %v7231_v21  ;;  %v7255_v8 = vpop.permute.xlu1 %3886  ;;  %v2627_v21 = vadd.f32 %v7208_v52, %v8130_v47 }
 0x4e1   :  { %8125 = vst [vmem:[#allocation52_spill] sm:$0xff] %v7255_v8 }
 0x4e3   :  { %v7235_v0 = vpop.xlane.xlu0 %3199 }
 0x4e4   :  { %3274 = vadd.xlane.f32.xlu1 %v3273_v26  ;;  %v3440_v26 = vadd.f32 %v6713_v60, %v7011_v5  ;;  %v3611_v5 = vadd.f32 %v7083_v43, %v3438_v15  ;;  %v8132_v15 = vld [vmem:[#allocation9_spill] sm:$0xff] }
 0x4e5   :  { %v2619_v53 = vadd.f32 %v7208_v52, %v8132_v15 }
 0x4e6   :  { %v3613_v61 = vadd.f32 %v7083_v43, %v3440_v26  ;;  %v7259_v26 = vpop.xlane.xlu1 %3214 }
 0x4e7   :  { %v7248_v35 = vpop.xlane.xlu0 %3193  ;;  %8127 = vst [vmem:[#allocation54_spill] sm:$0xff] %v7259_v26  ;;  %v8135_v26 = vld [vmem:[#allocation10_spill] sm:$0xff] }
 0x4e8   :  { %3268 = vadd.xlane.f32.xlu1 %v3267_v19  ;;  %v3610_v19 = vadd.f32 %v7083_v43, %v3437_v17  ;;  %8122 = vst [vmem:[#allocation49_spill] sm:$0xff] %v7248_v35  ;;  %v2630_v47 = vadd.f32 %v7208_v52, %v8135_v26  ;;  %v3446_v35 = vadd.f32 %v6627_v3, %v7036_v44 }
 0x4ea   :  { %v7263_v62 = vpop.xlane.xlu1 %3208 }
 0x4eb   :  { %v7253_v30 = vpop.permute.xlu0 %3889  ;;  %8129 = vst [vmem:[#allocation56_spill] sm:$0xff] %v7263_v62  ;;  %v2781_v62 = vmax.f32 %v2619_v53, 0.0 }
 0x4ec   :  { %8124 = vst [vmem:[#allocation51_spill] sm:$0xff] %v7253_v30 }
 0x4f5   :  { %3961 = vperm.xlu0 %5559, %v3612_v13   ;;  %v7257_v13 = vpop.permute.xlu0 %3883 }
 0x4f6   :  { %8126 = vst [vmem:[#allocation53_spill] sm:$0xff] %v7257_v13  ;;  %v7278_v13 = vld [vmem:[%s8048_s10] ss:$0 sm:$0xff] }
 0x4f7   :  { %v2916_v15 = vmul.f32 %v7278_v13, %v2781_v62 }
 0x4f9   :  { %3964 = vperm.xlu1 %5560, %v3613_v61   ;;  %3955 = vperm.xlu0 %5559, %v3610_v19   ;;  %v7261_v17 = vpop.xlane.xlu0 %3211  ;;  %v2783_v19 = vmax.f32 %v2627_v21, 0.0  ;;  %v3276_v53 = vsel %vm1927_vm2, %v2916_v15, 0.0 }
 0x4fa   :  { %8128 = vst [vmem:[#allocation55_spill] sm:$0xff] %v7261_v17  ;;  %v2622_v17 = vadd.f32 %v7208_v52, %v6842_v38 }
 0x4fb   :  { %v2918_v8 = vmul.f32 %v7278_v13, %v2783_v19 }
 0x4fd   :  { %3958 = vperm.xlu1 %5560, %v3611_v5   ;;  %v7267_v61 = vpop.xlane.xlu0 %3205  ;;  %v7271_v5 = vpop.permute.xlu1 %3904 }
 0x4fe   :  { %8131 = vst [vmem:[#allocation8_spill] sm:$0xff] %v7267_v61  ;;  %8133 = vst [vmem:[#allocation9_spill] sm:$0xff] %v7271_v5  ;;  %v3282_v5 = vsel %vm1927_vm2, %v2918_v8, 0.0 }
 0x501   :  { %v7273_v30 = vpop.permute.xlu0 %3901  ;;  %v7283_v61 = vpop.permute.xlu1 %3898 }
 0x502   :  { %8134 = vst [vmem:[#allocation57_spill] sm:$0xff] %v7273_v30  ;;  %8136 = vst [vmem:[#allocation10_spill] sm:$0xff] %v7283_v61  ;;  %v2784_v30 = vmax.f32 %v2630_v47, 0.0  ;;  %v2782_v61 = vmax.f32 %v2622_v17, 0.0  ;;  %v3443_v17 = vadd.f32 %v6730_v48, %v7044_v45  ;;  %v3442_v45 = vadd.f32 %v6726_v9, %v7027_v57 }
 0x504   :  { %v2919_v26 = vmul.f32 %v7278_v13, %v2784_v30  ;;  %v2917_v62 = vmul.f32 %v7278_v13, %v2782_v61 }
 0x505   :  { %v7285_v21 = vpop.permute.xlu0 %3895  ;;  %v7291_v11 = vpop.xlane.xlu1 %3226 }
 0x506   :  { %8137 = vst [vmem:[#allocation58_spill] sm:$0xff] %v7285_v21  ;;  %8138 = vst [vmem:[#allocation59_spill] sm:$0xff] %v7291_v11  ;;  %v3285_v47 = vsel %vm1927_vm2, %v2919_v26, 0.0  ;;  %v3616_v26 = vadd.f32 %v7083_v43, %v3443_v17  ;;  %v3615_v17 = vadd.f32 %v7083_v43, %v3442_v45  ;;  %v8158_v45 = vld [vmem:[#allocation11_spill] sm:$0xff] }
 0x509   :  { %v7293_v19 = vpop.xlane.xlu0 %3223  ;;  %v7297_v21 = vpop.xlane.xlu1 %3220 }
 0x50a   :  { %8139 = vst [vmem:[#allocation60_spill] sm:$0xff] %v7293_v19  ;;  %8140 = vst [vmem:[#allocation61_spill] sm:$0xff] %v7297_v21 }
 0x50d   :  { %v7300_v8 = vpop.xlane.xlu0 %3217  ;;  %v7306_v11 = vpop.permute.xlu1 %3916 }
 0x50e   :  { %8141 = vst [vmem:[#allocation62_spill] sm:$0xff] %v7300_v8  ;;  %8143 = vst [vmem:[#allocation64_spill] sm:$0xff] %v7306_v11 }
 0x511   :  { %v7303_v38 = vpop.permute.xlu0 %3913  ;;  %v7310_v30 = vpop.permute.xlu1 %3910 }
 0x512   :  { %8142 = vst [vmem:[#allocation63_spill] sm:$0xff] %v7303_v38  ;;  %8145 = vst [vmem:[#allocation66_spill] sm:$0xff] %v7310_v30 }
 0x515   :  { %v7308_v15 = vpop.permute.xlu0 %3907 }
 0x516   :  { %8144 = vst [vmem:[#allocation65_spill] sm:$0xff] %v7308_v15  ;;  %v2643_v15 = vadd.f32 %v7208_v52, %v6847_v14 }
 0x518   :  { %3283 = vadd.xlane.f32.xlu0 %v3282_v5  ;;  %v3279_v5 = vsel %vm1927_vm2, %v2917_v62, 0.0  ;;  %v3441_v62 = vadd.f32 %v6721_v10, %v7050_v55 }
 0x519   :  { %v7314_v61 = vpop.xlane.xlu0 %3235 }
 0x51a   :  { %8146 = vst [vmem:[#allocation67_spill] sm:$0xff] %v7314_v61  ;;  %v3614_v11 = vadd.f32 %v7083_v43, %v3441_v62 }
 0x51c   :  { %3277 = vadd.xlane.f32.xlu0 %v3276_v53  ;;  %v7316_v53 = vpop.xlane.xlu1 %3238 }
 0x51d   :  { %8147 = vst [vmem:[#allocation68_spill] sm:$0xff] %v7316_v53  ;;  %v7327_v38 = vpop.xlane.xlu0 %3229 }
 0x51e   :  { %8148 = vst [vmem:[#allocation69_spill] sm:$0xff] %v7327_v38 }
 0x520   :  { %v7329_v30 = vpop.xlane.xlu1 %3232 }
 0x521   :  { %3286 = vadd.xlane.f32.xlu1 %v3285_v47  ;;  %v3444_v47 = vadd.f32 %v6732_v20, %v7017_v42  ;;  %8149 = vst [vmem:[#allocation70_spill] sm:$0xff] %v7329_v30  ;;  %v7332_v42 = vpop.permute.xlu0 %3925 }
 0x522   :  { %8150 = vst [vmem:[#allocation71_spill] sm:$0xff] %v7332_v42 }
 0x524   :  { %v7334_v55 = vpop.permute.xlu1 %3928 }
 0x525   :  { %3280 = vadd.xlane.f32.xlu1 %v3279_v5  ;;  %v3617_v5 = vadd.f32 %v7083_v43, %v3444_v47  ;;  %8151 = vst [vmem:[#allocation72_spill] sm:$0xff] %v7334_v55  ;;  %v2787_v43 = vmax.f32 %v2643_v15, 0.0  ;;  %v2638_v15 = vadd.f32 %v7208_v52, %v6854_v28 }
 0x527   :  { %v2922_v42 = vmul.f32 %v7278_v13, %v2787_v43 }
 0x528   :  { %v7338_v47 = vpop.permute.xlu1 %3922 }
 0x529   :  { %8153 = vst [vmem:[#allocation74_spill] sm:$0xff] %v7338_v47 }
 0x52c   :  { %v7342_v57 = vpop.xlane.xlu1 %3250 }
 0x52d   :  { %8155 = vst [vmem:[#allocation76_spill] sm:$0xff] %v7342_v57 }
 0x532   :  { %3973 = vperm.xlu0 %5559, %v3616_v26   ;;  %v7336_v26 = vpop.permute.xlu0 %3919 }
 0x533   :  { %8152 = vst [vmem:[#allocation73_spill] sm:$0xff] %v7336_v26  ;;  %v8159_v26 = vld [vmem:[#allocation12_spill] sm:$0xff] }
 0x536   :  { %3976 = vperm.xlu1 %5560, %v3617_v5   ;;  %3967 = vperm.xlu0 %5559, %v3614_v11   ;;  %v7340_v62 = vpop.xlane.xlu0 %3247  ;;  %v7348_v11 = vpop.xlane.xlu1 %3244 }
 0x537   :  { %8154 = vst [vmem:[#allocation75_spill] sm:$0xff] %v7340_v62  ;;  %8157 = vst [vmem:[#allocation78_spill] sm:$0xff] %v7348_v11  ;;  %v2646_v62 = vadd.f32 %v7208_v52, %v8159_v26  ;;  %v2786_v26 = vmax.f32 %v2638_v15, 0.0 }
 0x539   :  { %v2788_v11 = vmax.f32 %v2646_v62, 0.0 }
 0x53a   :  { %3970 = vperm.xlu1 %5560, %v3615_v17   ;;  %v7346_v5 = vpop.xlane.xlu0 %3241  ;;  %v2635_v17 = vadd.f32 %v7208_v52, %v8158_v45  ;;  %v7357_v57 = vpop.permute.xlu1 %3940 }
 0x53b   :  { %8156 = vst [vmem:[#allocation77_spill] sm:$0xff] %v7346_v5  ;;  %v3294_v5 = vsel %vm1927_vm2, %v2922_v42, 0.0  ;;  %v2921_v42 = vmul.f32 %v7278_v13, %v2786_v26 }
 0x53c   :  { %v2785_v47 = vmax.f32 %v2635_v17, 0.0  ;;  %v2923_v17 = vmul.f32 %v7278_v13, %v2788_v11 }
 0x53e   :  { %v7352_v55 = vpop.permute.xlu0 %3937  ;;  %v2920_v14 = vmul.f32 %v7278_v13, %v2785_v47  ;;  %v3935_v53 = vpop.permute.xlu1 %3934  ;;  %v3297_v47 = vsel %vm1927_vm2, %v2923_v17, 0.0  ;;  %v3447_v17 = vadd.f32 %v6639_v32, %v7058_v56 }
 0x540   :  { %v3288_v43 = vsel %vm1927_vm2, %v2920_v14, 0.0  ;;  %v8164_v14 = vlaneseq }
 0x542   :  { %v3932_v30 = vpop.permute.xlu0 %3931  ;;  %v7367_v38 = vpop.xlane.xlu1 %3262  ;;  %v7379_v11 = vand.u32 127, %v8164_v14 }
 0x543   :  { %8161 = vst [vmem:[#allocation12_spill] sm:$0xff] %v7367_v38  ;;  %v3544_v38 = vsub.s32 3, %v5666_v7 }
 0x544   :  { %v4222_v15 = vadd.s32 4294967288, %v7379_v11  ;;  %v7398_v14 = vsub.s32 %v7379_v11, %v5666_v7  ;;  %v4236_v21 = vadd.s32 4294967272, %v7379_v11  ;;  %v4250_v8 = vadd.s32 4294967256, %v7379_v11 }
 0x546   :  { %v7363_v45 = vpop.xlane.xlu0 %3259  ;;  %v7375_v62 = vpop.xlane.xlu1 %3256  ;;  %v7388_v26 = vsub.s32 %v4222_v15, %v5666_v7  ;;  %v3448_v15 = vadd.f32 %v6651_v2, %v7032_v51  ;;  %v4409_v19 = vrot.slane %v3932_v30, %v7398_v14 }
 0x547   :  { %8160 = vst [vmem:[#allocation11_spill] sm:$0xff] %v7363_v45  ;;  %8163 = vst [vmem:[#allocation80_spill] sm:$0xff] %v7375_v62  ;;  %v4243_v62 = vadd.s32 4294967264, %v7379_v11 }
 0x548   :  { %8165 = vst [vmem:[#allocation81_spill] sm:$0xff] %v7388_v26  ;;  %v4413_v45 = vrot.slane %v3935_v53, %v7388_v26 }
 0x549   :  { %v7414_v53 = vsub.s32 %v4243_v62, %v5666_v7 }
 0x54a   :  { %v7369_v61 = vpop.xlane.xlu0 %3253  ;;  %v4414_v51 = vsel %vm4227_vm3, %v4413_v45, %v4409_v19  ;;  %v7431_v19 = vsub.s32 %v4250_v8, %v5666_v7  ;;  %v4257_v45 = vadd.s32 4294967248, %v7379_v11  ;;  %v4271_v8 = vadd.s32 4294967232, %v7379_v11 }
 0x54b   :  { %8162 = vst [vmem:[#allocation79_spill] sm:$0xff] %v7369_v61  ;;  %v7383_v61 = vpop.permute.xlu1 %3952  ;;  %8167 = vst [vmem:[#allocation83_spill] sm:$0xff] %v7414_v53 }
 0x54c   :  { %8169 = vst [vmem:[#allocation85_spill] sm:$0xff] %v7431_v19 }
 0x54e   :  { %v7373_v28 = vpop.permute.xlu0 %3949 }
 0x555   :  { %3295 = vadd.xlane.f32.xlu0 %v3294_v5  ;;  %v3291_v5 = vsel %vm1927_vm2, %v2921_v42, 0.0  ;;  %v7393_v42 = vrot.slane %v6738_v50, %v3544_v38  ;;  %v3947_v38 = vpop.permute.xlu1 %3946 }
 0x557   :  { %v3620_v56 = vadd.f32 %v7393_v42, %v3447_v17 }
 0x559   :  { %3289 = vadd.xlane.f32.xlu0 %v3288_v43  ;;  %v3944_v43 = vpop.permute.xlu0 %3943 }
 0x55e   :  { %3298 = vadd.xlane.f32.xlu1 %v3297_v47 }
 0x562   :  { %3292 = vadd.xlane.f32.xlu1 %v3291_v5  ;;  %v4229_v5 = vadd.s32 4294967280, %v7379_v11 }
 0x564   :  { %v7411_v29 = vsub.s32 %v4229_v5, %v5666_v7 }
 0x566   :  { %v4418_v30 = vrot.slane %v7352_v55, %v7411_v29  ;;  %v4433_v55 = vrot.slane %v3947_v38, %v7431_v19  ;;  %v4278_v38 = vadd.s32 4294967224, %v7379_v11 }
 0x568   :  { %v7390_v47 = vpop.xlane.xlu0 %3271  ;;  %v4419_v62 = vsel %vm4234_vm4, %v4418_v30, %v4414_v51  ;;  %v4264_v51 = vadd.s32 4294967240, %v7379_v11  ;;  %v7454_v30 = vsub.s32 %v4271_v8, %v5666_v7 }
 0x569   :  { %8166 = vst [vmem:[#allocation82_spill] sm:$0xff] %v7390_v47  ;;  %v3445_v47 = vadd.f32 %v6647_v37, %v7067_v24  ;;  %v3621_v24 = vadd.f32 %v7393_v42, %v3448_v15 }
 0x56a   :  { %8170 = vst [vmem:[#allocation86_spill] sm:$0xff] %v7454_v30 }
 0x56b   :  { %v3618_v26 = vadd.f32 %v7393_v42, %v3445_v47  ;;  %v4428_v47 = vrot.slane %v3944_v43, %v7414_v53 }
 0x56c   :  { %v7417_v17 = vpop.xlane.xlu0 %3265 }
 0x56d   :  { %8168 = vst [vmem:[#allocation84_spill] sm:$0xff] %v7417_v17 }
 0x56f   :  { %3985 = vperm.xlu0 %5559, %v3620_v56   ;;  %v7428_v56 = vsub.s32 %v4236_v21, %v5666_v7  ;;  %v3619_v21 = vadd.f32 %v7393_v42, %v3446_v35 }
 0x571   :  { %v7425_v5 = vpop.xlane.xlu1 %3274  ;;  %v4423_v44 = vrot.slane %v7357_v57, %v7428_v56 }
 0x573   :  { %3988 = vperm.xlu1 %5560, %v3621_v24   ;;  %3979 = vperm.xlu0 %5559, %v3618_v26   ;;  %v4424_v43 = vsel %vm4241_vm5, %v4423_v44, %v4419_v62  ;;  %v7448_v26 = vsub.s32 %v4257_v45, %v5666_v7  ;;  %v7461_v45 = vsub.s32 %v4264_v51, %v5666_v7 }
 0x574   :  { %v7439_v15 = vpop.permute.xlu0 %3961  ;;  %v4429_v57 = vsel %vm4248_vm6, %v4428_v47, %v4424_v43  ;;  %v7466_v44 = vsub.s32 %v4278_v38, %v5666_v7  ;;  %v8172_v43 = vld [vmem:[#allocation13_spill] sm:$0xff] }
 0x575   :  { %v7443_v17 = vpop.xlane.xlu1 %3268  ;;  %v4434_v35 = vsel %vm4255_vm7, %v4433_v55, %v4429_v57  ;;  %v4438_v19 = vrot.slane %v7373_v28, %v7448_v26  ;;  %8171 = vst [vmem:[#allocation87_spill] sm:$0xff] %v7461_v45  ;;  %v4443_v55 = vrot.slane %v7383_v61, %v7461_v45  ;;  %v2659_v57 = vadd.f32 %v7208_v52, %v8172_v43  ;;  %v8174_v45 = vld [vmem:[#allocation15_spill] sm:$0xff] }
 0x577   :  { %3982 = vperm.xlu1 %5560, %v3619_v21   ;;  %v4439_v62 = vsel %vm4262_vm8, %v4438_v19, %v4434_v35  ;;  %v2791_v38 = vmax.f32 %v2659_v57, 0.0  ;;  %v8173_v35 = vld [vmem:[#allocation14_spill] sm:$0xff] }
 0x578   :  { %v3956_v24 = vpop.permute.xlu0 %3955  ;;  %v4444_v28 = vsel %vm4269_vm9, %v4443_v55, %v4439_v62  ;;  %v2662_v62 = vadd.f32 %v7208_v52, %v8174_v45  ;;  %v3451_v45 = vadd.f32 %v6673_v6, %v7073_v18  ;;  %v3450_v18 = vadd.f32 %v6665_v41, %v7048_v27 }
 0x579   :  { %v7458_v53 = vpop.permute.xlu1 %3964  ;;  %v4448_v47 = vrot.slane %v3956_v24, %v7454_v30  ;;  %v2651_v24 = vadd.f32 %v7208_v52, %v8173_v35  ;;  %v2926_v61 = vmul.f32 %v7278_v13, %v2791_v38  ;;  %v3453_v27 = vadd.f32 %v6685_v46, %v7099_v25 }
 0x57b   :  { %v4449_v51 = vsel %vm4276_vm10, %v4448_v47, %v4444_v28  ;;  %v2789_v30 = vmax.f32 %v2651_v24, 0.0  ;;  %v2792_v47 = vmax.f32 %v2662_v62, 0.0  ;;  %v8175_v28 = vld [vmem:[#allocation16_spill] sm:$0xff]  ;;  %v3449_v62 = vadd.f32 %v6659_v54, %v7078_v63 }
 0x57c   :  { %v3456_v63 = vadd.f32 %v6713_v60, %v7055_v22 }
 0x57d   :  { %v3959_v21 = vpop.permute.xlu1 %3958  ;;  %v2924_v55 = vmul.f32 %v7278_v13, %v2789_v30  ;;  %v2927_v43 = vmul.f32 %v7278_v13, %v2792_v47  ;;  %v3622_v47 = vadd.f32 %v7393_v42, %v3449_v62  ;;  %v4306_v62 = vadd.s32 4294967192, %v7379_v11 }
 0x57e   :  { %v4453_v8 = vrot.slane %v3959_v21, %v7466_v44  ;;  %v3306_v21 = vsel %vm1927_vm2, %v2926_v61, 0.0  ;;  %v3452_v61 = vadd.f32 %v6677_v49, %v7040_v59  ;;  %v4292_v59 = vadd.s32 4294967208, %v7379_v11 }
 0x57f   :  { %v3309_v35 = vsel %vm1927_vm2, %v2927_v43, 0.0  ;;  %v4299_v43 = vadd.s32 4294967200, %v7379_v11 }
 0x580   :  { %v4454_v19 = vsel %vm4283_vm11, %v4453_v8, %v4449_v51  ;;  %v2654_v8 = vadd.f32 %v7208_v52, %v8175_v28  ;;  %v3300_v51 = vsel %vm1927_vm2, %v2924_v55, 0.0  ;;  %v3624_v52 = vadd.f32 %v7393_v42, %v3451_v45 }
 0x581   :  { %v3455_v28 = vadd.f32 %v6709_v33, %v7087_v40  ;;  %v3623_v40 = vadd.f32 %v7393_v42, %v3450_v18  ;;  %v7526_v22 = vsub.s32 %v4292_v59, %v5666_v7  ;;  %v3629_v45 = vadd.f32 %v7393_v42, %v3456_v63  ;;  %v8176_v63 = vld [vmem:[#allocation17_spill] sm:$0xff] }
 0x582   :  { %v2790_v57 = vmax.f32 %v2654_v8, 0.0  ;;  %v4313_v18 = vadd.s32 4294967184, %v7379_v11  ;;  %v4320_v59 = vadd.s32 4294967176, %v7379_v11 }
 0x584   :  { %v2925_v38 = vmul.f32 %v7278_v13, %v2790_v57  ;;  %v4285_v13 = vadd.s32 4294967216, %v7379_v11 }
 0x586   :  { %v3303_v30 = vsel %vm1927_vm2, %v2925_v38, 0.0  ;;  %v3628_v38 = vadd.f32 %v7393_v42, %v3455_v28  ;;  %vm4880_vm2 = vcmask 1041409  }
 0x592   :  { %3307 = vadd.xlane.f32.xlu0 %v3306_v21  ;;  %v3625_v21 = vadd.f32 %v7393_v42, %v3452_v61  ;;  %v3626_v61 = vadd.f32 %v7393_v42, %v3453_v27 }
 0x596   :  { %3301 = vadd.xlane.f32.xlu0 %v3300_v51  ;;  %v7514_v51 = vsub.s32 %v4285_v13, %v5666_v7  ;;  %v4463_v13 = vrot.slane %v7458_v53, %v7526_v22 }
 0x59b   :  { %3310 = vadd.xlane.f32.xlu1 %v3309_v35  ;;  %v4458_v35 = vrot.slane %v7439_v15, %v7514_v51  ;;  %v3454_v15 = vadd.f32 %v6696_v1, %v7065_v16 }
 0x59d   :  { %v4459_v25 = vsel %vm4290_vm12, %v4458_v35, %v4454_v19  ;;  %v3627_v27 = vadd.f32 %v7393_v42, %v3454_v15 }
 0x59e   :  { %v4464_v16 = vsel %vm8061_vm13, %v4463_v13, %v4459_v25  ;;  %v7559_v13 = vsub.s32 %v4320_v59, %v5666_v7 }
 0x59f   :  { %3304 = vadd.xlane.f32.xlu1 %v3303_v30 }
 0x5a5   :  { %v7492_v24 = vpop.xlane.xlu0 %3283 }
 0x5a9   :  { %v7500_v55 = vpop.xlane.xlu0 %3277 }
 0x5ac   :  { %3997 = vperm.xlu0 %5559, %v3624_v52   ;;  %v7530_v52 = vsub.s32 %v4299_v43, %v5666_v7  ;;  %v3460_v43 = vadd.f32 %v6732_v20, %v8176_v63  ;;  %v8179_v63 = vld [vmem:[#allocation25_spill] sm:$0xff] }
 0x5ae   :  { %v7508_v8 = vpop.xlane.xlu1 %3286 }
 0x5b0   :  { %4000 = vperm.xlu1 %5560, %v3625_v21   ;;  %3991 = vperm.xlu0 %5559, %v3622_v47   ;;  %v3459_v47 = vadd.f32 %v6730_v48, %v7104_v39  ;;  %v7549_v39 = vsub.s32 %v4306_v62, %v5666_v7  ;;  %v3633_v62 = vadd.f32 %v7393_v42, %v3460_v43 }
 0x5b1   :  { %v3974_v57 = vpop.permute.xlu0 %3973 }
 0x5b2   :  { %v7523_v30 = vpop.xlane.xlu1 %3280 }
 0x5b4   :  { %3994 = vperm.xlu1 %5560, %v3623_v40   ;;  %4009 = vperm.xlu0 %5559, %v3628_v38   ;;  %v3632_v40 = vadd.f32 %v7393_v42, %v3459_v47  ;;  %v8177_v38 = vld [vmem:[#allocation23_spill] sm:$0xff]  ;;  %v8178_v47 = vld [vmem:[#allocation18_spill] sm:$0xff] }
 0x5b5   :  { %v3968_v21 = vpop.permute.xlu0 %3967  ;;  %v3457_v35 = vadd.f32 %v6721_v10, %v8177_v38  ;;  %v3463_v38 = vadd.f32 %v6639_v32, %v8179_v63  ;;  %v3465_v63 = vadd.f32 %v6659_v54, %v7137_v36  ;;  %v3469_v36 = vadd.f32 %v6685_v46, %v7148_v31 }
 0x5b6   :  { %v4468_v19 = vrot.slane %v3968_v21, %v7530_v52  ;;  %v3977_v28 = vpop.permute.xlu1 %3976  ;;  %v7556_v21 = vsub.s32 %v4313_v18, %v5666_v7 }
 0x5b7   :  { %v4483_v18 = vrot.slane %v3977_v28, %v7559_v13 }
 0x5b8   :  { %v4469_v53 = vsel %vm8062_vm14, %v4468_v19, %v4464_v16  ;;  %4012 = vperm.xlu1 %5560, %v3629_v45   ;;  %4003 = vperm.xlu0 %5559, %v3626_v61   ;;  %v3548_v61 = vsub.s32 4, %v5666_v7  ;;  %v4478_v15 = vrot.slane %v3974_v57, %v7556_v21  ;;  %v3458_v19 = vadd.f32 %v6726_v9, %v8178_v47 }
 0x5b9   :  { %v3630_v16 = vadd.f32 %v7393_v42, %v3457_v35  ;;  %v8181_v35 = vld [vmem:[#allocation27_spill] sm:$0xff] }
 0x5ba   :  { %v3971_v25 = vpop.permute.xlu1 %3970 }
 0x5bb   :  { %v4473_v45 = vrot.slane %v3971_v25, %v7549_v39  ;;  %v8180_v25 = vld [vmem:[#allocation19_spill] sm:$0xff] }
 0x5bc   :  { %4006 = vperm.xlu1 %5560, %v3627_v27   ;;  %4021 = vperm.xlu0 %5559, %v3632_v40   ;;  %v3549_v27 = vrot.slane %v6738_v50, %v3548_v61  ;;  %v3631_v40 = vadd.f32 %v7393_v42, %v3458_v19  ;;  %v3467_v61 = vadd.f32 %v6673_v6, %v7127_v4  ;;  %v8183_v19 = vld [vmem:[#allocation21_spill] sm:$0xff] }
 0x5bd   :  { %v4474_v59 = vsel %vm4311_vm15, %v4473_v45, %v4469_v53  ;;  %v3464_v53 = vadd.f32 %v6651_v2, %v8180_v25  ;;  %v3461_v45 = vadd.f32 %v6647_v37, %v8181_v35  ;;  %v3471_v4 = vadd.f32 %v6709_v33, %v7143_v12  ;;  %v8185_v35 = vld [vmem:[#allocation24_spill] sm:$0xff] }
 0x5be   :  { %v4479_v43 = vsel %vm4318_vm0, %v4478_v15, %v4474_v59  ;;  %v3636_v28 = vadd.f32 %v3549_v27, %v3463_v38  ;;  %v8182_v59 = vld [vmem:[#allocation20_spill] sm:$0xff]  ;;  %v3475_v12 = vadd.f32 %v6730_v48, %v7161_v58  ;;  %v8190_v58 = vld [vmem:[#allocation39_spill] sm:$0xff] }
 0x5bf   :  { %v7574_v57 = vsel %vm4325_vm1, %v4483_v18, %v4479_v43  ;;  %v3637_v47 = vadd.f32 %v3549_v27, %v3464_v53  ;;  %v3634_v15 = vadd.f32 %v3549_v27, %v3461_v45  ;;  %v3462_v18 = vadd.f32 %v6627_v3, %v8182_v59  ;;  %v8186_v59 = vld [vmem:[#allocation26_spill] sm:$0xff] }
 0x5c0   :  { %4024 = vperm.xlu1 %5560, %v3633_v62   ;;  %4015 = vperm.xlu0 %5559, %v3630_v16   ;;  %v3640_v62 = vadd.f32 %v3549_v27, %v3467_v61  ;;  %v3468_v16 = vadd.f32 %v6677_v49, %v8183_v19  ;;  %v3638_v43 = vadd.f32 %v3549_v27, %v3465_v63  ;;  %v3552_v63 = vsub.s32 5, %v5666_v7 }
 0x5c1   :  { %v3635_v42 = vadd.f32 %v3549_v27, %v3462_v18  ;;  %v3644_v53 = vadd.f32 %v3549_v27, %v3471_v4  ;;  %v3472_v45 = vadd.f32 %v6713_v60, %v8185_v35  ;;  %v3470_v18 = vadd.f32 %v6696_v1, %v8186_v59 }
 0x5c2   :  { %v3641_v38 = vadd.f32 %v3549_v27, %v3468_v16  ;;  %v8188_v16 = vld [vmem:[#allocation29_spill] sm:$0xff]  ;;  %v3479_v4 = vadd.f32 %v6639_v32, %v8190_v58 }
 0x5c3   :  { %v3643_v61 = vadd.f32 %v3549_v27, %v3470_v18  ;;  %v3476_v31 = vadd.f32 %v6732_v20, %v8188_v16  ;;  %v3481_v16 = vadd.f32 %v6659_v54, %v7222_v34 }
 0x5c4   :  { %4018 = vperm.xlu1 %5560, %v3631_v40   ;;  %4033 = vperm.xlu0 %5559, %v3636_v28   ;;  %v8184_v40 = vld [vmem:[#allocation22_spill] sm:$0xff] }
 0x5c5   :  { %v3466_v28 = vadd.f32 %v6665_v41, %v8184_v40  ;;  %v8189_v40 = vld [vmem:[#allocation30_spill] sm:$0xff] }
 0x5c7   :  { %v3639_v25 = vadd.f32 %v3549_v27, %v3466_v28  ;;  %v3474_v28 = vadd.f32 %v6726_v9, %v8189_v40 }
 0x5c8   :  { %4036 = vperm.xlu1 %5560, %v3637_v47   ;;  %4027 = vperm.xlu0 %5559, %v3634_v15   ;;  %v3645_v47 = vadd.f32 %v3549_v27, %v3472_v45  ;;  %v3642_v15 = vadd.f32 %v3549_v27, %v3469_v36  ;;  %v8191_v45 = vld [vmem:[#allocation4_spill] sm:$0xff] }
 0x5c9   :  { %v3477_v36 = vadd.f32 %v6647_v37, %v8191_v45 }
 0x5cc   :  { %4030 = vperm.xlu1 %5560, %v3635_v42   ;;  %4045 = vperm.xlu0 %5559, %v3640_v62   ;;  %v3648_v42 = vadd.f32 %v3549_v27, %v3475_v12  ;;  %v8187_v62 = vld [vmem:[#allocation33_spill] sm:$0xff] }
 0x5cd   :  { %v3473_v19 = vadd.f32 %v6721_v10, %v8187_v62 }
 0x5d0   :  { %4048 = vperm.xlu1 %5560, %v3641_v38   ;;  %4039 = vperm.xlu0 %5559, %v3638_v43   ;;  %v3646_v38 = vadd.f32 %v3549_v27, %v3473_v19  ;;  %v3649_v43 = vadd.f32 %v3549_v27, %v3476_v31  ;;  %v8194_v31 = vld [vmem:[#allocation6_spill] sm:$0xff] }
 0x5d4   :  { %4042 = vperm.xlu1 %5560, %v3639_v25   ;;  %4057 = vperm.xlu0 %5559, %v3644_v53   ;;  %v7612_v25 = vrot.slane %v6738_v50, %v3552_v63  ;;  %v3647_v53 = vadd.f32 %v3549_v27, %v3474_v28  ;;  %v3483_v27 = vadd.f32 %v6673_v6, %v7214_v23  ;;  %v8195_v28 = vld [vmem:[#allocation7_spill] sm:$0xff] }
 0x5d5   :  { %v3484_v63 = vadd.f32 %v6677_v49, %v8194_v31  ;;  %v3482_v58 = vadd.f32 %v6665_v41, %v8195_v28 }
 0x5d6   :  { %v3652_v35 = vadd.f32 %v7612_v25, %v3479_v4  ;;  %v3650_v18 = vadd.f32 %v7612_v25, %v3477_v36  ;;  %v3656_v19 = vadd.f32 %v7612_v25, %v3483_v27  ;;  %v3654_v23 = vadd.f32 %v7612_v25, %v3481_v16  ;;  %v8196_v36 = vld [vmem:[#allocation49_spill] sm:$0xff] }
 0x5d7   :  { %v3657_v40 = vadd.f32 %v7612_v25, %v3484_v63  ;;  %v3487_v4 = vadd.f32 %v6709_v33, %v7235_v0 }
 0x5d8   :  { %4060 = vperm.xlu1 %5560, %v3645_v47   ;;  %4051 = vperm.xlu0 %5559, %v3642_v15   ;;  %v8192_v47 = vld [vmem:[#allocation36_spill] sm:$0xff] }
 0x5d9   :  { %v3480_v15 = vadd.f32 %v6651_v2, %v8192_v47  ;;  %v3660_v45 = vadd.f32 %v7612_v25, %v3487_v4  ;;  %v3485_v47 = vadd.f32 %v6685_v46, %v8196_v36  ;;  %v8202_v36 = vld [vmem:[#allocation54_spill] sm:$0xff] }
 0x5db   :  { %v3653_v12 = vadd.f32 %v7612_v25, %v3480_v15  ;;  %v8197_v15 = vld [vmem:[#allocation46_spill] sm:$0xff] }
 0x5dc   :  { %4054 = vperm.xlu1 %5560, %v3643_v61   ;;  %4069 = vperm.xlu0 %5559, %v3648_v42   ;;  %v8193_v61 = vld [vmem:[#allocation38_spill] sm:$0xff] }
 0x5dd   :  { %v3478_v42 = vadd.f32 %v6627_v3, %v8193_v61  ;;  %v8198_v61 = vld [vmem:[#allocation48_spill] sm:$0xff] }
 0x5de   :  { %v3486_v0 = vadd.f32 %v6696_v1, %v8198_v61 }
 0x5df   :  { %v3651_v62 = vadd.f32 %v7612_v25, %v3478_v42  ;;  %v8199_v42 = vld [vmem:[#allocation55_spill] sm:$0xff] }
 0x5e0   :  { %4072 = vperm.xlu1 %5560, %v3649_v43   ;;  %4063 = vperm.xlu0 %5559, %v3646_v38   ;;  %v3491_v27 = vadd.f32 %v6730_v48, %v8199_v42  ;;  %v3659_v28 = vadd.f32 %v7612_v25, %v3486_v0  ;;  %v3556_v42 = vsub.s32 6, %v5666_v7 }
 0x5e2   :  { %v7619_v59 = vpop.xlane.xlu0 %3295 }
 0x5e4   :  { %4066 = vperm.xlu1 %5560, %v3647_v53   ;;  %4081 = vperm.xlu0 %5559, %v3652_v35   ;;  %v3655_v35 = vadd.f32 %v7612_v25, %v3482_v58  ;;  %v3664_v58 = vadd.f32 %v7612_v25, %v3491_v27 }
 0x5e6   :  { %v7633_v38 = vpop.xlane.xlu0 %3289 }
 0x5e8   :  { %4084 = vperm.xlu1 %5560, %v3653_v12   ;;  %4075 = vperm.xlu0 %5559, %v3650_v18   ;;  %v3488_v18 = vadd.f32 %v6713_v60, %v8197_v15 }
 0x5ea   :  { %v3661_v16 = vadd.f32 %v7612_v25, %v3488_v18 }
 0x5eb   :  { %v7635_v43 = vpop.xlane.xlu1 %3298 }
 0x5ec   :  { %4078 = vperm.xlu1 %5560, %v3651_v62   ;;  %4093 = vperm.xlu0 %5559, %v3656_v19   ;;  %v3658_v19 = vadd.f32 %v7612_v25, %v3485_v47  ;;  %v3492_v47 = vadd.f32 %v6732_v20, %v8202_v36 }
 0x5ee   :  { %v3986_v34 = vpop.permute.xlu0 %3985  ;;  %v3665_v27 = vadd.f32 %v7612_v25, %v3492_v47  ;;  %v8207_v47 = vld [vmem:[#allocation61_spill] sm:$0xff] }
 0x5ef   :  { %v7643_v53 = vpop.xlane.xlu1 %3292  ;;  %v4497_v4 = vrot.slane %v3986_v34, %v7411_v29 }
 0x5f0   :  { %4096 = vperm.xlu1 %5560, %v3657_v40   ;;  %4087 = vperm.xlu0 %5559, %v3654_v23   ;;  %v8200_v23 = vld [vmem:[#allocation81_spill] sm:$0xff] }
 0x5f2   :  { %v3980_v62 = vpop.permute.xlu0 %3979 }
 0x5f3   :  { %v3989_v12 = vpop.permute.xlu1 %3988  ;;  %v4488_v63 = vrot.slane %v3980_v62, %v7398_v14  ;;  %v8203_v62 = vld [vmem:[#allocation56_spill] sm:$0xff] }
 0x5f4   :  { %4090 = vperm.xlu1 %5560, %v3655_v35   ;;  %4105 = vperm.xlu0 %5559, %v3660_v45   ;;  %v8201_v35 = vld [vmem:[#allocation8_spill] sm:$0xff]  ;;  %v4502_v15 = vrot.slane %v3989_v12, %v7428_v56 }
 0x5f5   :  { %v3489_v45 = vadd.f32 %v6721_v10, %v8201_v35 }
 0x5f7   :  { %v3983_v31 = vpop.permute.xlu1 %3982  ;;  %v3662_v34 = vadd.f32 %v7612_v25, %v3489_v45 }
 0x5f8   :  { %v4492_v40 = vrot.slane %v3983_v31, %v8200_v23  ;;  %4108 = vperm.xlu1 %5560, %v3661_v16   ;;  %4099 = vperm.xlu0 %5559, %v3658_v19   ;;  %v3490_v19 = vadd.f32 %v6726_v9, %v8203_v62  ;;  %v8204_v16 = vld [vmem:[#allocation60_spill] sm:$0xff]  ;;  %v7680_v31 = vrot.slane %v6738_v50, %v3556_v42 }
 0x5f9   :  { %v3495_v12 = vadd.f32 %v6639_v32, %v8204_v16  ;;  %v8210_v62 = vld [vmem:[#allocation68_spill] sm:$0xff] }
 0x5fa   :  { %v4493_v18 = vsel %vm4227_vm3, %v4492_v40, %v4488_v63  ;;  %v3663_v63 = vadd.f32 %v7612_v25, %v3490_v19  ;;  %v3500_v19 = vadd.f32 %v6677_v49, %v8210_v62 }
 0x5fb   :  { %v4498_v61 = vsel %vm4234_vm4, %v4497_v4, %v4493_v18  ;;  %v3668_v40 = vadd.f32 %v7680_v31, %v3495_v12  ;;  %v8206_v4 = vld [vmem:[#allocation59_spill] sm:$0xff] }
 0x5fc   :  { %4102 = vperm.xlu1 %5560, %v3659_v28   ;;  %4117 = vperm.xlu0 %5559, %v3664_v58   ;;  %v7671_v0 = vsel %vm4241_vm5, %v4502_v15, %v4498_v61  ;;  %v8205_v28 = vld [vmem:[#allocation62_spill] sm:$0xff]  ;;  %v3496_v35 = vadd.f32 %v6651_v2, %v8206_v4  ;;  %v3494_v15 = vadd.f32 %v6627_v3, %v8207_v47  ;;  %v8208_v18 = vld [vmem:[#allocation67_spill] sm:$0xff]  ;;  %v8214_v47 = vld [vmem:[#allocation76_spill] sm:$0xff] }
 0x5fd   :  { %v3493_v58 = vadd.f32 %v6647_v37, %v8205_v28  ;;  %v3499_v25 = vadd.f32 %v6673_v6, %v8208_v18  ;;  %v3673_v12 = vadd.f32 %v7680_v31, %v3500_v19  ;;  %v8212_v28 = vld [vmem:[#allocation75_spill] sm:$0xff]  ;;  %v3560_v18 = vsub.s32 7, %v5666_v7 }
 0x5fe   :  { %v3669_v36 = vadd.f32 %v7680_v31, %v3496_v35  ;;  %v3667_v61 = vadd.f32 %v7680_v31, %v3494_v15  ;;  %v3504_v15 = vadd.f32 %v6713_v60, %v8214_v47 }
 0x5ff   :  { %v3666_v45 = vadd.f32 %v7680_v31, %v3493_v58  ;;  %v3672_v42 = vadd.f32 %v7680_v31, %v3499_v25  ;;  %v3503_v58 = vadd.f32 %v6709_v33, %v8212_v28  ;;  %v7720_v62 = vrot.slane %v6738_v50, %v3560_v18  ;;  %v8217_v28 = vld [vmem:[#allocation28_spill] sm:$0xff] }
 0x600   :  { %4120 = vperm.xlu1 %5560, %v3665_v27   ;;  %4111 = vperm.xlu0 %5559, %v3662_v34   ;;  %v8209_v34 = vld [vmem:[#allocation69_spill] sm:$0xff] }
 0x601   :  { %v3497_v27 = vadd.f32 %v6659_v54, %v8209_v34  ;;  %v3676_v35 = vadd.f32 %v7680_v31, %v3503_v58 }
 0x603   :  { %v3670_v16 = vadd.f32 %v7680_v31, %v3497_v27  ;;  %v3512_v27 = vadd.f32 %v6651_v2, %v7425_v5  ;;  %v4226_v2 = vrot.slane %v8217_v28, %v8200_v23  ;;  %v8218_v5 = vld [vmem:[#allocation79_spill] sm:$0xff] }
 0x604   :  { %4114 = vperm.xlu1 %5560, %v3663_v63   ;;  %4129 = vperm.xlu0 %5559, %v3668_v40   ;;  %v8211_v63 = vld [vmem:[#allocation70_spill] sm:$0xff]  ;;  %v3505_v58 = vadd.f32 %v6721_v10, %v8218_v5  ;;  %v8226_v28 = vld [vmem:[#allocation3_spill] sm:$0xff] }
 0x605   :  { %v3498_v40 = vadd.f32 %v6665_v41, %v8211_v63  ;;  %v3685_v63 = vadd.f32 %v7720_v62, %v3512_v27  ;;  %v8223_v27 = vld [vmem:[#allocation53_spill] sm:$0xff]  ;;  %v8228_v5 = vld [vmem:[#allocation34_spill] sm:$0xff] }
 0x607   :  { %v3671_v4 = vadd.f32 %v7680_v31, %v3498_v40  ;;  %v3510_v40 = vadd.f32 %v6627_v3, %v7443_v17  ;;  %v8220_v3 = vld [vmem:[#allocation31_spill] sm:$0xff] }
 0x608   :  { %4132 = vperm.xlu1 %5560, %v3669_v36   ;;  %4123 = vperm.xlu0 %5559, %v3666_v45   ;;  %v8213_v45 = vld [vmem:[#allocation77_spill] sm:$0xff]  ;;  %v4233_v17 = vrot.slane %v8220_v3, %v7411_v29 }
 0x609   :  { %v3501_v36 = vadd.f32 %v6685_v46, %v8213_v45  ;;  %v8219_v45 = vld [vmem:[#allocation2_spill] sm:$0xff] }
 0x60b   :  { %v3674_v25 = vadd.f32 %v7680_v31, %v3501_v36  ;;  %v4221_v36 = vrot.slane %v8219_v45, %v7398_v14  ;;  %v8230_v45 = vld [vmem:[#allocation82_spill] sm:$0xff] }
 0x60c   :  { %4126 = vperm.xlu1 %5560, %v3667_v61   ;;  %4141 = vperm.xlu0 %5559, %v3672_v42   ;;  %v3677_v61 = vadd.f32 %v7680_v31, %v3504_v15  ;;  %v8215_v42 = vld [vmem:[#allocation78_spill] sm:$0xff]  ;;  %v8221_v15 = vld [vmem:[#allocation52_spill] sm:$0xff] }
 0x60d   :  { %v3502_v34 = vadd.f32 %v6696_v1, %v8215_v42  ;;  %v4228_v47 = vsel %vm4227_vm3, %v4226_v2, %v4221_v36  ;;  %v4334_v18 = vrot.slane %v8221_v15, %v8200_v23  ;;  %v8222_v42 = vld [vmem:[#allocation80_spill] sm:$0xff]  ;;  %v4240_v2 = vrot.slane %v8226_v28, %v7428_v56 }
 0x60e   :  { %v3511_v36 = vadd.f32 %v6639_v32, %v8230_v45  ;;  %v3520_v28 = vadd.f32 %v6713_v60, %v7635_v43  ;;  %v3515_v43 = vadd.f32 %v6673_v6, %v7492_v24 }
 0x60f   :  { %v3675_v19 = vadd.f32 %v7680_v31, %v3502_v34  ;;  %v3514_v34 = vadd.f32 %v6665_v41, %v7523_v30 }
 0x610   :  { %4144 = vperm.xlu1 %5560, %v3673_v12   ;;  %4135 = vperm.xlu0 %5559, %v3670_v16   ;;  %v8216_v16 = vld [vmem:[#allocation11_spill] sm:$0xff] }
 0x611   :  { %v3507_v12 = vadd.f32 %v6730_v48, %v8216_v16  ;;  %v4235_v16 = vsel %vm4234_vm4, %v4233_v17, %v4228_v47  ;;  %v3687_v3 = vadd.f32 %v7720_v62, %v3514_v34  ;;  %v3519_v17 = vadd.f32 %v6709_v33, %v7619_v59  ;;  %v8233_v33 = vld [vmem:[#allocation10_spill] sm:$0xff] }
 0x612   :  { %v4242_v47 = vsel %vm4241_vm5, %v4240_v2, %v4235_v16  ;;  %v8234_v16 = vld [vmem:[#allocation84_spill] sm:$0xff]  ;;  %v8235_v2 = vld [vmem:[#allocation35_spill] sm:$0xff] }
 0x613   :  { %v3680_v50 = vadd.f32 %v7680_v31, %v3507_v12  ;;  %v8224_v12 = vld [vmem:[#allocation83_spill] sm:$0xff] }
 0x614   :  { %4138 = vperm.xlu1 %5560, %v3671_v4   ;;  %4153 = vperm.xlu0 %5559, %v3676_v35   ;;  %v3683_v4 = vadd.f32 %v7720_v62, %v3510_v40  ;;  %v3516_v35 = vadd.f32 %v6677_v49, %v7508_v8  ;;  %v3506_v49 = vadd.f32 %v6726_v9, %v8222_v42 }
 0x616   :  { %v3689_v8 = vadd.f32 %v7720_v62, %v3516_v35  ;;  %v3679_v30 = vadd.f32 %v7680_v31, %v3506_v49  ;;  %v8232_v49 = vld [vmem:[#allocation50_spill] sm:$0xff] }
 0x617   :  { %v4344_v34 = vrot.slane %v8232_v49, %v7428_v56  ;;  %v8241_v49 = vld [vmem:[#allocation5_spill] sm:$0xff] }
 0x618   :  { %4156 = vperm.xlu1 %5560, %v3677_v61   ;;  %4147 = vperm.xlu0 %5559, %v3674_v25   ;;  %v3678_v61 = vadd.f32 %v7680_v31, %v3505_v58 }
 0x61c   :  { %4150 = vperm.xlu1 %5560, %v3675_v19   ;;  %4180 = vperm.xlu0 %5559, %v3685_v63   ;;  %v4330_v19 = vrot.slane %v8223_v27, %v7398_v14  ;;  %v8225_v63 = vld [vmem:[#allocation37_spill] sm:$0xff] }
 0x61d   :  { %v4247_v40 = vrot.slane %v8225_v63, %v8224_v12  ;;  %v3509_v63 = vadd.f32 %v6647_v37, %v8234_v16  ;;  %v8236_v37 = vld [vmem:[#allocation57_spill] sm:$0xff] }
 0x61e   :  { %v4335_v41 = vsel %vm4227_vm3, %v4334_v18, %v4330_v19  ;;  %v3684_v19 = vadd.f32 %v7720_v62, %v3511_v36  ;;  %v4359_v45 = vrot.slane %v8236_v37, %v7448_v26 }
 0x61f   :  { %v7743_v25 = vpop.xlane.xlu0 %3307  ;;  %v3682_v60 = vadd.f32 %v7720_v62, %v3509_v63 }
 0x620   :  { %4165 = vperm.xlu1 %5560, %v3680_v50   ;;  %4174 = vperm.xlu0 %5559, %v3683_v4   ;;  %v8227_v50 = vld [vmem:[#allocation85_spill] sm:$0xff]  ;;  %v8229_v4 = vld [vmem:[#allocation51_spill] sm:$0xff] }
 0x621   :  { %v4254_v58 = vrot.slane %v8228_v5, %v8227_v50  ;;  %v4339_v35 = vrot.slane %v8229_v4, %v7411_v29  ;;  %v4354_v59 = vrot.slane %v8233_v33, %v8227_v50  ;;  %v4261_v5 = vrot.slane %v8235_v2, %v7448_v26 }
 0x622   :  { %v3513_v2 = vadd.f32 %v6659_v54, %v7500_v55  ;;  %v8245_v55 = vld [vmem:[#allocation41_spill] sm:$0xff] }
 0x623   :  { %v3302_v15 = vpop.xlane.xlu0 %3301  ;;  %v4340_v42 = vsel %vm4234_vm4, %v4339_v35, %v4335_v41 }
 0x624   :  { %4159 = vperm.xlu1 %5560, %v3678_v61   ;;  %4192 = vperm.xlu0 %5559, %v3689_v8   ;;  %v4249_v61 = vsel %vm4248_vm6, %v4247_v40, %v4242_v47  ;;  %v8231_v8 = vld [vmem:[#allocation58_spill] sm:$0xff]  ;;  %v3692_v40 = vadd.f32 %v7720_v62, %v3519_v17  ;;  %v3518_v17 = vadd.f32 %v6696_v1, %v7643_v53  ;;  %v8237_v47 = vld [vmem:[#allocation87_spill] sm:$0xff]  ;;  %v8243_v53 = vld [vmem:[#allocation9_spill] sm:$0xff] }
 0x625   :  { %v4349_v18 = vrot.slane %v8231_v8, %v8224_v12  ;;  %v4256_v32 = vsel %vm4255_vm7, %v4254_v58, %v4249_v61  ;;  %v4345_v58 = vsel %vm4241_vm5, %v4344_v34, %v4340_v42  ;;  %v8238_v61 = vld [vmem:[#allocation32_spill] sm:$0xff]  ;;  %v8239_v8 = vld [vmem:[#allocation86_spill] sm:$0xff]  ;;  %v4282_v34 = vrot.slane %v8241_v49, %v7466_v44  ;;  %v8246_v49 = vld [vmem:[#allocation63_spill] sm:$0xff] }
 0x626   :  { %v4268_v42 = vrot.slane %v8238_v61, %v8237_v47  ;;  %v4364_v63 = vrot.slane %v8243_v53, %v8237_v47  ;;  %v8249_v53 = vld [vmem:[#allocation12_spill] sm:$0xff] }
 0x627   :  { %v4350_v35 = vsel %vm4248_vm6, %v4349_v18, %v4345_v58  ;;  %v8240_v18 = vld [vmem:[#allocation42_spill] sm:$0xff]  ;;  %v3691_v58 = vadd.f32 %v7720_v62, %v3518_v17  ;;  %v3517_v17 = vadd.f32 %v6685_v46, %v7633_v38 }
 0x628   :  { %v7774_v27 = vpop.xlane.xlu1 %3310  ;;  %4162 = vperm.xlu1 %5560, %v3679_v30   ;;  %4186 = vperm.xlu0 %5559, %v3687_v3   ;;  %v4263_v30 = vsel %vm4262_vm8, %v4261_v5, %v4256_v32  ;;  %v4355_v36 = vsel %vm4255_vm7, %v4354_v59, %v4350_v35  ;;  %v3693_v3 = vadd.f32 %v7720_v62, %v3520_v28 }
 0x629   :  { %v4275_v32 = vrot.slane %v8240_v18, %v8239_v8  ;;  %v4360_v59 = vsel %vm4262_vm8, %v4359_v45, %v4355_v36  ;;  %v4270_v1 = vsel %vm4269_vm9, %v4268_v42, %v4263_v30  ;;  %v3688_v5 = vadd.f32 %v7720_v62, %v3515_v43 }
 0x62a   :  { %v3521_v35 = vadd.f32 %v6721_v10, %v3302_v15  ;;  %v4365_v45 = vsel %vm4269_vm9, %v4364_v63, %v4360_v59  ;;  %v4289_v43 = vrot.slane %v8245_v55, %v7514_v51  ;;  %v3686_v15 = vadd.f32 %v7720_v62, %v3513_v2 }
 0x62b   :  { %v3998_v4 = vpop.permute.xlu0 %3997  ;;  %v4277_v30 = vsel %vm4276_vm10, %v4275_v32, %v4270_v1 }
 0x62c   :  { %4177 = vperm.xlu1 %5560, %v3684_v19   ;;  %v3305_v41 = vpop.xlane.xlu1 %3304  ;;  %4201 = vperm.xlu0 %5559, %v3692_v40   ;;  %v8242_v19 = vld [vmem:[#allocation65_spill] sm:$0xff]  ;;  %v8244_v40 = vld [vmem:[#allocation66_spill] sm:$0xff]  ;;  %v3694_v61 = vadd.f32 %v7720_v62, %v3521_v35  ;;  %v4517_v42 = vrot.slane %v3998_v4, %v7448_v26 }
 0x62d   :  { %v4369_v6 = vrot.slane %v8242_v19, %v8239_v8  ;;  %v4374_v28 = vrot.slane %v8244_v40, %v7466_v44  ;;  %v3522_v18 = vadd.f32 %v6726_v9, %v3305_v41  ;;  %v8248_v41 = vld [vmem:[#allocation73_spill] sm:$0xff]  ;;  %v3690_v40 = vadd.f32 %v7720_v62, %v3517_v17 }
 0x62e   :  { %v4389_v1 = vrot.slane %v8248_v41, %v7530_v52  ;;  %v8256_v41 = vld [vmem:[#allocation72_spill] sm:$0xff] }
 0x62f   :  { %v3992_v33 = vpop.permute.xlu0 %3991  ;;  %v3695_v2 = vadd.f32 %v7720_v62, %v3522_v18 }
 0x630   :  { %v4507_v24 = vrot.slane %v3992_v33, %v8224_v12  ;;  %4171 = vperm.xlu1 %5560, %v3682_v60   ;;  %v4001_v16 = vpop.permute.xlu1 %4000  ;;  %4204 = vperm.xlu0 %5559, %v3693_v3   ;;  %v4284_v60 = vsel %vm4283_vm11, %v4282_v34, %v4277_v30  ;;  %v4370_v3 = vsel %vm4276_vm10, %v4369_v6, %v4365_v45  ;;  %v8247_v6 = vld [vmem:[#allocation64_spill] sm:$0xff]  ;;  %v8252_v45 = vld [vmem:[#allocation74_spill] sm:$0xff] }
 0x631   :  { %v4375_v10 = vsel %vm4283_vm11, %v4374_v28, %v4370_v3  ;;  %v4291_v32 = vsel %vm4290_vm12, %v4289_v43, %v4284_v60  ;;  %v4379_v34 = vrot.slane %v8246_v49, %v7514_v51  ;;  %v4522_v33 = vrot.slane %v4001_v16, %v8237_v47 }
 0x632   :  { %v4508_v37 = vsel %vm4248_vm6, %v4507_v24, %v7671_v0  ;;  %v4384_v24 = vrot.slane %v8247_v6, %v7526_v22  ;;  %v3508_v16 = vadd.f32 %v6732_v20, %v8249_v53  ;;  %v3523_v28 = vadd.f32 %v6730_v48, %v7743_v25  ;;  %v8253_v25 = vld [vmem:[#allocation45_spill] sm:$0xff] }
 0x633   :  { %v4010_v36 = vpop.permute.xlu0 %4009  ;;  %v4380_v9 = vsel %vm4290_vm12, %v4379_v34, %v4375_v10  ;;  %v4394_v60 = vrot.slane %v8252_v45, %v7549_v39  ;;  %v4310_v43 = vrot.slane %v8253_v25, %v7549_v39 }
 0x634   :  { %4189 = vperm.xlu1 %5560, %v3688_v5   ;;  %v3995_v54 = vpop.permute.xlu1 %3994  ;;  %4198 = vperm.xlu0 %5559, %v3691_v58   ;;  %v8250_v58 = vld [vmem:[#allocation40_spill] sm:$0xff]  ;;  %v3696_v17 = vadd.f32 %v7720_v62, %v3523_v28 }
 0x635   :  { %v4512_v0 = vrot.slane %v3995_v54, %v8227_v50  ;;  %v4296_v35 = vrot.slane %v8250_v58, %v7526_v22  ;;  %v4385_v54 = vsel %vm8061_vm13, %v4384_v24, %v4380_v9  ;;  %v8255_v24 = vld [vmem:[#allocation44_spill] sm:$0xff] }
 0x636   :  { %v4390_v10 = vsel %vm8062_vm14, %v4389_v1, %v4385_v54  ;;  %v4404_v1 = vrot.slane %v8256_v41, %v7559_v13 }
 0x637   :  { %v4513_v59 = vsel %vm4255_vm7, %v4512_v0, %v4508_v37  ;;  %v4004_v19 = vpop.permute.xlu0 %4003  ;;  %v8251_v37 = vld [vmem:[#allocation47_spill] sm:$0xff]  ;;  %v4298_v48 = vsel %vm8061_vm13, %v4296_v35, %v4291_v32  ;;  %v3681_v0 = vadd.f32 %v7680_v31, %v3508_v16  ;;  %v4395_v32 = vsel %vm4311_vm15, %v4394_v60, %v4390_v10 }
 0x638   :  { %v4518_v46 = vsel %vm4262_vm8, %v4517_v42, %v4513_v59  ;;  %v4527_v38 = vrot.slane %v4004_v19, %v8239_v8  ;;  %4183 = vperm.xlu1 %5560, %v3686_v15   ;;  %v4013_v4 = vpop.permute.xlu1 %4012  ;;  %4207 = vperm.xlu0 %5559, %v3694_v61   ;;  %v4303_v30 = vrot.slane %v8251_v37, %v7530_v52  ;;  %v8254_v59 = vld [vmem:[#allocation71_spill] sm:$0xff] }
 0x639   :  { %v4523_v63 = vsel %vm4269_vm9, %v4522_v33, %v4518_v46  ;;  %v3524_v61 = vadd.f32 %v6732_v20, %v7774_v27  ;;  %v4537_v42 = vrot.slane %v4010_v36, %v7514_v51  ;;  %v4542_v49 = vrot.slane %v4013_v4, %v7526_v22 }
 0x63a   :  { %v4528_v5 = vsel %vm4276_vm10, %v4527_v38, %v4523_v63  ;;  %v4305_v18 = vsel %vm8062_vm14, %v4303_v30, %v4298_v48  ;;  %v4399_v19 = vrot.slane %v8254_v59, %v7556_v21  ;;  %v4317_v46 = vrot.slane %v8255_v24, %v7556_v21 }
 0x63b   :  { %v4022_v3 = vpop.permute.xlu0 %4021  ;;  %v4312_v27 = vsel %vm4311_vm15, %v4310_v43, %v4305_v18  ;;  %v3697_v4 = vadd.f32 %v7720_v62, %v3524_v61 }
 0x63c   :  { %4195 = vperm.xlu1 %5560, %v3690_v40   ;;  %v4007_v55 = vpop.permute.xlu1 %4006  ;;  %4210 = vperm.xlu0 %5559, %v3695_v2   ;;  %v4400_v38 = vsel %vm4318_vm0, %v4399_v19, %v4395_v32  ;;  %v4319_v16 = vsel %vm4318_vm0, %v4317_v46, %v4312_v27  ;;  %v8257_v40 = vld [vmem:[#allocation43_spill] sm:$0xff]  ;;  %v4557_v62 = vrot.slane %v4022_v3, %v7556_v21 }
 0x63d   :  { %v4532_v15 = vrot.slane %v4007_v55, %v7466_v44  ;;  %v4324_v28 = vrot.slane %v8257_v40, %v7559_v13  ;;  %v4405_v2 = vsel %vm4325_vm1, %v4404_v1, %v4400_v38 }
 0x63f   :  { %v4533_v34 = vsel %vm4283_vm11, %v4532_v15, %v4528_v5  ;;  %v4016_v33 = vpop.permute.xlu0 %4015  ;;  %v4326_v58 = vsel %vm4325_vm1, %v4324_v28, %v4319_v16 }
 0x640   :  { %v4538_v31 = vsel %vm4290_vm12, %v4537_v42, %v4533_v34  ;;  %v4547_v6 = vrot.slane %v4016_v33, %v7530_v52  ;;  %4168 = vperm.xlu1 %5560, %v3681_v0   ;;  %v4025_v20 = vpop.permute.xlu1 %4024  ;;  %4213 = vperm.xlu0 %5559, %v3696_v17   ;;  %v4881_v45 = vsel %vm4880_vm2, %v4405_v2, %v4326_v58  ;;  %vm4886_vm2 = vcmask 1044484  }
 0x641   :  { %v4543_v36 = vsel %vm8061_vm13, %v4542_v49, %v4538_v31  ;;  %vm4882_vm13 = vcmask 1042434   ;;  %v4562_v35 = vrot.slane %v4025_v20, %v7559_v13 }
 0x642   :  { %v4548_v9 = vsel %vm8062_vm14, %v4547_v6, %v4543_v36  ;;  %vm4884_vm14 = vcmask 1043459   ;;  %v4883_v55 = vsel %vm4882_vm13, %v7574_v57, %v4881_v45  ;;  %vm8258_vm13 = vcmask 786112  }
 0x643   :  { %v4034_v53 = vpop.permute.xlu0 %4033 }
 0x644   :  { %4216 = vperm.xlu1 %5560, %v3697_v4   ;;  %v4019_v63 = vpop.permute.xlu1 %4018  ;;  %v4576_v0 = vrot.slane %v4034_v53, %v7411_v29 }
 0x645   :  { %v4552_v5 = vrot.slane %v4019_v63, %v7549_v39 }
 0x647   :  { %v4553_v37 = vsel %vm4311_vm15, %v4552_v5, %v4548_v9  ;;  %v4028_v30 = vpop.permute.xlu0 %4027 }
 0x648   :  { %v4558_v60 = vsel %vm4318_vm0, %v4557_v62, %v4553_v37  ;;  %v4037_v54 = vpop.permute.xlu1 %4036  ;;  %v4567_v3 = vrot.slane %v4028_v30, %v7398_v14 }
 0x649   :  { %v4563_v48 = vsel %vm4325_vm1, %v4562_v35, %v4558_v60  ;;  %v4581_v17 = vrot.slane %v4037_v54, %v7428_v56 }
 0x64a   :  { %v4885_v25 = vsel %vm4884_vm14, %v4563_v48, %v4883_v55  ;;  %vm8259_vm14 = vcmask 851712  }
 0x64b   :  { %v4046_v43 = vpop.permute.xlu0 %4045 }
 0x64c   :  { %v4031_v10 = vpop.permute.xlu1 %4030  ;;  %v4596_v31 = vrot.slane %v4046_v43, %v7448_v26 }
 0x64d   :  { %v4571_v15 = vrot.slane %v4031_v10, %v8200_v23 }
 0x64f   :  { %v4572_v61 = vsel %vm4227_vm3, %v4571_v15, %v4567_v3  ;;  %v4040_v42 = vpop.permute.xlu0 %4039 }
 0x650   :  { %v4577_v18 = vsel %vm4234_vm4, %v4576_v0, %v4572_v61  ;;  %v4586_v57 = vrot.slane %v4040_v42, %v8224_v12  ;;  %v4049_v32 = vpop.permute.xlu1 %4048 }
 0x651   :  { %v4582_v49 = vsel %vm4241_vm5, %v4581_v17, %v4577_v18  ;;  %v4601_v6 = vrot.slane %v4049_v32, %v8237_v47 }
 0x652   :  { %v4587_v34 = vsel %vm4248_vm6, %v4586_v57, %v4582_v49 }
 0x653   :  { %v4058_v33 = vpop.permute.xlu0 %4057 }
 0x654   :  { %v4043_v59 = vpop.permute.xlu1 %4042  ;;  %v4616_v53 = vrot.slane %v4058_v33, %v7514_v51 }
 0x655   :  { %v4591_v19 = vrot.slane %v4043_v59, %v8227_v50 }
 0x657   :  { %v4592_v20 = vsel %vm4255_vm7, %v4591_v19, %v4587_v34  ;;  %v4052_v27 = vpop.permute.xlu0 %4051 }
 0x658   :  { %v4597_v36 = vsel %vm4262_vm8, %v4596_v31, %v4592_v20  ;;  %v4606_v24 = vrot.slane %v4052_v27, %v8239_v8  ;;  %v4061_v46 = vpop.permute.xlu1 %4060 }
 0x659   :  { %v4602_v38 = vsel %vm4269_vm9, %v4601_v6, %v4597_v36  ;;  %v4621_v16 = vrot.slane %v4061_v46, %v7526_v22 }
 0x65a   :  { %v4607_v4 = vsel %vm4276_vm10, %v4606_v24, %v4602_v38 }
 0x65b   :  { %v4070_v9 = vpop.permute.xlu0 %4069 }
 0x65c   :  { %v4055_v41 = vpop.permute.xlu1 %4054  ;;  %v4636_v45 = vrot.slane %v4070_v9, %v7556_v21 }
 0x65d   :  { %v4611_v1 = vrot.slane %v4055_v41, %v7466_v44 }
 0x65f   :  { %v4612_v63 = vsel %vm4283_vm11, %v4611_v1, %v4607_v4  ;;  %v4064_v40 = vpop.permute.xlu0 %4063 }
 0x660   :  { %v4617_v28 = vsel %vm4290_vm12, %v4616_v53, %v4612_v63  ;;  %v4626_v2 = vrot.slane %v4064_v40, %v7530_v52  ;;  %v4073_v5 = vpop.permute.xlu1 %4072 }
 0x661   :  { %v4622_v62 = vsel %vm8258_vm13, %v4621_v16, %v4617_v28  ;;  %v4641_v60 = vrot.slane %v4073_v5, %v7559_v13 }
 0x662   :  { %v4627_v58 = vsel %vm8259_vm14, %v4626_v2, %v4622_v62 }
 0x663   :  { %v4082_v35 = vpop.permute.xlu0 %4081 }
 0x664   :  { %v4067_v37 = vpop.permute.xlu1 %4066  ;;  %v4655_v42 = vrot.slane %v4082_v35, %v7411_v29 }
 0x665   :  { %v4631_v30 = vrot.slane %v4067_v37, %v7549_v39 }
 0x667   :  { %v4632_v54 = vsel %vm4311_vm15, %v4631_v30, %v4627_v58  ;;  %v4076_v55 = vpop.permute.xlu0 %4075 }
 0x668   :  { %v4637_v48 = vsel %vm4318_vm0, %v4636_v45, %v4632_v54  ;;  %v4085_v43 = vpop.permute.xlu1 %4084  ;;  %v4646_v17 = vrot.slane %v4076_v55, %v7398_v14 }
 0x669   :  { %v4642_v10 = vsel %vm4325_vm1, %v4641_v60, %v4637_v48  ;;  %v4660_v18 = vrot.slane %v4085_v43, %v7428_v56 }
 0x66a   :  { %v4887_v3 = vsel %vm4886_vm2, %v4642_v10, %v4885_v25  ;;  %vm4888_vm2 = vcmask 1045509  }
 0x66b   :  { %v4094_v15 = vpop.permute.xlu0 %4093 }
 0x66c   :  { %v4079_v0 = vpop.permute.xlu1 %4078  ;;  %v4675_v20 = vrot.slane %v4094_v15, %v7448_v26 }
 0x66d   :  { %v4650_v61 = vrot.slane %v4079_v0, %v8200_v23 }
 0x66f   :  { %v4651_v57 = vsel %vm4227_vm3, %v4650_v61, %v4646_v17  ;;  %v4088_v32 = vpop.permute.xlu0 %4087 }
 0x670   :  { %v4656_v49 = vsel %vm4234_vm4, %v4655_v42, %v4651_v57  ;;  %v4665_v34 = vrot.slane %v4088_v32, %v8224_v12  ;;  %v4097_v33 = vpop.permute.xlu1 %4096 }
 0x671   :  { %v4661_v25 = vsel %vm4241_vm5, %v4660_v18, %v4656_v49  ;;  %v4680_v27 = vrot.slane %v4097_v33, %v8237_v47 }
 0x672   :  { %v4666_v59 = vsel %vm4248_vm6, %v4665_v34, %v4661_v25 }
 0x673   :  { %v4106_v19 = vpop.permute.xlu0 %4105 }
 0x674   :  { %v4091_v31 = vpop.permute.xlu1 %4090  ;;  %v4695_v63 = vrot.slane %v4106_v19, %v7514_v51 }
 0x675   :  { %v4670_v6 = vrot.slane %v4091_v31, %v8227_v50 }
 0x677   :  { %v4671_v36 = vsel %vm4255_vm7, %v4670_v6, %v4666_v59  ;;  %v4100_v24 = vpop.permute.xlu0 %4099 }
 0x678   :  { %v4676_v46 = vsel %vm4262_vm8, %v4675_v20, %v4671_v36  ;;  %v4685_v38 = vrot.slane %v4100_v24, %v8239_v8  ;;  %v4109_v4 = vpop.permute.xlu1 %4108 }
 0x679   :  { %v4681_v9 = vsel %vm4269_vm9, %v4680_v27, %v4676_v46  ;;  %v4700_v40 = vrot.slane %v4109_v4, %v7526_v22 }
 0x67a   :  { %v4686_v41 = vsel %vm4276_vm10, %v4685_v38, %v4681_v9 }
 0x67b   :  { %v4118_v1 = vpop.permute.xlu0 %4117 }
 0x67c   :  { %v4103_v53 = vpop.permute.xlu1 %4102  ;;  %v4715_v60 = vrot.slane %v4118_v1, %v7556_v21 }
 0x67d   :  { %v4690_v16 = vrot.slane %v4103_v53, %v7466_v44 }
 0x67f   :  { %v4691_v28 = vsel %vm4283_vm11, %v4690_v16, %v4686_v41  ;;  %v4112_v2 = vpop.permute.xlu0 %4111 }
 0x680   :  { %v4696_v5 = vsel %vm4290_vm12, %v4695_v63, %v4691_v28  ;;  %v4121_v62 = vpop.permute.xlu1 %4120  ;;  %v4705_v35 = vrot.slane %v4112_v2, %v7530_v52 }
 0x681   :  { %v4701_v58 = vsel %vm8258_vm13, %v4700_v40, %v4696_v5  ;;  %v4720_v55 = vrot.slane %v4121_v62, %v7559_v13 }
 0x682   :  { %v4706_v54 = vsel %vm8259_vm14, %v4705_v35, %v4701_v58 }
 0x683   :  { %v4130_v37 = vpop.permute.xlu0 %4129 }
 0x684   :  { %v4115_v30 = vpop.permute.xlu1 %4114  ;;  %v4734_v24 = vrot.slane %v4130_v37, %v7411_v29 }
 0x685   :  { %v4710_v45 = vrot.slane %v4115_v30, %v7549_v39 }
 0x687   :  { %v4711_v48 = vsel %vm4311_vm15, %v4710_v45, %v4706_v54  ;;  %v4124_v43 = vpop.permute.xlu0 %4123 }
 0x688   :  { %v4716_v10 = vsel %vm4318_vm0, %v4715_v60, %v4711_v48  ;;  %v4133_v15 = vpop.permute.xlu1 %4132  ;;  %v4725_v20 = vrot.slane %v4124_v43, %v7398_v14 }
 0x689   :  { %v4721_v0 = vsel %vm4325_vm1, %v4720_v55, %v4716_v10  ;;  %v4739_v4 = vrot.slane %v4133_v15, %v7428_v56 }
 0x68a   :  { %v7965_v17 = vsel %vm4888_vm2, %v4721_v0, %v4887_v3 }
 0x68b   :  { %v4142_v61 = vpop.permute.xlu0 %4141 }
 0x68c   :  { %v4127_v42 = vpop.permute.xlu1 %4126  ;;  %v4754_v2 = vrot.slane %v4142_v61, %v7448_v26 }
 0x68d   :  { %v4729_v31 = vrot.slane %v4127_v42, %v8200_v23 }
 0x68f   :  { %v4136_v18 = vpop.permute.xlu0 %4135  ;;  %v4730_v3 = vsel %vm4227_vm3, %v4729_v31, %v4725_v20 }
 0x690   :  { %v4145_v57 = vpop.permute.xlu1 %4144  ;;  %v4735_v46 = vsel %vm4234_vm4, %v4734_v24, %v4730_v3  ;;  %v4744_v41 = vrot.slane %v4136_v18, %v8224_v12 }
 0x691   :  { %v4740_v1 = vsel %vm4241_vm5, %v4739_v4, %v4735_v46  ;;  %v4759_v37 = vrot.slane %v4145_v57, %v8237_v47 }
 0x692   :  { %v4745_v40 = vsel %vm4248_vm6, %v4744_v41, %v4740_v1 }
 0x693   :  { %v4154_v32 = vpop.permute.xlu0 %4153 }
 0x694   :  { %v4139_v49 = vpop.permute.xlu1 %4138  ;;  %v4774_v18 = vrot.slane %v4154_v32, %v7514_v51 }
 0x695   :  { %v4749_v53 = vrot.slane %v4139_v49, %v8227_v50 }
 0x697   :  { %v4148_v34 = vpop.permute.xlu0 %4147  ;;  %v4750_v28 = vsel %vm4255_vm7, %v4749_v53, %v4745_v40 }
 0x698   :  { %v4157_v33 = vpop.permute.xlu1 %4156  ;;  %v4755_v58 = vsel %vm4262_vm8, %v4754_v2, %v4750_v28  ;;  %v4764_v45 = vrot.slane %v4148_v34, %v8239_v8 }
 0x699   :  { %v4760_v54 = vsel %vm4269_vm9, %v4759_v37, %v4755_v58 }
 0x69a   :  { %v4765_v15 = vsel %vm4276_vm10, %v4764_v45, %v4760_v54 }
 0x69b   :  { %v4181_v25 = vpop.permute.xlu0 %4180 }
 0x69c   :  { %v4151_v59 = vpop.permute.xlu1 %4150  ;;  %v4818_v61 = vrot.slane %v4181_v25, %v7428_v56  ;;  %v4779_v25 = vrot.slane %v4157_v33, %v7526_v22 }
 0x69d   :  { %v4769_v55 = vrot.slane %v4151_v59, %v7466_v44 }
 0x69f   :  { %v4175_v19 = vpop.permute.xlu0 %4174 }
 0x6a0   :  { %v7968_v6 = vpop.permute.xlu1 %4165  ;;  %v4808_v30 = vrot.slane %v4175_v19, %v8200_v23  ;;  %v4770_v23 = vsel %vm4283_vm11, %v4769_v55, %v4765_v15 }
 0x6a1   :  { %v4794_v1 = vrot.slane %v7968_v6, %v7556_v21 }
 0x6a3   :  { %v4193_v27 = vpop.permute.xlu0 %4192 }
 0x6a4   :  { %v4160_v36 = vpop.permute.xlu1 %4159  ;;  %v4838_v20 = vrot.slane %v4193_v27, %v8237_v47 }
 0x6a5   :  { %v4784_v59 = vrot.slane %v4160_v36, %v7530_v52 }
 0x6a7   :  { %v4187_v38 = vpop.permute.xlu0 %4186 }
 0x6a8   :  { %v4163_v9 = vpop.permute.xlu1 %4162  ;;  %v4828_v49 = vrot.slane %v4187_v38, %v8227_v50 }
 0x6a9   :  { %v4789_v32 = vrot.slane %v4163_v9, %v7549_v39 }
 0x6ab   :  { %v4202_v16 = vpop.permute.xlu0 %4201 }
 0x6ac   :  { %v4178_v63 = vpop.permute.xlu1 %4177  ;;  %v4853_v33 = vrot.slane %v4202_v16, %v7514_v51 }
 0x6ad   :  { %v4813_v10 = vrot.slane %v4178_v63, %v7411_v29  ;;  %v4775_v29 = vsel %vm4290_vm12, %v4774_v18, %v4770_v23 }
 0x6af   :  { %v4205_v5 = vpop.permute.xlu0 %4204 }
 0x6b0   :  { %v4172_v62 = vpop.permute.xlu1 %4171  ;;  %v4858_v4 = vrot.slane %v4205_v5, %v7526_v22 }
 0x6b1   :  { %v4804_v35 = vrot.slane %v4172_v62, %v7398_v14 }
 0x6b3   :  { %v4199_v60 = vpop.permute.xlu0 %4198  ;;  %v4809_v48 = vsel %vm4227_vm3, %v4808_v30, %v4804_v35  ;;  %vm8260_vm3 = vmmov %vm8258_vm13 }
 0x6b4   :  { %v4190_v43 = vpop.permute.xlu1 %4189  ;;  %v4814_v14 = vsel %vm4234_vm4, %v4813_v10, %v4809_v48  ;;  %v4780_v36 = vsel %vm8260_vm3, %v4779_v25, %v4775_v29  ;;  %vm8261_vm4 = vmmov %vm8259_vm14 }
 0x6b5   :  { %v4819_v34 = vsel %vm4241_vm5, %v4818_v61, %v4814_v14  ;;  %v4833_v19 = vrot.slane %v4190_v43, %v7448_v26  ;;  %v4848_v26 = vrot.slane %v4199_v60, %v7466_v44  ;;  %v4785_v38 = vsel %vm8261_vm4, %v4784_v59, %v4780_v36  ;;  %vm8262_vm5 = vmmov %vm8260_vm3 }
 0x6b6   :  { %v4790_v27 = vsel %vm4311_vm15, %v4789_v32, %v4785_v38 }
 0x6b7   :  { %v4208_v0 = vpop.permute.xlu0 %4207  ;;  %v4795_v28 = vsel %vm4318_vm0, %v4794_v1, %v4790_v27 }
 0x6b8   :  { %v4184_v42 = vpop.permute.xlu1 %4183  ;;  %v4863_v44 = vrot.slane %v4208_v0, %v7530_v52 }
 0x6b9   :  { %v4823_v57 = vrot.slane %v4184_v42, %v8224_v12 }
 0x6bb   :  { %v4824_v31 = vsel %vm4248_vm6, %v4823_v57, %v4819_v34  ;;  %v4211_v56 = vpop.permute.xlu0 %4210  ;;  %vm8263_vm6 = vmmov %vm8261_vm4 }
 0x6bc   :  { %v4829_v12 = vsel %vm4255_vm7, %v4828_v49, %v4824_v31  ;;  %v4196_v50 = vpop.permute.xlu1 %4195  ;;  %v4868_v51 = vrot.slane %v4211_v56, %v7549_v39  ;;  %vm4890_vm7 = vcmask 1046534  }
 0x6bd   :  { %v4834_v3 = vsel %vm4262_vm8, %v4833_v19, %v4829_v12  ;;  %v4843_v24 = vrot.slane %v4196_v50, %v8239_v8  ;;  %vm4892_vm8 = vcmask 1047559  }
 0x6be   :  { %v4839_v46 = vsel %vm4269_vm9, %v4838_v20, %v4834_v3  ;;  %vm3705_vm9 = vcmp.lt.s32.totalorder %v7379_v11, %v5666_v7 }
 0x6bf   :  { %v4844_v47 = vsel %vm4276_vm10, %v4843_v24, %v4839_v46  ;;  %v4214_v41 = vpop.permute.xlu0 %4213 }
 0x6c0   :  { %v4849_v9 = vsel %vm4283_vm11, %v4848_v26, %v4844_v47  ;;  %v4169_v8 = vpop.permute.xlu1 %4168  ;;  %v4873_v22 = vrot.slane %v4214_v41, %v7556_v21 }
 0x6c1   :  { %v4854_v53 = vsel %vm4290_vm12, %v4853_v33, %v4849_v9  ;;  %v4799_v63 = vrot.slane %v4169_v8, %v7559_v13 }
 0x6c2   :  { %v4859_v16 = vsel %vm8262_vm5, %v4858_v4, %v4854_v53 }
 0x6c3   :  { %v4864_v40 = vsel %vm8263_vm6, %v4863_v44, %v4859_v16  ;;  %v4800_v6 = vsel %vm4325_vm1, %v4799_v63, %v4795_v28 }
 0x6c4   :  { %v4869_v2 = vsel %vm4311_vm15, %v4868_v51, %v4864_v40  ;;  %v4217_v52 = vpop.permute.xlu1 %4216  ;;  %v4891_v39 = vsel %vm4890_vm7, %v4800_v6, %v7965_v17 }
 0x6c5   :  { %v4874_v5 = vsel %vm4318_vm0, %v4873_v22, %v4869_v2  ;;  %v4878_v62 = vrot.slane %v4217_v52, %v7559_v13 }
 0x6c7   :  { %v4879_v21 = vsel %vm4325_vm1, %v4878_v62, %v4874_v5 }
 0x6c8   :  { %v4893_v58 = vsel %vm4892_vm8, %v4879_v21, %v4891_v39 }
 0x6c9   :  { %v4895_v35 = vsel %vm3705_vm9, %v4893_v58, -1e+09 }
 0x6ca   :  { %4896 = vst [vmem:[%s8049_s11] sm:$0xff] %v4895_v35 }

</bundles_post_ra>
